<compile_context>
chip_gen: v7x
topology: tpu7x:2x2x1
jax: 0.10.0
libtpu: 0.0.40
codegen_flags: <defaults>
</compile_context>

<pallas_src>
import functools

import jax
import jax.numpy as jnp
from jax.experimental import pallas as pl
from jax.experimental.pallas import tpu as pltpu

HIDDEN = 2048  # fixed by the module definition (nn.Linear(dim, 2048))


def _round_up(x, m):
    return (x + m - 1) // m * m


def _tpu_generation():
    """Best-effort TPU generation (5 / 6 / 7), or None if unknown."""
    try:
        kind = jax.devices()[0].device_kind.lower()
    except Exception:
        return None
    for g in (7, 6, 5):
        if f"v{g}" in kind:
            return g
    return None


def _vmem_capacity_bytes():
    try:
        return int(pltpu.get_tpu_info().vmem_capacity_bytes)
    except Exception:
        return 64 * 1024 * 1024  # conservative default (v7x per-TC size)


def _use_bf16_elementwise():
    gen = _tpu_generation()
    # v6e/v7x have bf16 VPU lanes -> bf16 bias+ReLU halves vreg traffic; v5e does not.
    return gen is None or gen >= 6


def _spec(shape, index_map, *, single_buffered=False):
    """BlockSpec helper; grid-constant operands are single-buffered when supported."""
    if single_buffered:
        try:
            return pl.BlockSpec(shape, index_map, pipeline_mode=pl.Buffered(1))
        except Exception:  # older jax without pipeline_mode / Buffered
            pass
    return pl.BlockSpec(shape, index_map)


def _ffn_kernel_resident(x_ref, w1_ref, b1_ref, w2_ref, b2_ref, o_ref,
                         *, bf16_elementwise):
    """One grid step = one (tm, dim) token tile, full FFN. Weights stay VMEM-resident.

    x_ref : (tm, dim)    native-dtype token tile (cast to bf16 in-kernel)
    w1_ref: (dim, 2048)  bf16, resident (constant index_map, single-buffered)
    b1_ref: (1, 2048)    f32, resident
    w2_ref: (2048, dim)  bf16, resident
    b2_ref: (1, dim)     f32, resident
    o_ref : (tm, dim)    output tile (x.dtype)
    """
    x = x_ref[...].astype(jnp.bfloat16)  # in-kernel cast, hidden under the MXU
    h = jnp.dot(x, w1_ref[...], preferred_element_type=jnp.float32)
    if bf16_elementwise:
        h = jnp.maximum(h.astype(jnp.bfloat16) + b1_ref[...].astype(jnp.bfloat16), 0.0)
    else:
        h = jnp.maximum(h + b1_ref[...], 0.0).astype(jnp.bfloat16)
    y = jnp.dot(h, w2_ref[...], preferred_element_type=jnp.float32)
    o_ref[...] = (y + b2_ref[...]).astype(o_ref.dtype)


def _ffn_kernel_kblocked(x_ref, w1_ref, b1_ref, w2_ref, b2_ref, o_ref, acc_ref,
                         *, bf16_elementwise):
    """2-D grid (M tile, HIDDEN block): the hidden reduction is accumulated in f32."""
    k = pl.program_id(1)

    @pl.when(k == 0)
    def _():
        acc_ref[...] = jnp.zeros_like(acc_ref)

    x = x_ref[...].astype(jnp.bfloat16)
    h = jnp.dot(x, w1_ref[...], preferred_element_type=jnp.float32)
    if bf16_elementwise:
        h = jnp.maximum(h.astype(jnp.bfloat16) + b1_ref[...].astype(jnp.bfloat16), 0.0)
    else:
        h = jnp.maximum(h + b1_ref[...], 0.0).astype(jnp.bfloat16)
    acc_ref[...] += jnp.dot(h, w2_ref[...], preferred_element_type=jnp.float32)

    @pl.when(k == pl.num_programs(1) - 1)
    def _():
        o_ref[...] = (acc_ref[...] + b2_ref[...]).astype(o_ref.dtype)


def _choose_tm(m, align, cap):
    """Token-tile rows: sublane-aligned, <= cap, preferring exact divisors of m (no pad)."""
    cap = max(8, cap - cap % 8)
    if m <= cap:
        return min(cap, _round_up(m, 8))  # one full tile (pad only up to the 8-row sublane)
    if cap < align:
        return cap
    t = (cap // align) * align
    while t >= align:                     # largest MXU-aligned divisor of m -> no wrapper pad
        if m % t == 0:
            return t
        t -= align
    return max(align, (cap // align) * align)


@functools.partial(jax.jit, static_argnames=("force_k_blocked", "single_buffer_resident"))
def position_feed_forward(x, w1, b1, w2, b2, *,
                          force_k_blocked=False, single_buffer_resident=True):
    """x: [..., dim] -> [..., dim] (same forward semantics as the PyTorch module).

    Expects pre-prepared params (see prepare_params):
      w1: (dim, 2048) bf16, b1: (1, 2048) f32, w2: (2048, dim) bf16, b2: (1, dim) f32.
    """
    *lead, dim = x.shape
    m = 1
    for d in lead:
        m *= d

    out_dtype = x.dtype
    x_b = jnp.dtype(x.dtype).itemsize
    out_b = jnp.dtype(out_dtype).itemsize

    gen = _tpu_generation()
    bf16_elementwise = _use_bf16_elementwise()
    vmem_budget = int(_vmem_capacity_bytes() * 0.78)   # ~50 MiB (v7x) / ~100 MiB (v5e, v6e)
    align = 128 if gen == 5 else 256                   # MXU tile: 4x128^2 (v5e) vs 2x256^2
    tm_max = 1024 if gen in (5, 6) else 512            # 128-MiB parts afford bigger tiles

    x2 = x.reshape(m, dim)

    # --- Resident-weights design: W1+W2 (bf16, single-buffered) live in VMEM across M ---
    weight_bytes = 2 * dim * HIDDEN * 2                # W1 + W2 in bf16
    if not single_buffer_resident:
        weight_bytes *= 2                              # double-buffered copies
    bias_bytes = 2 * (HIDDEN + dim) * 4
    slack = 2 * 1024 * 1024                            # Mosaic internal scratch headroom
    per_row = 2 * dim * x_b + 2 * dim * out_b + HIDDEN * (4 + 2)  # tiles + hidden act (f32+bf16)
    rows_budget = (vmem_budget - weight_bytes - bias_bytes - slack) // per_row
    use_resident = (not force_k_blocked) and rows_budget >= 8

    if use_resident:
        cap = min(tm_max, (rows_budget // 8) * 8)
        if gen == 7 and m >= 2 * align:
            # Feed both v7x TensorCores: force >= 2 grid steps along the parallel M axis.
            cap = min(cap, _round_up((m + 1) // 2, align))
        tm = _choose_tm(m, align, cap)
        m_pad = _round_up(m, tm)
        if m_pad != m:
            x2 = jnp.pad(x2, ((0, m_pad - m), (0, 0)))

        est = weight_bytes + bias_bytes + per_row * tm
        vmem_limit = min(vmem_budget, max(32 * 1024 * 1024, int(est * 1.5)))

        kernel = functools.partial(_ffn_kernel_resident, bf16_elementwise=bf16_elementwise)
        out = pl.pallas_call(
            kernel,
            out_shape=jax.ShapeDtypeStruct((m_pad, dim), out_dtype),
            grid_spec=pltpu.PrefetchScalarGridSpec(
                num_scalar_prefetch=0,
                grid=(m_pad // tm,),
                in_specs=[
                    pl.BlockSpec((tm, dim), lambda i: (i, 0)),                       # x tile
                    _spec((dim, HIDDEN), lambda i: (0, 0),
                          single_buffered=single_buffer_resident),                   # W1
                    _spec((1, HIDDEN), lambda i: (0, 0),
                          single_buffered=single_buffer_resident),                   # b1
                    _spec((HIDDEN, dim), lambda i: (0, 0),
                          single_buffered=single_buffer_resident),                   # W2
                    _spec((1, dim), lambda i: (0, 0),
                          single_buffered=single_buffer_resident),                   # b2
                ],
                out_specs=pl.BlockSpec((tm, dim), lambda i: (i, 0)),
            ),
            compiler_params=pltpu.CompilerParams(
                dimension_semantics=("parallel",),     # M tiles are independent (megacore)
                vmem_limit_bytes=vmem_limit,
            ),
        )(x2, w1, b1, w2, b2)
    else:
        # --- Fallback: 2-D (M, HIDDEN) grid, f32 accumulator over the hidden reduction ---
        tk = 512                                       # divides HIDDEN, multiple of 128
        per_row_k = 2 * dim * x_b + 2 * dim * out_b + dim * 4 + tk * (4 + 2)
        fixed_k = 2 * 2 * dim * tk * 2 + bias_bytes + slack   # double-buffered W1/W2 blocks
        rows_budget_k = max(8, (vmem_budget - fixed_k) // per_row_k)
        cap = min(tm_max, (rows_budget_k // 8) * 8)
        if gen == 7 and m >= 2 * align:
            cap = min(cap, _round_up((m + 1) // 2, align))
        tm = _choose_tm(m, align, cap)
        m_pad = _round_up(m, tm)
        if m_pad != m:
            x2 = jnp.pad(x2, ((0, m_pad - m), (0, 0)))

        est = fixed_k + per_row_k * tm
        vmem_limit = min(vmem_budget, max(32 * 1024 * 1024, int(est * 1.5)))

        kernel = functools.partial(_ffn_kernel_kblocked, bf16_elementwise=bf16_elementwise)
        out = pl.pallas_call(
            kernel,
            out_shape=jax.ShapeDtypeStruct((m_pad, dim), out_dtype),
            grid_spec=pltpu.PrefetchScalarGridSpec(
                num_scalar_prefetch=0,
                grid=(m_pad // tm, HIDDEN // tk),
                in_specs=[
                    pl.BlockSpec((tm, dim), lambda i, k: (i, 0)),                    # x tile
                    pl.BlockSpec((dim, tk), lambda i, k: (0, k)),                    # W1 block
                    pl.BlockSpec((1, tk), lambda i, k: (0, k)),                      # b1 block
                    pl.BlockSpec((tk, dim), lambda i, k: (k, 0)),                    # W2 block
                    _spec((1, dim), lambda i, k: (0, 0),
                          single_buffered=single_buffer_resident),                   # b2
                ],
                out_specs=pl.BlockSpec((tm, dim), lambda i, k: (i, 0)),
                scratch_shapes=[pltpu.VMEM((tm, dim), jnp.float32)],
            ),
            compiler_params=pltpu.CompilerParams(
                dimension_semantics=("parallel", "arbitrary"),
                vmem_limit_bytes=vmem_limit,
            ),
        )(x2, w1, b1, w2, b2)

    out = out[:m]
    return out.reshape(*lead, dim)


def init_params(key, dim):
    """Deterministic f32 init matching the PyTorch parameter shapes (transposed storage).

    torch Linear(dim, 2048): weight (2048, dim), bias (2048,) -> stored as w1 (dim, 2048)
    torch Linear(2048, dim): weight (dim, 2048), bias (dim,)  -> stored as w2 (2048, dim)
    (Forward semantics x @ W^T + b are identical.)
    """
    k1, k2, k3, k4 = jax.random.split(key, 4)
    bound1 = 1.0 / (dim ** 0.5)
    bound2 = 1.0 / (HIDDEN ** 0.5)
    w1 = jax.random.uniform(k1, (dim, HIDDEN), jnp.float32, -bound1, bound1)
    b1 = jax.random.uniform(k2, (HIDDEN,), jnp.float32, -bound1, bound1)
    w2 = jax.random.uniform(k3, (HIDDEN, dim), jnp.float32, -bound2, bound2)
    b2 = jax.random.uniform(k4, (dim,), jnp.float32, -bound2, bound2)
    return w1, b1, w2, b2


def prepare_params(w1, b1, w2, b2):
    """One-time conversion for the kernel (done OUTSIDE the jitted call):
    weights -> bf16 (MXU inputs), biases -> 2-D f32 rows."""
    dim = w1.shape[0]
    return (w1.astype(jnp.bfloat16),
            b1.reshape(1, HIDDEN).astype(jnp.float32),
            w2.astype(jnp.bfloat16),
            b2.reshape(1, dim).astype(jnp.float32))


if __name__ == "__main__":
    key = jax.random.PRNGKey(0)
    batch, seq, dim = 2, 8, 128          # dim multiple of 128 -> lane-dense stores
    kx, kp = jax.random.split(key)
    x = jax.random.normal(kx, (batch, seq, dim), jnp.float32)
    w1, b1, w2, b2 = init_params(kp, dim)
    w1k, b1k, w2k, b2k = jax.block_until_ready(prepare_params(w1, b1, w2, b2))

    def run(**kw):
        try:
            return jax.block_until_ready(
                position_feed_forward(x, w1k, b1k, w2k, b2k, **kw))
        except Exception:
            # TODO(synk): drop this retry once pl.Buffered(1) single-buffering of
            # grid-constant operands is supported on every deployed jax/Mosaic version.
            return jax.block_until_ready(
                position_feed_forward(x, w1k, b1k, w2k, b2k,
                                      single_buffer_resident=False, **kw))

    out = run()                                   # resident-weights path
    assert out.shape == (batch, seq, dim)
    assert out.dtype == x.dtype

    out_kb = run(force_k_blocked=True)            # K-blocked fallback path (coverage)

    # Full-precision reference (module semantics); loose tolerance for bf16 MXU inputs.
    ref_f32 = jnp.maximum(x @ w1 + b1, 0.0) @ w2 + b2
    assert jnp.allclose(out, ref_f32, atol=7.5e-2, rtol=7.5e-2)
    assert jnp.allclose(out_kb, ref_f32, atol=7.5e-2, rtol=7.5e-2)
    assert jnp.allclose(out, out_kb, atol=2e-2, rtol=2e-2)

    print("KERNEL_OK")
</pallas_src>

<mosaic_0001>
module attributes {stable_mosaic.version = 11 : i64} {
  func.func @_ffn_kernel_resident(%arg0: i32, %arg1: memref<16x128xf32, #tpu.memory_space<vmem>>, %arg2: memref<128x2048xbf16, #tpu.memory_space<vmem>>, %arg3: memref<1x2048xf32, #tpu.memory_space<vmem>>, %arg4: memref<2048x128xbf16, #tpu.memory_space<vmem>>, %arg5: memref<1x128xf32, #tpu.memory_space<vmem>>, %arg6: memref<16x128xf32, #tpu.memory_space<vmem>>) attributes {dimension_semantics = [#tpu.dimension_semantics<parallel>], iteration_bounds = array<i64: 1>, scalar_prefetch = 0 : i64, scratch_operands = 0 : i64, tpu.core_type = #tpu.core_type<tc>, window_params = [{transform_indices = @transform_0, window_bounds = array<i64: 16, 128>}, {pipeline_mode = #tpu.pipeline_mode<synchronous>, transform_indices = @transform_1, window_bounds = array<i64: 128, 2048>}, {pipeline_mode = #tpu.pipeline_mode<synchronous>, transform_indices = @transform_2, window_bounds = array<i64: 1, 2048>}, {pipeline_mode = #tpu.pipeline_mode<synchronous>, transform_indices = @transform_3, window_bounds = array<i64: 2048, 128>}, {pipeline_mode = #tpu.pipeline_mode<synchronous>, transform_indices = @transform_4, window_bounds = array<i64: 1, 128>}, {transform_indices = @transform_5, window_bounds = array<i64: 16, 128>}]} {
    %c0 = arith.constant 0 : index
    %c0_0 = arith.constant 0 : index
    %0 = vector.load %arg1[%c0, %c0_0] : memref<16x128xf32, #tpu.memory_space<vmem>>, vector<16x128xf32>
    %1 = arith.truncf %0 : vector<16x128xf32> to vector<16x128xbf16>
    %c0_1 = arith.constant 0 : index
    %c0_2 = arith.constant 0 : index
    %2 = vector.load %arg2[%c0_1, %c0_2] : memref<128x2048xbf16, #tpu.memory_space<vmem>>, vector<128x2048xbf16>
    %cst = arith.constant dense<0.000000e+00> : vector<16x2048xf32>
    %3 = tpu.matmul %1, %2, %cst {dimension_numbers = #tpu.dot_dimension_numbers<[1], [0], [0], [1], [0, 0, 1, 1], [], []>} : vector<16x128xbf16>, vector<128x2048xbf16>, vector<16x2048xf32> -> vector<16x2048xf32>
    %4 = arith.truncf %3 : vector<16x2048xf32> to vector<16x2048xbf16>
    %c0_3 = arith.constant 0 : index
    %c0_4 = arith.constant 0 : index
    %5 = vector.load %arg3[%c0_3, %c0_4] : memref<1x2048xf32, #tpu.memory_space<vmem>>, vector<1x2048xf32>
    %6 = arith.truncf %5 : vector<1x2048xf32> to vector<1x2048xbf16>
    %7 = vector.broadcast %6 : vector<1x2048xbf16> to vector<16x2048xbf16>
    %8 = arith.addf %4, %7 : vector<16x2048xbf16>
    %cst_5 = arith.constant 0.000000e+00 : bf16
    %9 = vector.broadcast %cst_5 : bf16 to vector<16x2048xbf16>
    %10 = arith.maximumf %8, %9 : vector<16x2048xbf16>
    %c0_6 = arith.constant 0 : index
    %c0_7 = arith.constant 0 : index
    %11 = vector.load %arg4[%c0_6, %c0_7] : memref<2048x128xbf16, #tpu.memory_space<vmem>>, vector<2048x128xbf16>
    %cst_8 = arith.constant dense<0.000000e+00> : vector<16x128xf32>
    %12 = tpu.matmul %10, %11, %cst_8 {dimension_numbers = #tpu.dot_dimension_numbers<[1], [0], [0], [1], [0, 0, 1, 1], [], []>} : vector<16x2048xbf16>, vector<2048x128xbf16>, vector<16x128xf32> -> vector<16x128xf32>
    %c0_9 = arith.constant 0 : index
    %c0_10 = arith.constant 0 : index
    %13 = vector.load %arg5[%c0_9, %c0_10] : memref<1x128xf32, #tpu.memory_space<vmem>>, vector<1x128xf32>
    %14 = vector.broadcast %13 : vector<1x128xf32> to vector<16x128xf32>
    %15 = arith.addf %12, %14 : vector<16x128xf32>
    %c0_11 = arith.constant 0 : index
    %c0_12 = arith.constant 0 : index
    %16 = vector.load %arg6[%c0_11, %c0_12] : memref<16x128xf32, #tpu.memory_space<vmem>>, vector<16x128xf32>
    tpu.vector_store %arg6[%c0_11, %c0_12], %15 {strides = array<i32>} : memref<16x128xf32, #tpu.memory_space<vmem>>, vector<16x128xf32>,
    return
  }
  func.func @transform_0(%arg0: i32) -> (i32, i32) {
    %c0_i32 = arith.constant 0 : i32
    %c0_i32_0 = arith.constant 0 : i32
    return %arg0, %c0_i32 : i32, i32
  }
  func.func @transform_1(%arg0: i32) -> (i32, i32) {
    %c0_i32 = arith.constant 0 : i32
    %c0_i32_0 = arith.constant 0 : i32
    %c0_i32_1 = arith.constant 0 : i32
    return %c0_i32, %c0_i32_0 : i32, i32
  }
  func.func @transform_2(%arg0: i32) -> (i32, i32) {
    %c0_i32 = arith.constant 0 : i32
    %c0_i32_0 = arith.constant 0 : i32
    %c0_i32_1 = arith.constant 0 : i32
    return %c0_i32, %c0_i32_0 : i32, i32
  }
  func.func @transform_3(%arg0: i32) -> (i32, i32) {
    %c0_i32 = arith.constant 0 : i32
    %c0_i32_0 = arith.constant 0 : i32
    %c0_i32_1 = arith.constant 0 : i32
    return %c0_i32, %c0_i32_0 : i32, i32
  }
  func.func @transform_4(%arg0: i32) -> (i32, i32) {
    %c0_i32 = arith.constant 0 : i32
    %c0_i32_0 = arith.constant 0 : i32
    %c0_i32_1 = arith.constant 0 : i32
    return %c0_i32, %c0_i32_0 : i32, i32
  }
  func.func @transform_5(%arg0: i32) -> (i32, i32) {
    %c0_i32 = arith.constant 0 : i32
    %c0_i32_0 = arith.constant 0 : i32
    return %arg0, %c0_i32 : i32, i32
  }
}

module attributes {stable_mosaic.version = 11 : i64} {
  func.func @_ffn_kernel_resident(%arg0: i32, %arg1: memref<16x128xf32, #tpu.memory_space<vmem>>, %arg2: memref<128x2048xbf16, #tpu.memory_space<vmem>>, %arg3: memref<1x2048xf32, #tpu.memory_space<vmem>>, %arg4: memref<2048x128xbf16, #tpu.memory_space<vmem>>, %arg5: memref<1x128xf32, #tpu.memory_space<vmem>>, %arg6: memref<16x128xf32, #tpu.memory_space<vmem>>) attributes {dimension_semantics = [#tpu.dimension_semantics<parallel>], iteration_bounds = array<i64: 1>, scalar_prefetch = 0 : i64, scratch_operands = 0 : i64, tpu.core_type = #tpu.core_type<tc>, window_params = [{transform_indices = @transform_0, window_bounds = array<i64: 16, 128>}, {pipeline_mode = #tpu.pipeline_mode<synchronous>, transform_indices = @transform_1, window_bounds = array<i64: 128, 2048>}, {pipeline_mode = #tpu.pipeline_mode<synchronous>, transform_indices = @transform_2, window_bounds = array<i64: 1, 2048>}, {pipeline_mode = #tpu.pipeline_mode<synchronous>, transform_indices = @transform_3, window_bounds = array<i64: 2048, 128>}, {pipeline_mode = #tpu.pipeline_mode<synchronous>, transform_indices = @transform_4, window_bounds = array<i64: 1, 128>}, {transform_indices = @transform_5, window_bounds = array<i64: 16, 128>}]} {
    %c0 = arith.constant 0 : index
    %c0_0 = arith.constant 0 : index
    %0 = vector.load %arg1[%c0, %c0_0] : memref<16x128xf32, #tpu.memory_space<vmem>>, vector<16x128xf32>
    %1 = arith.truncf %0 : vector<16x128xf32> to vector<16x128xbf16>
    %c0_1 = arith.constant 0 : index
    %c0_2 = arith.constant 0 : index
    %2 = vector.load %arg2[%c0_1, %c0_2] : memref<128x2048xbf16, #tpu.memory_space<vmem>>, vector<128x2048xbf16>
    %cst = arith.constant dense<0.000000e+00> : vector<16x2048xf32>
    %3 = tpu.matmul %1, %2, %cst {dimension_numbers = #tpu.dot_dimension_numbers<[1], [0], [0], [1], [0, 0, 1, 1], [], []>} : vector<16x128xbf16>, vector<128x2048xbf16>, vector<16x2048xf32> -> vector<16x2048xf32>
    %4 = arith.truncf %3 : vector<16x2048xf32> to vector<16x2048xbf16>
    %c0_3 = arith.constant 0 : index
    %c0_4 = arith.constant 0 : index
    %5 = vector.load %arg3[%c0_3, %c0_4] : memref<1x2048xf32, #tpu.memory_space<vmem>>, vector<1x2048xf32>
    %6 = arith.truncf %5 : vector<1x2048xf32> to vector<1x2048xbf16>
    %7 = vector.broadcast %6 : vector<1x2048xbf16> to vector<16x2048xbf16>
    %8 = arith.addf %4, %7 : vector<16x2048xbf16>
    %cst_5 = arith.constant 0.000000e+00 : bf16
    %9 = vector.broadcast %cst_5 : bf16 to vector<16x2048xbf16>
    %10 = arith.maximumf %8, %9 : vector<16x2048xbf16>
    %c0_6 = arith.constant 0 : index
    %c0_7 = arith.constant 0 : index
    %11 = vector.load %arg4[%c0_6, %c0_7] : memref<2048x128xbf16, #tpu.memory_space<vmem>>, vector<2048x128xbf16>
    %cst_8 = arith.constant dense<0.000000e+00> : vector<16x128xf32>
    %12 = tpu.matmul %10, %11, %cst_8 {dimension_numbers = #tpu.dot_dimension_numbers<[1], [0], [0], [1], [0, 0, 1, 1], [], []>} : vector<16x2048xbf16>, vector<2048x128xbf16>, vector<16x128xf32> -> vector<16x128xf32>
    %c0_9 = arith.constant 0 : index
    %c0_10 = arith.constant 0 : index
    %13 = vector.load %arg5[%c0_9, %c0_10] : memref<1x128xf32, #tpu.memory_space<vmem>>, vector<1x128xf32>
    %14 = vector.broadcast %13 : vector<1x128xf32> to vector<16x128xf32>
    %15 = arith.addf %12, %14 : vector<16x128xf32>
    %c0_11 = arith.constant 0 : index
    %c0_12 = arith.constant 0 : index
    %16 = vector.load %arg6[%c0_11, %c0_12] : memref<16x128xf32, #tpu.memory_space<vmem>>, vector<16x128xf32>
    tpu.vector_store %arg6[%c0_11, %c0_12], %15 {strides = array<i32>} : memref<16x128xf32, #tpu.memory_space<vmem>>, vector<16x128xf32>,
    return
  }
  func.func @transform_0(%arg0: i32) -> (i32, i32) {
    %c0_i32 = arith.constant 0 : i32
    %c0_i32_0 = arith.constant 0 : i32
    return %arg0, %c0_i32 : i32, i32
  }
  func.func @transform_1(%arg0: i32) -> (i32, i32) {
    %c0_i32 = arith.constant 0 : i32
    %c0_i32_0 = arith.constant 0 : i32
    %c0_i32_1 = arith.constant 0 : i32
    return %c0_i32, %c0_i32_0 : i32, i32
  }
  func.func @transform_2(%arg0: i32) -> (i32, i32) {
    %c0_i32 = arith.constant 0 : i32
    %c0_i32_0 = arith.constant 0 : i32
    %c0_i32_1 = arith.constant 0 : i32
    return %c0_i32, %c0_i32_0 : i32, i32
  }
  func.func @transform_3(%arg0: i32) -> (i32, i32) {
    %c0_i32 = arith.constant 0 : i32
    %c0_i32_0 = arith.constant 0 : i32
    %c0_i32_1 = arith.constant 0 : i32
    return %c0_i32, %c0_i32_0 : i32, i32
  }
  func.func @transform_4(%arg0: i32) -> (i32, i32) {
    %c0_i32 = arith.constant 0 : i32
    %c0_i32_0 = arith.constant 0 : i32
    %c0_i32_1 = arith.constant 0 : i32
    return %c0_i32, %c0_i32_0 : i32, i32
  }
  func.func @transform_5(%arg0: i32) -> (i32, i32) {
    %c0_i32 = arith.constant 0 : i32
    %c0_i32_0 = arith.constant 0 : i32
    return %arg0, %c0_i32 : i32, i32
  }
}

</mosaic_0001>

<bundles_post_ra>
// kernel: position_feed_forward.1
= control target key start
LH: loop header
LB: loop body
LE: loop exit
PB: predicated region body
PF: predicated region fallthrough
CT: control target
= control target key end

     0   :  { %10 = vsyncpa [#allocation3], 0  ;;  %s3752_s0 = inlined_call_operand.hbm [shape: f32[16,128], index: 0, kind: input, shape index: {}]   ;;  %s3753_s1 = inlined_call_operand.hbm [shape: bf16[128,2048], index: 1, kind: input, shape index: {}]   ;;  %s3754_s2 = inlined_call_operand.hbm [shape: f32[1,2048], index: 2, kind: input, shape index: {}]   ;;  %s3755_s3 = inlined_call_operand.hbm [shape: bf16[2048,128], index: 3, kind: input, shape index: {}]   ;;  %s3756_s4 = inlined_call_operand.vmem [shape: f32[1,128], index: 4, kind: input, shape index: {}]   ;;  %s3757_s5 = inlined_call_operand.hbm [shape: f32[16,128], index: 5, kind: output, shape index: {}]  }
   0x1   :  { %11 = vsyncpa [#allocation6], 0 }
   0x2   :  { %12 = vsyncpa [#allocation9], 0 }
   0x3   :  { %13 = vsyncpa [#allocation4], 0  ;;  %s3520_s18 = smov [#allocation5]   ;;  %s3402_s22 = scalar_lea.hbm %s3753_s1, 16384 }
   0x4   :  { %s31_s19 = sshll.u32 %s3520_s18, 4  ;;  %p3403_p0 = scmp.ne.s32.totalorder %s3753_s1, %s3402_s22  ;;  %s32_s19 = int_to_ptr.vmem [resolvable:$true] %s31_s19 }
   0x5   :  { %p3406_p1 = scmp.lt.u32.totalorder %s3402_s22, %s3753_s1 }
   0x7   :  { %p3408_p2 = pnand %p3406_p1, %p3403_p0 }
   0x9   :  { %3411 = shalt.err (!%p3408_p2)
}
   0xa   :  { %s3412_s27 = scalar_lea.vmem %s32_s19, 16384  ;;  %p3417_p4 = scmp.lt.s32.totalorder %s32_s19, %s32_s19 }
   0xb   :  { %p3413_p3 = scmp.ne.s32.totalorder %s32_s19, %s3412_s27  ;;  %p3418_p5 = scmp.lt.s32.totalorder %s3412_s27, %s3412_s27 }
   0xd   :  { %p3419_p6 = por %p3418_p5, %p3417_p4 }
   0xf   :  { %p3420_p7 = pnand %p3419_p6, %p3413_p3 }
  0x11   :  { %3423 = shalt.err (!%p3420_p7)
}
  0x12   :  { %s3521_s28 = smov 1024   ;;  %s3522_s29 = smov 64  }
  0x13   :  { %37 = dma.hbm_to_vmem [thread:$0]  %s3753_s1, 16384, %s32_s19, [#allocation6], %s3521_s28, %s3521_s28, %s3522_s29  }
  0x14   :  { %s3523_s7 = smov [#allocation2]   ;;  %s3424_s11 = scalar_lea.hbm %s3752_s0, 256 }
  0x15   :  { %s19_s8 = sshll.u32 %s3523_s7, 4  ;;  %p3425_p8 = scmp.ne.s32.totalorder %s3752_s0, %s3424_s11  ;;  %s20_s8 = int_to_ptr.vmem [resolvable:$true] %s19_s8 }
  0x16   :  { %p3428_p9 = scmp.lt.u32.totalorder %s3424_s11, %s3752_s0 }
  0x18   :  { %p3430_p10 = pnand %p3428_p9, %p3425_p8 }
  0x1a   :  { %3433 = shalt.err (!%p3430_p10)
}
  0x1b   :  { %s3434_s16 = scalar_lea.vmem %s20_s8, 256  ;;  %p3439_p12 = scmp.lt.s32.totalorder %s20_s8, %s20_s8 }
  0x1c   :  { %p3435_p11 = scmp.ne.s32.totalorder %s20_s8, %s3434_s16  ;;  %p3440_p13 = scmp.lt.s32.totalorder %s3434_s16, %s3434_s16 }
  0x1e   :  { %p3441_p0 = por %p3440_p13, %p3439_p12 }
  0x20   :  { %p3442_p1 = pnand %p3441_p0, %p3435_p11 }
  0x22   :  { %3445 = shalt.err (!%p3442_p1)
}
  0x23   :  { %s3524_s1 = smov 128   ;;  %s3525_s17 = smov 8  }
  0x24   :  { %25 = dma.hbm_to_vmem [thread:$0]  %s3752_s0, 256, %s20_s8, [#allocation3], %s3524_s1, %s3524_s1, %s3525_s17  }
  0x25   :  { %s3526_s20 = smov [#allocation7]   ;;  %s3527_s22 = smov [#allocation8]  }
  0x26   :  { %s44_s21 = sshll.u32 %s3526_s20, 4  ;;  %s53_s23 = sshll.u32 %s3527_s22, 4  ;;  %s45_s21 = int_to_ptr.vmem [resolvable:$true] %s44_s21  ;;  %s3589_s23 = int_to_ptr.vmem [resolvable:$true] %s53_s23 }
  0x27   :  { %s3446_s26 = scalar_lea.hbm %s3754_s2, 256 }
  0x28   :  { %p3447_p2 = scmp.ne.s32.totalorder %s3754_s2, %s3446_s26  ;;  %p3450_p3 = scmp.lt.u32.totalorder %s3446_s26, %s3754_s2 }
  0x2a   :  { %p3452_p4 = pnand %p3450_p3, %p3447_p2 }
  0x2c   :  { %3455 = shalt.err (!%p3452_p4)
}
  0x2d   :  { %s3456_s0 = scalar_lea.vmem %s45_s21, 256  ;;  %p3461_p6 = scmp.lt.s32.totalorder %s45_s21, %s45_s21 }
  0x2e   :  { %p3457_p5 = scmp.ne.s32.totalorder %s45_s21, %s3456_s0  ;;  %p3462_p7 = scmp.lt.s32.totalorder %s3456_s0, %s3456_s0 }
  0x30   :  { %p3463_p8 = por %p3462_p7, %p3461_p6 }
  0x32   :  { %p3464_p9 = pnand %p3463_p8, %p3457_p5 }
  0x34   :  { %3467 = shalt.err (!%p3464_p9)
}
  0x35   :  { %47 = dma.hbm_to_vmem [thread:$0]  %s3754_s2, 256, %s45_s21, [#allocation6]  }
  0x36   :  { %s3468_s11 = scalar_lea.hbm %s3755_s3, 16384 }
  0x37   :  { %p3469_p10 = scmp.ne.s32.totalorder %s3755_s3, %s3468_s11  ;;  %p3472_p11 = scmp.lt.u32.totalorder %s3468_s11, %s3755_s3 }
  0x39   :  { %p3474_p12 = pnand %p3472_p11, %p3469_p10 }
  0x3b   :  { %3477 = shalt.err (!%p3474_p12)
}
  0x3c   :  { %s3478_s16 = scalar_lea.vmem %s3589_s23, 16384  ;;  %p3483_p0 = scmp.lt.s32.totalorder %s3589_s23, %s3589_s23 }
  0x3d   :  { %p3479_p13 = scmp.ne.s32.totalorder %s3589_s23, %s3478_s16  ;;  %p3484_p1 = scmp.lt.s32.totalorder %s3478_s16, %s3478_s16 }
  0x3f   :  { %p3485_p2 = por %p3484_p1, %p3483_p0 }
  0x41   :  { %p3486_p3 = pnand %p3485_p2, %p3479_p13 }
  0x43   :  { %3489 = shalt.err (!%p3486_p3)
}
  0x44   :  { %s3528_s2 = smov 4  }
  0x45   :  { %59 = dma.hbm_to_vmem [thread:$0]  %s3755_s3, 16384, %s3589_s23, [#allocation9], %s3522_s29, %s3522_s29, %s3528_s2  }
  0x46   :  { %3512 = dma.done.wait [#allocation3], 256  }
  0x47   :  { %3513 = vsyncadd [#allocation3], 4294967040 }
  0x48   :  { %3514 = dma.done.wait [#allocation6], 16640  }
  0x49   :  { %3515 = vsyncadd [#allocation6], 4294950656 }
  0x4a   :  { %3516 = dma.done.wait [#allocation9], 16384  }
  0x4b   :  { %3517 = vsyncadd [#allocation9], 4294950912  ;;  %v3529_v0 = vmov 0   ;;  %v78_v1 = vld [vmem:[#allocation5] sm:$0xff]  ;;  %v79_v3 = vld [vmem:[#allocation5 + $0x8] sm:$0xff] }
  0x4c   :  { %878 = vmatprep.mubr.bf16.mxu0 %v3529_v0  ;;  %921 = vmatprep.mubr.bf16.mxu1 %v3529_v0  ;;  %v86_v2 = vld [vmem:[#allocation5 + $0x40] sm:$0xff]  ;;  %v87_v5 = vld [vmem:[#allocation5 + $0x48] sm:$0xff]  ;;  %v80_v63 = vld [vmem:[#allocation5 + $0x10] sm:$0xff] }
  0x4d   :  { %v2831_v4 = vcombine.high %v78_v1, %v86_v2  ;;  %v2830_v6 = vcombine.low %v78_v1, %v86_v2  ;;  %v94_v7 = vld [vmem:[#allocation5 + $0x80] sm:$0xff]  ;;  %v2833_v9 = vcombine.high %v79_v3, %v87_v5  ;;  %v2832_v10 = vcombine.low %v79_v3, %v87_v5  ;;  %v95_v12 = vld [vmem:[#allocation5 + $0x88] sm:$0xff]  ;;  %v88_v1 = vld [vmem:[#allocation5 + $0x50] sm:$0xff] }
  0x4e   :  { %v102_v8 = vld [vmem:[#allocation5 + $0xc0] sm:$0xff]  ;;  %v103_v13 = vld [vmem:[#allocation5 + $0xc8] sm:$0xff]  ;;  %v81_v2 = vld [vmem:[#allocation5 + $0x18] sm:$0xff] }
  0x4f   :  { %v2847_v11 = vcombine.high %v94_v7, %v102_v8  ;;  %v110_v14 = vld [vmem:[#allocation5 + $0x100] sm:$0xff]  ;;  %846 = vmatprep.subr.bf16.mxu0 %v2831_v4  ;;  %v2849_v15 = vcombine.high %v95_v12, %v103_v13  ;;  %v111_v17 = vld [vmem:[#allocation5 + $0x108] sm:$0xff]  ;;  %889 = vmatprep.subr.bf16.mxu1 %v2833_v9  ;;  %v2846_v19 = vcombine.low %v94_v7, %v102_v8  ;;  %v89_v3 = vld [vmem:[#allocation5 + $0x58] sm:$0xff] }
  0x50   :  { %v118_v16 = vld [vmem:[#allocation5 + $0x140] sm:$0xff]  ;;  %v119_v18 = vld [vmem:[#allocation5 + $0x148] sm:$0xff]  ;;  %847 = vmatpush1.bf16.msra.mxu0 %v2830_v6  ;;  %890 = vmatpush1.bf16.msra.mxu1 %v2832_v10  ;;  %v2848_v20 = vcombine.low %v95_v12, %v103_v13  ;;  %v75_v5 = vld [vmem:[#allocation2] sm:$0xff]  ;;  %v2835_v8 = vcombine.high %v80_v63, %v88_v1  ;;  %v2837_v9 = vcombine.high %v81_v2, %v89_v3 }
  0x51   :  { %848 = vmatprep.subr.bf16.mxu0 %v2847_v11  ;;  %v2863_v21 = vcombine.high %v110_v14, %v118_v16  ;;  %891 = vmatprep.subr.bf16.mxu1 %v2849_v15  ;;  %v2865_v22 = vcombine.high %v111_v17, %v119_v18  ;;  %v126_v23 = vld [vmem:[#allocation5 + $0x180] sm:$0xff]  ;;  %v127_v25 = vld [vmem:[#allocation5 + $0x188] sm:$0xff]  ;;  %v2862_v27 = vcombine.low %v110_v14, %v118_v16  ;;  %v76_v6 = vld [vmem:[#allocation2 + $0x8] sm:$0xff] }
  0x52   :  { %v134_v24 = vld [vmem:[#allocation5 + $0x1c0] sm:$0xff]  ;;  %v135_v26 = vld [vmem:[#allocation5 + $0x1c8] sm:$0xff]  ;;  %v2864_v28 = vcombine.low %v111_v17, %v119_v18  ;;  %v96_v10 = vld [vmem:[#allocation5 + $0x90] sm:$0xff]  ;;  %v3624_v12 = vpack.c.bf16 %v76_v6, %v75_v5  ;;  %v2834_v15 = vcombine.low %v80_v63, %v88_v1  ;;  %v2836_v16 = vcombine.low %v81_v2, %v89_v3 }
  0x53   :  { %v2879_v29 = vcombine.high %v126_v23, %v134_v24  ;;  %v2881_v30 = vcombine.high %v127_v25, %v135_v26  ;;  %v142_v31 = vld [vmem:[#allocation5 + $0x200] sm:$0xff]  ;;  %v143_v33 = vld [vmem:[#allocation5 + $0x208] sm:$0xff]  ;;  %v2878_v35 = vcombine.low %v126_v23, %v134_v24  ;;  %v2880_v36 = vcombine.low %v127_v25, %v135_v26  ;;  %v104_v11 = vld [vmem:[#allocation5 + $0xd0] sm:$0xff] }
  0x54   :  { %849 = vmatpush1.bf16.msra.mxu0 %v2846_v19  ;;  %892 = vmatpush1.bf16.msra.mxu1 %v2848_v20  ;;  %v150_v32 = vld [vmem:[#allocation5 + $0x240] sm:$0xff]  ;;  %v151_v34 = vld [vmem:[#allocation5 + $0x248] sm:$0xff]  ;;  %v97_v13 = vld [vmem:[#allocation5 + $0x98] sm:$0xff]  ;;  %v2851_v17 = vcombine.high %v96_v10, %v104_v11  ;;  %v2850_v23 = vcombine.low %v96_v10, %v104_v11 }
  0x55   :  { %850 = vmatprep.subr.bf16.mxu0 %v2863_v21  ;;  %893 = vmatprep.subr.bf16.mxu1 %v2865_v22  ;;  %v2895_v37 = vcombine.high %v142_v31, %v150_v32  ;;  %v2897_v38 = vcombine.high %v143_v33, %v151_v34  ;;  %v158_v39 = vld [vmem:[#allocation5 + $0x280] sm:$0xff]  ;;  %v159_v41 = vld [vmem:[#allocation5 + $0x288] sm:$0xff]  ;;  %v2894_v43 = vcombine.low %v142_v31, %v150_v32  ;;  %v105_v14 = vld [vmem:[#allocation5 + $0xd8] sm:$0xff] }
  0x56   :  { %v166_v40 = vld [vmem:[#allocation5 + $0x2c0] sm:$0xff]  ;;  %v167_v42 = vld [vmem:[#allocation5 + $0x2c8] sm:$0xff]  ;;  %v2896_v44 = vcombine.low %v143_v33, %v151_v34  ;;  %v2853_v18 = vcombine.high %v97_v13, %v105_v14  ;;  %v112_v19 = vld [vmem:[#allocation5 + $0x110] sm:$0xff]  ;;  %v2852_v24 = vcombine.low %v97_v13, %v105_v14 }
  0x57   :  { %v2911_v45 = vcombine.high %v158_v39, %v166_v40  ;;  %v2913_v46 = vcombine.high %v159_v41, %v167_v42  ;;  %v174_v47 = vld [vmem:[#allocation5 + $0x300] sm:$0xff]  ;;  %v175_v49 = vld [vmem:[#allocation5 + $0x308] sm:$0xff]  ;;  %v2910_v51 = vcombine.low %v158_v39, %v166_v40  ;;  %v2912_v52 = vcombine.low %v159_v41, %v167_v42  ;;  %v120_v20 = vld [vmem:[#allocation5 + $0x150] sm:$0xff] }
  0x58   :  { %851 = vmatpush1.bf16.msra.mxu0 %v2862_v27  ;;  %894 = vmatpush1.bf16.msra.mxu1 %v2864_v28  ;;  %v182_v48 = vld [vmem:[#allocation5 + $0x340] sm:$0xff]  ;;  %v183_v50 = vld [vmem:[#allocation5 + $0x348] sm:$0xff]  ;;  %v113_v21 = vld [vmem:[#allocation5 + $0x118] sm:$0xff]  ;;  %v2867_v25 = vcombine.high %v112_v19, %v120_v20  ;;  %v2866_v31 = vcombine.low %v112_v19, %v120_v20 }
  0x59   :  { %852 = vmatprep.subr.bf16.mxu0 %v2879_v29  ;;  %895 = vmatprep.subr.bf16.mxu1 %v2881_v30  ;;  %v2927_v53 = vcombine.high %v174_v47, %v182_v48  ;;  %v2929_v54 = vcombine.high %v175_v49, %v183_v50  ;;  %v190_v55 = vld [vmem:[#allocation5 + $0x380] sm:$0xff]  ;;  %v191_v57 = vld [vmem:[#allocation5 + $0x388] sm:$0xff]  ;;  %v2926_v59 = vcombine.low %v174_v47, %v182_v48  ;;  %v121_v22 = vld [vmem:[#allocation5 + $0x158] sm:$0xff] }
  0x5a   :  { %v198_v56 = vld [vmem:[#allocation5 + $0x3c0] sm:$0xff]  ;;  %v199_v58 = vld [vmem:[#allocation5 + $0x3c8] sm:$0xff]  ;;  %v2928_v60 = vcombine.low %v175_v49, %v183_v50  ;;  %v2869_v26 = vcombine.high %v113_v21, %v121_v22  ;;  %v128_v27 = vld [vmem:[#allocation5 + $0x190] sm:$0xff]  ;;  %v2868_v32 = vcombine.low %v113_v21, %v121_v22 }
  0x5b   :  { %v2943_v61 = vcombine.high %v190_v55, %v198_v56  ;;  %v2945_v62 = vcombine.high %v191_v57, %v199_v58  ;;  %v2942_v4 = vcombine.low %v190_v55, %v198_v56  ;;  %v2944_v7 = vcombine.low %v191_v57, %v199_v58  ;;  %v136_v28 = vld [vmem:[#allocation5 + $0x1d0] sm:$0xff]  ;;  %v129_v29 = vld [vmem:[#allocation5 + $0x198] sm:$0xff]  ;;  %v82_v1 = vld [vmem:[#allocation5 + $0x20] sm:$0xff] }
  0x5c   :  { %853 = vmatpush1.bf16.msra.mxu0 %v2878_v35  ;;  %896 = vmatpush1.bf16.msra.mxu1 %v2880_v36  ;;  %v137_v30 = vld [vmem:[#allocation5 + $0x1d8] sm:$0xff]  ;;  %v2883_v33 = vcombine.high %v128_v27, %v136_v28  ;;  %v144_v35 = vld [vmem:[#allocation5 + $0x210] sm:$0xff]  ;;  %v2882_v39 = vcombine.low %v128_v27, %v136_v28  ;;  %v83_v6 = vld [vmem:[#allocation5 + $0x28] sm:$0xff] }
  0x5d   :  { %854 = vmatprep.subr.bf16.mxu0 %v2895_v37  ;;  %897 = vmatprep.subr.bf16.mxu1 %v2897_v38  ;;  %v2885_v34 = vcombine.high %v129_v29, %v137_v30  ;;  %v152_v36 = vld [vmem:[#allocation5 + $0x250] sm:$0xff]  ;;  %v145_v37 = vld [vmem:[#allocation5 + $0x218] sm:$0xff]  ;;  %v2884_v41 = vcombine.low %v129_v29, %v137_v30  ;;  %v106_v13 = vld [vmem:[#allocation5 + $0xe0] sm:$0xff] }
  0x5e   :  { %v153_v38 = vld [vmem:[#allocation5 + $0x258] sm:$0xff]  ;;  %v160_v40 = vld [vmem:[#allocation5 + $0x290] sm:$0xff]  ;;  %v2899_v42 = vcombine.high %v144_v35, %v152_v36  ;;  %v2898_v47 = vcombine.low %v144_v35, %v152_v36  ;;  %v122_v19 = vld [vmem:[#allocation5 + $0x160] sm:$0xff] }
  0x5f   :  { %v176_v48 = vld [vmem:[#allocation5 + $0x310] sm:$0xff]  ;;  %v2900_v49 = vcombine.low %v145_v37, %v153_v38  ;;  %v115_v22 = vld [vmem:[#allocation5 + $0x128] sm:$0xff]  ;;  %v138_v27 = vld [vmem:[#allocation5 + $0x1e0] sm:$0xff] }
  0x60   :  { %855 = vmatpush1.bf16.msra.mxu0 %v2894_v43  ;;  %898 = vmatpush1.bf16.msra.mxu1 %v2896_v44  ;;  %v168_v43 = vld [vmem:[#allocation5 + $0x2d0] sm:$0xff]  ;;  %v2901_v44 = vcombine.high %v145_v37, %v153_v38  ;;  %v131_v30 = vld [vmem:[#allocation5 + $0x1a8] sm:$0xff]  ;;  %v154_v35 = vld [vmem:[#allocation5 + $0x260] sm:$0xff] }
  0x61   :  { %856 = vmatprep.subr.bf16.mxu0 %v2911_v45  ;;  %899 = vmatprep.subr.bf16.mxu1 %v2913_v46  ;;  %v161_v45 = vld [vmem:[#allocation5 + $0x298] sm:$0xff]  ;;  %v2915_v50 = vcombine.high %v160_v40, %v168_v43  ;;  %v2914_v55 = vcombine.low %v160_v40, %v168_v43  ;;  %v192_v56 = vld [vmem:[#allocation5 + $0x390] sm:$0xff]  ;;  %v147_v38 = vld [vmem:[#allocation5 + $0x228] sm:$0xff] }
  0x62   :  { %v169_v46 = vld [vmem:[#allocation5 + $0x2d8] sm:$0xff]  ;;  %v170_v43 = vld [vmem:[#allocation5 + $0x2e0] sm:$0xff] }
  0x63   :  { %v2916_v57 = vcombine.low %v161_v45, %v169_v46 }
  0x64   :  { %857 = vmatpush1.bf16.msra.mxu0 %v2910_v51  ;;  %900 = vmatpush1.bf16.msra.mxu1 %v2912_v52  ;;  %v184_v51 = vld [vmem:[#allocation5 + $0x350] sm:$0xff]  ;;  %v2917_v52 = vcombine.high %v161_v45, %v169_v46  ;;  %v163_v46 = vld [vmem:[#allocation5 + $0x2a8] sm:$0xff] }
  0x65   :  { %858 = vmatprep.subr.bf16.mxu0 %v2927_v53  ;;  %901 = vmatprep.subr.bf16.mxu1 %v2929_v54  ;;  %v177_v53 = vld [vmem:[#allocation5 + $0x318] sm:$0xff]  ;;  %v2931_v58 = vcombine.high %v176_v48, %v184_v51  ;;  %v2930_v63 = vcombine.low %v176_v48, %v184_v51  ;;  %v186_v51 = vld [vmem:[#allocation5 + $0x360] sm:$0xff] }
  0x66   :  { %v185_v54 = vld [vmem:[#allocation5 + $0x358] sm:$0xff] }
  0x67   :  { %v2932_v2 = vcombine.low %v177_v53, %v185_v54 }
  0x68   :  { %859 = vmatpush1.bf16.msra.mxu0 %v2926_v59  ;;  %902 = vmatpush1.bf16.msra.mxu1 %v2928_v60  ;;  %v200_v59 = vld [vmem:[#allocation5 + $0x3d0] sm:$0xff]  ;;  %v2933_v60 = vcombine.high %v177_v53, %v185_v54  ;;  %v179_v54 = vld [vmem:[#allocation5 + $0x328] sm:$0xff] }
  0x69   :  { %860 = vmatprep.subr.bf16.mxu0 %v2943_v61  ;;  %903 = vmatprep.subr.bf16.mxu1 %v2945_v62  ;;  %v193_v61 = vld [vmem:[#allocation5 + $0x398] sm:$0xff]  ;;  %v2947_v3 = vcombine.high %v192_v56, %v200_v59 }
  0x6a   :  { %v201_v62 = vld [vmem:[#allocation5 + $0x3d8] sm:$0xff] }
  0x6b   :  { %v2949_v5 = vcombine.high %v193_v61, %v201_v62  ;;  %v2948_v10 = vcombine.low %v193_v61, %v201_v62  ;;  %v195_v62 = vld [vmem:[#allocation5 + $0x3a8] sm:$0xff] }
  0x6c   :  { %861 = vmatpush1.bf16.msra.mxu0 %v2942_v4  ;;  %904 = vmatpush1.bf16.msra.mxu1 %v2944_v7  ;;  %v90_v4 = vld [vmem:[#allocation5 + $0x60] sm:$0xff]  ;;  %v91_v7 = vld [vmem:[#allocation5 + $0x68] sm:$0xff] }
  0x6d   :  { %932 = vmatprep.subr.bf16.mxu0 %v2835_v8  ;;  %975 = vmatprep.subr.bf16.mxu1 %v2837_v9  ;;  %v2946_v8 = vcombine.low %v192_v56, %v200_v59  ;;  %v98_v9 = vld [vmem:[#allocation5 + $0xa0] sm:$0xff]  ;;  %v2839_v11 = vcombine.high %v82_v1, %v90_v4  ;;  %v2841_v14 = vcombine.high %v83_v6, %v91_v7 }
  0x6e   :  { %v2840_v20 = vcombine.low %v83_v6, %v91_v7  ;;  %v2855_v21 = vcombine.high %v98_v9, %v106_v13  ;;  %v202_v59 = vld [vmem:[#allocation5 + $0x3e0] sm:$0xff]  ;;  %v85_v7 = vld [vmem:[#allocation5 + $0x38] sm:$0xff] }
  0x6f   :  { %879 = vmatmul.mubr.bf16.vlgmr.msra.gmra.mrb[0].mxu0 %v3624_v12  ;;  %922 = vmatmul.mubr.bf16.vlgmr.msra.gmra.mrb[0].mxu1 %v3624_v12 }
  0x70   :  { %933 = vmatpush1.bf16.msra.mxu0 %v2834_v15  ;;  %976 = vmatpush1.bf16.msra.mxu1 %v2836_v16  ;;  %v99_v15 = vld [vmem:[#allocation5 + $0xa8] sm:$0xff] }
  0x71   :  { %934 = vmatprep.subr.bf16.mxu0 %v2851_v17  ;;  %977 = vmatprep.subr.bf16.mxu1 %v2853_v18  ;;  %v107_v16 = vld [vmem:[#allocation5 + $0xe8] sm:$0xff]  ;;  %v2838_v17 = vcombine.low %v82_v1, %v90_v4  ;;  %v114_v18 = vld [vmem:[#allocation5 + $0x120] sm:$0xff]  ;;  %v92_v4 = vld [vmem:[#allocation5 + $0x70] sm:$0xff] }
  0x72   :  { %964 = vmatprep.mubr.bf16.mxu0 %v3529_v0  ;;  %1007 = vmatprep.mubr.bf16.mxu1 %v3529_v0  ;;  %v2856_v28 = vcombine.low %v99_v15, %v107_v16  ;;  %v2871_v29 = vcombine.high %v114_v18, %v122_v19 }
  0x74   :  { %935 = vmatpush1.bf16.msra.mxu0 %v2850_v23  ;;  %978 = vmatpush1.bf16.msra.mxu1 %v2852_v24  ;;  %v123_v23 = vld [vmem:[#allocation5 + $0x168] sm:$0xff]  ;;  %v2857_v24 = vcombine.high %v99_v15, %v107_v16  ;;  %v101_v16 = vld [vmem:[#allocation5 + $0xb8] sm:$0xff] }
  0x75   :  { %936 = vmatprep.subr.bf16.mxu0 %v2867_v25  ;;  %979 = vmatprep.subr.bf16.mxu1 %v2869_v26  ;;  %v2854_v25 = vcombine.low %v98_v9, %v106_v13  ;;  %v130_v26 = vld [vmem:[#allocation5 + $0x1a0] sm:$0xff]  ;;  %v2872_v36 = vcombine.low %v115_v22, %v123_v23  ;;  %v108_v13 = vld [vmem:[#allocation5 + $0xf0] sm:$0xff] }
  0x76   :  { %v2887_v37 = vcombine.high %v130_v26, %v138_v27 }
  0x78   :  { %937 = vmatpush1.bf16.msra.mxu0 %v2866_v31  ;;  %980 = vmatpush1.bf16.msra.mxu1 %v2868_v32  ;;  %v139_v31 = vld [vmem:[#allocation5 + $0x1e8] sm:$0xff]  ;;  %v2873_v32 = vcombine.high %v115_v22, %v123_v23 }
  0x79   :  { %938 = vmatprep.subr.bf16.mxu0 %v2883_v33  ;;  %981 = vmatprep.subr.bf16.mxu1 %v2885_v34  ;;  %v2870_v33 = vcombine.low %v114_v18, %v122_v19  ;;  %v146_v34 = vld [vmem:[#allocation5 + $0x220] sm:$0xff]  ;;  %v2889_v40 = vcombine.high %v131_v30, %v139_v31 }
  0x7a   :  { %v2903_v45 = vcombine.high %v146_v34, %v154_v35 }
  0x7c   :  { %939 = vmatpush1.bf16.msra.mxu0 %v2882_v39  ;;  %982 = vmatpush1.bf16.msra.mxu1 %v2884_v41  ;;  %v155_v39 = vld [vmem:[#allocation5 + $0x268] sm:$0xff]  ;;  %v2886_v41 = vcombine.low %v130_v26, %v138_v27 }
  0x7d   :  { %940 = vmatprep.subr.bf16.mxu0 %v2899_v42  ;;  %983 = vmatprep.subr.bf16.mxu1 %v2901_v44  ;;  %v162_v42 = vld [vmem:[#allocation5 + $0x2a0] sm:$0xff]  ;;  %v2888_v44 = vcombine.low %v131_v30, %v139_v31  ;;  %v2905_v48 = vcombine.high %v147_v38, %v155_v39 }
  0x7e   :  { %v2919_v53 = vcombine.high %v162_v42, %v170_v43 }
  0x80   :  { %941 = vmatpush1.bf16.msra.mxu0 %v2898_v47  ;;  %984 = vmatpush1.bf16.msra.mxu1 %v2900_v49  ;;  %v171_v47 = vld [vmem:[#allocation5 + $0x2e8] sm:$0xff]  ;;  %v2902_v49 = vcombine.low %v146_v34, %v154_v35 }
  0x81   :  { %942 = vmatprep.subr.bf16.mxu0 %v2915_v50  ;;  %985 = vmatprep.subr.bf16.mxu1 %v2917_v52  ;;  %v178_v50 = vld [vmem:[#allocation5 + $0x320] sm:$0xff]  ;;  %v2904_v52 = vcombine.low %v147_v38, %v155_v39  ;;  %v2921_v56 = vcombine.high %v163_v46, %v171_v47 }
  0x82   :  { %v2935_v61 = vcombine.high %v178_v50, %v186_v51 }
  0x84   :  { %943 = vmatpush1.bf16.msra.mxu0 %v2914_v55  ;;  %986 = vmatpush1.bf16.msra.mxu1 %v2916_v57  ;;  %v187_v55 = vld [vmem:[#allocation5 + $0x368] sm:$0xff]  ;;  %v2918_v57 = vcombine.low %v162_v42, %v170_v43 }
  0x85   :  { %944 = vmatprep.subr.bf16.mxu0 %v2931_v58  ;;  %987 = vmatprep.subr.bf16.mxu1 %v2933_v60  ;;  %v194_v58 = vld [vmem:[#allocation5 + $0x3a0] sm:$0xff]  ;;  %v2920_v60 = vcombine.low %v163_v46, %v171_v47  ;;  %v2937_v1 = vcombine.high %v179_v54, %v187_v55 }
  0x86   :  { %v2951_v6 = vcombine.high %v194_v58, %v202_v59 }
  0x88   :  { %945 = vmatpush1.bf16.msra.mxu0 %v2930_v63  ;;  %988 = vmatpush1.bf16.msra.mxu1 %v2932_v2  ;;  %v203_v63 = vld [vmem:[#allocation5 + $0x3e8] sm:$0xff]  ;;  %v2934_v2 = vcombine.low %v178_v50, %v186_v51 }
  0x89   :  { %946 = vmatprep.subr.bf16.mxu0 %v2947_v3  ;;  %989 = vmatprep.subr.bf16.mxu1 %v2949_v5  ;;  %v84_v3 = vld [vmem:[#allocation5 + $0x30] sm:$0xff]  ;;  %v2936_v5 = vcombine.low %v179_v54, %v187_v55  ;;  %v2953_v9 = vcombine.high %v195_v62, %v203_v63 }
  0x8a   :  { %v2843_v15 = vcombine.high %v84_v3, %v92_v4  ;;  %v2842_v19 = vcombine.low %v84_v3, %v92_v4 }
  0x8c   :  { %947 = vmatpush1.bf16.msra.mxu0 %v2946_v8  ;;  %990 = vmatpush1.bf16.msra.mxu1 %v2948_v10  ;;  %v93_v8 = vld [vmem:[#allocation5 + $0x78] sm:$0xff]  ;;  %v2950_v10 = vcombine.low %v194_v58, %v202_v59 }
  0x8d   :  { %1018 = vmatprep.subr.bf16.mxu0 %v2839_v11  ;;  %1061 = vmatprep.subr.bf16.mxu1 %v2841_v14  ;;  %v100_v11 = vld [vmem:[#allocation5 + $0xb0] sm:$0xff]  ;;  %v2952_v14 = vcombine.low %v195_v62, %v203_v63  ;;  %v2845_v18 = vcombine.high %v85_v7, %v93_v8  ;;  %v2844_v22 = vcombine.low %v85_v7, %v93_v8  ;;  %v189_v58 = vld [vmem:[#allocation5 + $0x378] sm:$0xff] }
  0x8e   :  { %v2859_v23 = vcombine.high %v100_v11, %v108_v13  ;;  %v2858_v27 = vcombine.low %v100_v11, %v108_v13  ;;  %v3275_v11 = vld [vmem:[#allocation8 + $0xc0] sm:$0xff]  }
  0x8f   :  { %965 = vmatmul.mubr.bf16.vlgmr.msra.gmra.mrb[4].mxu0 %v3624_v12  ;;  %1008 = vmatmul.mubr.bf16.vlgmr.msra.gmra.mrb[4].mxu1 %v3624_v12  ;;  %v3276_v13 = vld [vmem:[#allocation8] sm:$0xff]  }
  0x90   :  { %1019 = vmatpush1.bf16.msra.mxu0 %v2838_v17  ;;  %1062 = vmatpush1.bf16.msra.mxu1 %v2840_v20  ;;  %v109_v17 = vld [vmem:[#allocation5 + $0xf8] sm:$0xff]  ;;  %v116_v20 = vld [vmem:[#allocation5 + $0x130] sm:$0xff] }
  0x91   :  { %1020 = vmatprep.subr.bf16.mxu0 %v2855_v21  ;;  %1063 = vmatprep.subr.bf16.mxu1 %v2857_v24  ;;  %v124_v21 = vld [vmem:[#allocation5 + $0x170] sm:$0xff]  ;;  %v117_v24 = vld [vmem:[#allocation5 + $0x138] sm:$0xff]  ;;  %v2861_v26 = vcombine.high %v101_v16, %v109_v17  ;;  %v2860_v30 = vcombine.low %v101_v16, %v109_v17 }
  0x92   :  { %1050 = vmatprep.mubr.bf16.mxu0 %v3529_v0  ;;  %1093 = vmatprep.mubr.bf16.mxu1 %v3529_v0  ;;  %v2875_v31 = vcombine.high %v116_v20, %v124_v21  ;;  %v2874_v35 = vcombine.low %v116_v20, %v124_v21  ;;  %v3279_v16 = vld [vmem:[#allocation8 + $0xc8] sm:$0xff]   ;;  %v3283_v20 = vld [vmem:[#allocation8 + $0xd0] sm:$0xff]  }
  0x93   :  { %v3280_v17 = vld [vmem:[#allocation8 + $0x8] sm:$0xff]   ;;  %v3284_v21 = vld [vmem:[#allocation8 + $0x10] sm:$0xff]  }
  0x94   :  { %1021 = vmatpush1.bf16.msra.mxu0 %v2854_v25  ;;  %1064 = vmatpush1.bf16.msra.mxu1 %v2856_v28  ;;  %v125_v25 = vld [vmem:[#allocation5 + $0x178] sm:$0xff]  ;;  %v132_v28 = vld [vmem:[#allocation5 + $0x1b0] sm:$0xff] }
  0x95   :  { %1022 = vmatprep.subr.bf16.mxu0 %v2871_v29  ;;  %1065 = vmatprep.subr.bf16.mxu1 %v2873_v32  ;;  %v140_v29 = vld [vmem:[#allocation5 + $0x1f0] sm:$0xff]  ;;  %v133_v32 = vld [vmem:[#allocation5 + $0x1b8] sm:$0xff]  ;;  %v2877_v34 = vcombine.high %v117_v24, %v125_v25  ;;  %v2876_v38 = vcombine.low %v117_v24, %v125_v25  ;;  %v3287_v24 = vld [vmem:[#allocation8 + $0xd8] sm:$0xff]  }
  0x96   :  { %v2891_v39 = vcombine.high %v132_v28, %v140_v29  ;;  %v2890_v43 = vcombine.low %v132_v28, %v140_v29  ;;  %v3288_v25 = vld [vmem:[#allocation8 + $0x18] sm:$0xff]   ;;  %v3292_v28 = vld [vmem:[#allocation8 + $0x20] sm:$0xff]  }
  0x97   :  { %v3293_v29 = vld [vmem:[#allocation8 + $0xa0] sm:$0xff]  }
  0x98   :  { %1023 = vmatpush1.bf16.msra.mxu0 %v2870_v33  ;;  %1066 = vmatpush1.bf16.msra.mxu1 %v2872_v36  ;;  %v141_v33 = vld [vmem:[#allocation5 + $0x1f8] sm:$0xff]  ;;  %v148_v36 = vld [vmem:[#allocation5 + $0x230] sm:$0xff] }
  0x99   :  { %1024 = vmatprep.subr.bf16.mxu0 %v2887_v37  ;;  %1067 = vmatprep.subr.bf16.mxu1 %v2889_v40  ;;  %v156_v37 = vld [vmem:[#allocation5 + $0x270] sm:$0xff]  ;;  %v149_v40 = vld [vmem:[#allocation5 + $0x238] sm:$0xff]  ;;  %v2893_v42 = vcombine.high %v133_v32, %v141_v33  ;;  %v2892_v46 = vcombine.low %v133_v32, %v141_v33 }
  0x9a   :  { %v2907_v47 = vcombine.high %v148_v36, %v156_v37  ;;  %v2906_v51 = vcombine.low %v148_v36, %v156_v37  ;;  %v3296_v32 = vld [vmem:[#allocation8 + $0x28] sm:$0xff]   ;;  %v3300_v36 = vld [vmem:[#allocation8 + $0x30] sm:$0xff]  }
  0x9b   :  { %v3297_v33 = vld [vmem:[#allocation8 + $0xa8] sm:$0xff]   ;;  %v3301_v37 = vld [vmem:[#allocation8 + $0xb0] sm:$0xff]  }
  0x9c   :  { %1025 = vmatpush1.bf16.msra.mxu0 %v2886_v41  ;;  %1068 = vmatpush1.bf16.msra.mxu1 %v2888_v44  ;;  %v157_v41 = vld [vmem:[#allocation5 + $0x278] sm:$0xff]  ;;  %v164_v44 = vld [vmem:[#allocation5 + $0x2b0] sm:$0xff] }
  0x9d   :  { %1026 = vmatprep.subr.bf16.mxu0 %v2903_v45  ;;  %1069 = vmatprep.subr.bf16.mxu1 %v2905_v48  ;;  %v172_v45 = vld [vmem:[#allocation5 + $0x2f0] sm:$0xff]  ;;  %v165_v48 = vld [vmem:[#allocation5 + $0x2b8] sm:$0xff]  ;;  %v2909_v50 = vcombine.high %v149_v40, %v157_v41 }
  0x9e   :  { %v2923_v54 = vcombine.high %v164_v44, %v172_v45  ;;  %v2922_v59 = vcombine.low %v164_v44, %v172_v45  ;;  %v1210_v44 = vlaneseq }
  0xa0   :  { %1027 = vmatpush1.bf16.msra.mxu0 %v2902_v49  ;;  %1070 = vmatpush1.bf16.msra.mxu1 %v2904_v52  ;;  %v173_v49 = vld [vmem:[#allocation5 + $0x2f8] sm:$0xff]  ;;  %v180_v52 = vld [vmem:[#allocation5 + $0x330] sm:$0xff]  ;;  %v3640_v45 = vshrl.u32 %v1210_v44, 7 }
  0xa1   :  { %1028 = vmatprep.subr.bf16.mxu0 %v2919_v53  ;;  %1071 = vmatprep.subr.bf16.mxu1 %v2921_v56  ;;  %v2908_v53 = vcombine.low %v149_v40, %v157_v41  ;;  %v2925_v55 = vcombine.high %v165_v48, %v173_v49  ;;  %v188_v56 = vld [vmem:[#allocation5 + $0x370] sm:$0xff]  ;;  %v2924_v62 = vcombine.low %v165_v48, %v173_v49  ;;  %v3304_v40 = vld [vmem:[#allocation8 + $0x38] sm:$0xff]  }
  0xa2   :  { %v2939_v63 = vcombine.high %v180_v52, %v188_v56  ;;  %v2938_v4 = vcombine.low %v180_v52, %v188_v56  ;;  %v3305_v41 = vld [vmem:[#allocation8 + $0xb8] sm:$0xff]   ;;  %v1220_v48 = vsub.s32 2, %v3640_v45  ;;  %v1216_v49 = vsub.s32 1, %v3640_v45  ;;  %v3323_v44 = vld [vmem:[#allocation8 + $0x1e0] sm:$0xff]  }
  0xa4   :  { %1029 = vmatpush1.bf16.msra.mxu0 %v2918_v57  ;;  %1072 = vmatpush1.bf16.msra.mxu1 %v2920_v60  ;;  %v181_v57 = vld [vmem:[#allocation5 + $0x338] sm:$0xff]  ;;  %v196_v60 = vld [vmem:[#allocation5 + $0x3b0] sm:$0xff] }
  0xa5   :  { %1030 = vmatprep.subr.bf16.mxu0 %v2935_v61  ;;  %1073 = vmatprep.subr.bf16.mxu1 %v2937_v1  ;;  %v204_v61 = vld [vmem:[#allocation5 + $0x3f0] sm:$0xff]  ;;  %v197_v1 = vld [vmem:[#allocation5 + $0x3b8] sm:$0xff]  ;;  %v2941_v3 = vcombine.high %v181_v57, %v189_v58 }
  0xa6   :  { %v2954_v8 = vcombine.low %v196_v60, %v204_v61 }
  0xa8   :  { %1031 = vmatpush1.bf16.msra.mxu0 %v2934_v2  ;;  %1074 = vmatpush1.bf16.msra.mxu1 %v2936_v5  ;;  %v205_v2 = vld [vmem:[#allocation5 + $0x3f8] sm:$0xff]  ;;  %v2940_v5 = vcombine.low %v181_v57, %v189_v58 }
  0xa9   :  { %1032 = vmatprep.subr.bf16.mxu0 %v2951_v6  ;;  %1075 = vmatprep.subr.bf16.mxu1 %v2953_v9  ;;  %v2955_v6 = vcombine.high %v196_v60, %v204_v61  ;;  %v2957_v7 = vcombine.high %v197_v1, %v205_v2  ;;  %v2956_v9 = vcombine.low %v197_v1, %v205_v2 }
  0xac   :  { %1033 = vmatpush1.bf16.msra.mxu0 %v2950_v10  ;;  %1076 = vmatpush1.bf16.msra.mxu1 %v2952_v14  ;;  %v3274_v10 = vld [vmem:[#allocation8 + $0x40] sm:$0xff]  }
  0xad   :  { %1104 = vmatprep.subr.bf16.mxu0 %v2843_v15  ;;  %1147 = vmatprep.subr.bf16.mxu1 %v2845_v18  ;;  %v3277_v14 = vld [vmem:[#allocation8 + $0x80] sm:$0xff]   ;;  %v3278_v15 = vld [vmem:[#allocation8 + $0x48] sm:$0xff]  }
  0xae   :  { %v3281_v18 = vld [vmem:[#allocation8 + $0x88] sm:$0xff]  }
  0xaf   :  { %1051 = vmatmul.mubr.bf16.vlgmr.msra.gmra.mrb[8].mxu0 %v3624_v12  ;;  %1094 = vmatmul.mubr.bf16.vlgmr.msra.gmra.mrb[8].mxu1 %v3624_v12 }
  0xb0   :  { %1105 = vmatpush1.bf16.msra.mxu0 %v2842_v19  ;;  %1148 = vmatpush1.bf16.msra.mxu1 %v2844_v22  ;;  %v3282_v19 = vld [vmem:[#allocation8 + $0x50] sm:$0xff]  }
  0xb1   :  { %1106 = vmatprep.subr.bf16.mxu0 %v2859_v23  ;;  %1149 = vmatprep.subr.bf16.mxu1 %v2861_v26  ;;  %v3285_v22 = vld [vmem:[#allocation8 + $0x90] sm:$0xff]   ;;  %v3286_v23 = vld [vmem:[#allocation8 + $0x58] sm:$0xff]  }
  0xb2   :  { %1136 = vmatprep.mubr.bf16.mxu0 %v3529_v0  ;;  %1179 = vmatprep.mubr.bf16.mxu1 %v3529_v0  ;;  %v3289_v26 = vld [vmem:[#allocation8 + $0x98] sm:$0xff]  }
  0xb4   :  { %1107 = vmatpush1.bf16.msra.mxu0 %v2858_v27  ;;  %1150 = vmatpush1.bf16.msra.mxu1 %v2860_v30  ;;  %v3290_v27 = vld [vmem:[#allocation8 + $0x60] sm:$0xff]   ;;  %v3294_v30 = vld [vmem:[#allocation8 + $0x68] sm:$0xff]  }
  0xb5   :  { %1108 = vmatprep.subr.bf16.mxu0 %v2875_v31  ;;  %1151 = vmatprep.subr.bf16.mxu1 %v2877_v34  ;;  %v3295_v31 = vld [vmem:[#allocation8 + $0xe8] sm:$0xff]   ;;  %v3298_v34 = vld [vmem:[#allocation8 + $0x70] sm:$0xff]  }
  0xb8   :  { %1109 = vmatpush1.bf16.msra.mxu0 %v2874_v35  ;;  %1152 = vmatpush1.bf16.msra.mxu1 %v2876_v38  ;;  %v3299_v35 = vld [vmem:[#allocation8 + $0xf0] sm:$0xff]   ;;  %v3302_v38 = vld [vmem:[#allocation8 + $0x78] sm:$0xff]  }
  0xb9   :  { %1110 = vmatprep.subr.bf16.mxu0 %v2891_v39  ;;  %1153 = vmatprep.subr.bf16.mxu1 %v2893_v42  ;;  %v3303_v39 = vld [vmem:[#allocation8 + $0xf8] sm:$0xff]   ;;  %v3306_v42 = vld [vmem:[#allocation8 + $0x140] sm:$0xff]  }
  0xbc   :  { %1111 = vmatpush1.bf16.msra.mxu0 %v2890_v43  ;;  %1154 = vmatpush1.bf16.msra.mxu1 %v2892_v46  ;;  %v3307_v43 = vld [vmem:[#allocation8 + $0x1c0] sm:$0xff]   ;;  %v3643_v46 = vsub.s32 0, %v3640_v45 }
  0xbd   :  { %1112 = vmatprep.subr.bf16.mxu0 %v2907_v47  ;;  %1155 = vmatprep.subr.bf16.mxu1 %v2909_v50  ;;  %v3645_v47 = vld [vmem:[#allocation7] sm:$0xff]  ;;  %v1224_v50 = vsub.s32 3, %v3640_v45 }
  0xbe   :  { %v1221_v52 = vrot.slane %v3645_v47, %v1220_v48 }
  0xc0   :  { %1113 = vmatpush1.bf16.msra.mxu0 %v2906_v51  ;;  %1156 = vmatpush1.bf16.msra.mxu1 %v2908_v53  ;;  %v1213_v51 = vrot.slane %v3645_v47, %v3643_v46  ;;  %v1217_v53 = vrot.slane %v3645_v47, %v1216_v49  ;;  %v1292_v56 = vpack.c.bf16 %v1221_v52, %v1221_v52 }
  0xc1   :  { %1114 = vmatprep.subr.bf16.mxu0 %v2923_v54  ;;  %1157 = vmatprep.subr.bf16.mxu1 %v2925_v55  ;;  %v1225_v54 = vrot.slane %v3645_v47, %v1224_v50 }
  0xc2   :  { %v1290_v55 = vpack.c.bf16 %v1213_v51, %v1213_v51  ;;  %v1291_v57 = vpack.c.bf16 %v1217_v53, %v1217_v53  ;;  %v1321_v60 = vpack.i.b16 %v1292_v56, %v1292_v56  ;;  %v3326_v56 = vld [vmem:[#allocation8 + $0x168] sm:$0xff]  }
  0xc3   :  { %v1293_v58 = vpack.c.bf16 %v1225_v54, %v1225_v54  ;;  %v3324_v54 = vld [vmem:[#allocation8 + $0x120] sm:$0xff]  }
  0xc4   :  { %1115 = vmatpush1.bf16.msra.mxu0 %v2922_v59  ;;  %1158 = vmatpush1.bf16.msra.mxu1 %v2924_v62  ;;  %v1307_v59 = vpack.i.b16 %v1290_v55, %v1290_v55  ;;  %v1314_v61 = vpack.i.b16 %v1291_v57, %v1291_v57  ;;  %v3325_v55 = vld [vmem:[#allocation8 + $0x1a0] sm:$0xff]  }
  0xc5   :  { %1116 = vmatprep.subr.bf16.mxu0 %v2939_v63  ;;  %1159 = vmatprep.subr.bf16.mxu1 %v2941_v3  ;;  %v1328_v62 = vpack.i.b16 %v1293_v58, %v1293_v58  ;;  %v3327_v58 = vld [vmem:[#allocation8 + $0x1e8] sm:$0xff]  }
  0xc6   :  { %v1312_v3 = vrot.slane %v1307_v59, %v3643_v46 }
  0xc8   :  { %1117 = vmatpush1.bf16.msra.mxu0 %v2938_v4  ;;  %1160 = vmatpush1.bf16.msra.mxu1 %v2940_v5 }
  0xc9   :  { %1118 = vmatprep.subr.bf16.mxu0 %v2955_v6  ;;  %1161 = vmatprep.subr.bf16.mxu1 %v2957_v7  ;;  %v1326_v6 = vrot.slane %v1321_v60, %v3643_v46  ;;  %v1319_v7 = vrot.slane %v1314_v61, %v3643_v46 }
  0xcc   :  { %1119 = vmatpush1.bf16.msra.mxu0 %v2954_v8  ;;  %1162 = vmatpush1.bf16.msra.mxu1 %v2956_v9 }
  0xcd   :  { %3087 = vmatprep.subr.bf16.mxu0 %v3274_v10  ;;  %3109 = vmatprep.subr.bf16.mxu1 %v3275_v11  ;;  %v1333_v11 = vrot.slane %v1328_v62, %v3643_v46  ;;  %v3328_v62 = vld [vmem:[#allocation8 + $0x128] sm:$0xff]  }
  0xcf   :  { %1137 = vmatmul.mubr.bf16.vlgmr.msra.gmra.mrb[12].mxu0 %v3624_v12  ;;  %1180 = vmatmul.mubr.bf16.vlgmr.msra.gmra.mrb[12].mxu1 %v3624_v12  ;;  %v3291_v12 = vld [vmem:[#allocation8 + $0xe0] sm:$0xff]  }
  0xd0   :  { %3088 = vmatpush3.bf16.msra.mxu0 %v3276_v13  ;;  %3110 = vmatpush3.bf16.msra.mxu1 %v3277_v14 }
  0xd1   :  { %3089 = vmatprep.subr.bf16.mxu0 %v3278_v15  ;;  %3111 = vmatprep.subr.bf16.mxu1 %v3279_v16 }
  0xd4   :  { %3090 = vmatpush3.bf16.msra.mxu0 %v3280_v17  ;;  %3112 = vmatpush3.bf16.msra.mxu1 %v3281_v18 }
  0xd5   :  { %3091 = vmatprep.subr.bf16.mxu0 %v3282_v19  ;;  %3113 = vmatprep.subr.bf16.mxu1 %v3283_v20 }
  0xd8   :  { %3092 = vmatpush3.bf16.msra.mxu0 %v3284_v21  ;;  %3114 = vmatpush3.bf16.msra.mxu1 %v3285_v22 }
  0xd9   :  { %3093 = vmatprep.subr.bf16.mxu0 %v3286_v23  ;;  %3115 = vmatprep.subr.bf16.mxu1 %v3287_v24  ;;  %v3308_v23 = vld [vmem:[#allocation8 + $0x100] sm:$0xff]  }
  0xdc   :  { %3094 = vmatpush3.bf16.msra.mxu0 %v3288_v25  ;;  %3116 = vmatpush3.bf16.msra.mxu1 %v3289_v26  ;;  %v3309_v26 = vld [vmem:[#allocation8 + $0x180] sm:$0xff]  }
  0xdd   :  { %3095 = vmatprep.subr.bf16.mxu0 %v3290_v27  ;;  %3117 = vmatprep.subr.bf16.mxu1 %v3291_v12  ;;  %v3310_v27 = vld [vmem:[#allocation8 + $0x148] sm:$0xff]  }
  0xde   :  { %v3311_v12 = vld [vmem:[#allocation8 + $0x1c8] sm:$0xff]  }
  0xe0   :  { %3096 = vmatpush3.bf16.msra.mxu0 %v3292_v28  ;;  %3118 = vmatpush3.bf16.msra.mxu1 %v3293_v29  ;;  %v3312_v28 = vld [vmem:[#allocation8 + $0x108] sm:$0xff]  }
  0xe1   :  { %3097 = vmatprep.subr.bf16.mxu0 %v3294_v30  ;;  %3119 = vmatprep.subr.bf16.mxu1 %v3295_v31  ;;  %v3313_v29 = vld [vmem:[#allocation8 + $0x188] sm:$0xff]   ;;  %v3314_v30 = vld [vmem:[#allocation8 + $0x150] sm:$0xff]  }
  0xe2   :  { %v3315_v31 = vld [vmem:[#allocation8 + $0x1d0] sm:$0xff]  }
  0xe4   :  { %3098 = vmatpush3.bf16.msra.mxu0 %v3296_v32  ;;  %3120 = vmatpush3.bf16.msra.mxu1 %v3297_v33  ;;  %v3316_v32 = vld [vmem:[#allocation8 + $0x110] sm:$0xff]  }
  0xe5   :  { %3099 = vmatprep.subr.bf16.mxu0 %v3298_v34  ;;  %3121 = vmatprep.subr.bf16.mxu1 %v3299_v35  ;;  %v3317_v33 = vld [vmem:[#allocation8 + $0x190] sm:$0xff]   ;;  %v3318_v34 = vld [vmem:[#allocation8 + $0x158] sm:$0xff]   ;;  %v1228_v35 = vsub.s32 4, %v3640_v45 }
  0xe8   :  { %3100 = vmatpush3.bf16.msra.mxu0 %v3300_v36  ;;  %3122 = vmatpush3.bf16.msra.mxu1 %v3301_v37  ;;  %v3319_v36 = vld [vmem:[#allocation8 + $0x1d8] sm:$0xff]   ;;  %v1236_v37 = vsub.s32 6, %v3640_v45 }
  0xe9   :  { %3101 = vmatprep.subr.bf16.mxu0 %v3302_v38  ;;  %3123 = vmatprep.subr.bf16.mxu1 %v3303_v39  ;;  %v1232_v38 = vsub.s32 5, %v3640_v45  ;;  %v1240_v39 = vsub.s32 7, %v3640_v45 }
  0xea   :  { %v1237_v51 = vrot.slane %v3645_v47, %v1236_v37 }
  0xeb   :  { %v1233_v52 = vrot.slane %v3645_v47, %v1232_v38  ;;  %v1241_v53 = vrot.slane %v3645_v47, %v1240_v39 }
  0xec   :  { %3102 = vmatpush3.bf16.msra.mxu0 %v3304_v40  ;;  %3124 = vmatpush3.bf16.msra.mxu1 %v3305_v41  ;;  %v3320_v40 = vld [vmem:[#allocation8 + $0x118] sm:$0xff]   ;;  %v1296_v59 = vpack.c.bf16 %v1237_v51, %v1237_v51  ;;  %v3343_v51 = vld [vmem:[#allocation8 + $0x2c8] sm:$0xff]  }
  0xed   :  { %3131 = vmatprep.subr.bf16.mxu0 %v3306_v42  ;;  %3153 = vmatprep.subr.bf16.mxu1 %v3307_v43  ;;  %v3321_v41 = vld [vmem:[#allocation8 + $0x198] sm:$0xff]   ;;  %v3322_v42 = vld [vmem:[#allocation8 + $0x160] sm:$0xff]   ;;  %v1229_v43 = vrot.slane %v3645_v47, %v1228_v35  ;;  %v1295_v60 = vpack.c.bf16 %v1233_v52, %v1233_v52  ;;  %v1297_v61 = vpack.c.bf16 %v1241_v53, %v1241_v53  ;;  %v3344_v52 = vld [vmem:[#allocation8 + $0x208] sm:$0xff]  }
  0xee   :  { %v1349_v47 = vpack.i.b16 %v1296_v59, %v1296_v59  ;;  %v3345_v53 = vld [vmem:[#allocation8 + $0x288] sm:$0xff]   ;;  %v3351_v59 = vld [vmem:[#allocation8 + $0x2d8] sm:$0xff]  }
  0xef   :  { %v1294_v57 = vpack.c.bf16 %v1229_v43, %v1229_v43  ;;  %v3341_v43 = vld [vmem:[#allocation8 + $0x280] sm:$0xff]  }
 0x142   :  { %v880_v63 = vpop.f32.mrb[0].mxu0  ;;  %v923_v1 = vpop.f32.mrb[0].mxu1 }
 0x143   :  { %v882_v2 = vpop.f32.mrb[1].mxu0  ;;  %v925_v4 = vpop.f32.mrb[1].mxu1 }
 0x144   :  { %v884_v5 = vpop.f32.mrb[2].mxu0  ;;  %v927_v9 = vpop.f32.mrb[2].mxu1 }
 0x145   :  { %v1190_v8 = vpack.c.bf16 %v884_v5, %v880_v63  ;;  %v886_v10 = vpop.f32.mrb[3].mxu0  ;;  %v1192_v13 = vpack.c.bf16 %v927_v9, %v923_v1  ;;  %v929_v15 = vpop.f32.mrb[3].mxu1  ;;  %v3329_v63 = vld [vmem:[#allocation8 + $0x1a8] sm:$0xff]   ;;  %v1335_v1 = vpack.i.b16 %v1294_v57, %v1294_v57  ;;  %v1356_v5 = vpack.i.b16 %v1297_v61, %v1297_v61  ;;  %v3349_v57 = vld [vmem:[#allocation8 + $0x290] sm:$0xff]   ;;  %v3352_v61 = vld [vmem:[#allocation8 + $0x218] sm:$0xff]  }
 0x146   :  { %v1191_v14 = vpack.c.bf16 %v886_v10, %v882_v2  ;;  %v1193_v17 = vpack.c.bf16 %v929_v15, %v925_v4  ;;  %v3330_v2 = vld [vmem:[#allocation8 + $0x170] sm:$0xff]  }
 0x147   :  { %v1418_v16 = vadd.bf16 %v1312_v3, %v1190_v8  ;;  %v1420_v18 = vadd.bf16 %v1326_v6, %v1192_v13  ;;  %v1342_v3 = vpack.i.b16 %v1295_v60, %v1295_v60  ;;  %v3331_v4 = vld [vmem:[#allocation8 + $0x1f0] sm:$0xff]   ;;  %v1340_v10 = vrot.slane %v1335_v1, %v3643_v46  ;;  %v3334_v13 = vld [vmem:[#allocation8 + $0x178] sm:$0xff]  }
 0x148   :  { %v1419_v19 = vadd.bf16 %v1319_v7, %v1191_v14  ;;  %v1421_v20 = vadd.bf16 %v1333_v11, %v1193_v17  ;;  %v3332_v7 = vld [vmem:[#allocation8 + $0x130] sm:$0xff]   ;;  %v3693_v60 = vld [vmem:[#allocation7 + $0x8] sm:$0xff] }
 0x149   :  { %v1436_v21 = vmax.bf16 %v3529_v0, %v1420_v18  ;;  %v1434_v24 = vmax.bf16 %v3529_v0, %v1418_v16  ;;  %v3333_v11 = vld [vmem:[#allocation8 + $0x1b0] sm:$0xff]   ;;  %v1354_v16 = vrot.slane %v1349_v47, %v3643_v46  ;;  %v1347_v17 = vrot.slane %v1342_v3, %v3643_v46  ;;  %v3335_v18 = vld [vmem:[#allocation8 + $0x1f8] sm:$0xff]  }
 0x14a   :  { %v1435_v22 = vmax.bf16 %v3529_v0, %v1419_v19  ;;  %v1437_v25 = vmax.bf16 %v3529_v0, %v1421_v20  ;;  %v1245_v1 = vrot.slane %v3693_v60, %v3643_v46  ;;  %v1253_v47 = vrot.slane %v3693_v60, %v1220_v48 }
 0x14b   :  { %v1249_v3 = vrot.slane %v3693_v60, %v1216_v49  ;;  %v3361_v49 = vld [vmem:[#allocation8 + $0x2a8] sm:$0xff]  }
 0x14c   :  { %2513 = vmatprep.mubr.bf16.mxu0 %v1435_v22  ;;  %2554 = vmatprep.mubr.bf16.mxu1 %v1437_v25  ;;  %v1361_v22 = vrot.slane %v1356_v5, %v3643_v46  ;;  %v3356_v5 = vld [vmem:[#allocation8 + $0x220] sm:$0xff]  }
 0x14d   :  { %2514 = vmatmul.mubr.bf16.vlgmr.msra.gmra.mrb[16].mxu0 %v1434_v24  ;;  %2555 = vmatmul.mubr.bf16.vlgmr.msra.gmra.mrb[16].mxu1 %v1436_v21 }
 0x14e   :  { %3132 = vmatpush3.bf16.msra.mxu0 %v3308_v23  ;;  %3154 = vmatpush3.bf16.msra.mxu1 %v3309_v26  ;;  %v3336_v26 = vld [vmem:[#allocation8 + $0x138] sm:$0xff]  }
 0x14f   :  { %3133 = vmatprep.subr.bf16.mxu0 %v3310_v27  ;;  %3155 = vmatprep.subr.bf16.mxu1 %v3311_v12 }
 0x152   :  { %3134 = vmatpush3.bf16.msra.mxu0 %v3312_v28  ;;  %3156 = vmatpush3.bf16.msra.mxu1 %v3313_v29  ;;  %v3337_v28 = vld [vmem:[#allocation8 + $0x1b8] sm:$0xff]   ;;  %v3338_v29 = vld [vmem:[#allocation8 + $0x240] sm:$0xff]  }
 0x153   :  { %3135 = vmatprep.subr.bf16.mxu0 %v3314_v30  ;;  %3157 = vmatprep.subr.bf16.mxu1 %v3315_v31 }
 0x156   :  { %3136 = vmatpush3.bf16.msra.mxu0 %v3316_v32  ;;  %3158 = vmatpush3.bf16.msra.mxu1 %v3317_v33  ;;  %v3339_v32 = vld [vmem:[#allocation8 + $0x2c0] sm:$0xff]  }
 0x157   :  { %3137 = vmatprep.subr.bf16.mxu0 %v3318_v34  ;;  %3159 = vmatprep.subr.bf16.mxu1 %v3319_v36 }
 0x15a   :  { %3138 = vmatpush3.bf16.msra.mxu0 %v3320_v40  ;;  %3160 = vmatpush3.bf16.msra.mxu1 %v3321_v41  ;;  %v3340_v40 = vld [vmem:[#allocation8 + $0x200] sm:$0xff]  }
 0x15b   :  { %3139 = vmatprep.subr.bf16.mxu0 %v3322_v42  ;;  %3161 = vmatprep.subr.bf16.mxu1 %v3323_v44  ;;  %v3342_v44 = vld [vmem:[#allocation8 + $0x248] sm:$0xff]  }
 0x15e   :  { %3140 = vmatpush3.bf16.msra.mxu0 %v3324_v54  ;;  %3162 = vmatpush3.bf16.msra.mxu1 %v3325_v55  ;;  %v3346_v54 = vld [vmem:[#allocation8 + $0x250] sm:$0xff]  }
 0x15f   :  { %3141 = vmatprep.subr.bf16.mxu0 %v3326_v56  ;;  %3163 = vmatprep.subr.bf16.mxu1 %v3327_v58  ;;  %v3347_v55 = vld [vmem:[#allocation8 + $0x2d0] sm:$0xff]   ;;  %v3350_v58 = vld [vmem:[#allocation8 + $0x258] sm:$0xff]  }
 0x160   :  { %v3348_v56 = vld [vmem:[#allocation8 + $0x210] sm:$0xff]  }
 0x162   :  { %v966_v6 = vpop.f32.mrb[4].mxu0  ;;  %3142 = vmatpush3.bf16.msra.mxu0 %v3328_v62  ;;  %v1009_v8 = vpop.f32.mrb[4].mxu1  ;;  %3164 = vmatpush3.bf16.msra.mxu1 %v3329_v63  ;;  %v3353_v62 = vld [vmem:[#allocation8 + $0x298] sm:$0xff]   ;;  %v3354_v63 = vld [vmem:[#allocation8 + $0x260] sm:$0xff]  }
 0x163   :  { %v968_v9 = vpop.f32.mrb[5].mxu0  ;;  %3143 = vmatprep.subr.bf16.mxu0 %v3330_v2  ;;  %v1011_v14 = vpop.f32.mrb[5].mxu1  ;;  %3165 = vmatprep.subr.bf16.mxu1 %v3331_v4  ;;  %v3355_v2 = vld [vmem:[#allocation8 + $0x2e0] sm:$0xff]   ;;  %v1257_v4 = vrot.slane %v3693_v60, %v1224_v50 }
 0x164   :  { %v970_v15 = vpop.f32.mrb[6].mxu0  ;;  %v1013_v20 = vpop.f32.mrb[6].mxu1 }
 0x165   :  { %v1194_v19 = vpack.c.bf16 %v970_v15, %v966_v6  ;;  %v972_v21 = vpop.f32.mrb[7].mxu0  ;;  %v1196_v23 = vpack.c.bf16 %v1013_v20, %v1009_v8  ;;  %v1015_v25 = vpop.f32.mrb[7].mxu1  ;;  %v3357_v6 = vld [vmem:[#allocation8 + $0x2a0] sm:$0xff]   ;;  %v1298_v8 = vpack.c.bf16 %v1245_v1, %v1245_v1  ;;  %v1301_v48 = vpack.c.bf16 %v1257_v4, %v1257_v4  ;;  %v3362_v15 = vld [vmem:[#allocation8 + $0x270] sm:$0xff]   ;;  %v3375_v1 = vld [vmem:[#allocation8 + $0x3c8] sm:$0xff]  }
 0x166   :  { %v1195_v24 = vpack.c.bf16 %v972_v21, %v968_v9  ;;  %3144 = vmatpush3.bf16.msra.mxu0 %v3332_v7  ;;  %v1197_v12 = vpack.c.bf16 %v1015_v25, %v1011_v14  ;;  %3166 = vmatpush3.bf16.msra.mxu1 %v3333_v11  ;;  %v3358_v7 = vld [vmem:[#allocation8 + $0x268] sm:$0xff]   ;;  %v1299_v11 = vpack.c.bf16 %v1249_v3, %v1249_v3  ;;  %v3364_v20 = vld [vmem:[#allocation8 + $0x230] sm:$0xff]   ;;  %v3366_v25 = vld [vmem:[#allocation8 + $0x278] sm:$0xff]  }
 0x167   :  { %v1422_v27 = vadd.bf16 %v1340_v10, %v1194_v19  ;;  %3145 = vmatprep.subr.bf16.mxu0 %v3334_v13  ;;  %v1424_v30 = vadd.bf16 %v1354_v16, %v1196_v23  ;;  %3167 = vmatprep.subr.bf16.mxu1 %v3335_v18  ;;  %v3359_v9 = vld [vmem:[#allocation8 + $0x2e8] sm:$0xff]   ;;  %v1300_v10 = vpack.c.bf16 %v1253_v47, %v1253_v47  ;;  %v3378_v3 = vld [vmem:[#allocation8 + $0x350] sm:$0xff]  }
 0x168   :  { %v1423_v31 = vadd.bf16 %v1347_v17, %v1195_v24  ;;  %v1425_v33 = vadd.bf16 %v1361_v22, %v1197_v12  ;;  %v3360_v13 = vld [vmem:[#allocation8 + $0x228] sm:$0xff]   ;;  %v1363_v14 = vpack.i.b16 %v1298_v8, %v1298_v8  ;;  %v1370_v16 = vpack.i.b16 %v1299_v11, %v1299_v11  ;;  %v3363_v17 = vld [vmem:[#allocation8 + $0x2f0] sm:$0xff]   ;;  %v3383_v8 = vld [vmem:[#allocation8 + $0x3d8] sm:$0xff]  }
 0x169   :  { %v1440_v34 = vmax.bf16 %v3529_v0, %v1424_v30  ;;  %v1438_v41 = vmax.bf16 %v3529_v0, %v1422_v27  ;;  %v1377_v50 = vpack.i.b16 %v1300_v10, %v1300_v10  ;;  %v1384_v18 = vpack.i.b16 %v1301_v48, %v1301_v48  ;;  %v3365_v24 = vld [vmem:[#allocation8 + $0x2b0] sm:$0xff]   ;;  %v3377_v47 = vld [vmem:[#allocation8 + $0x388] sm:$0xff]   ;;  %v3385_v10 = vld [vmem:[#allocation8 + $0x398] sm:$0xff]  }
 0x16a   :  { %3146 = vmatpush3.bf16.msra.mxu0 %v3336_v26  ;;  %v1439_v36 = vmax.bf16 %v3529_v0, %v1423_v31  ;;  %3168 = vmatpush3.bf16.msra.mxu1 %v3337_v28  ;;  %v1441_v42 = vmax.bf16 %v3529_v0, %v1425_v33  ;;  %v1368_v23 = vrot.slane %v1363_v14, %v3643_v46  ;;  %v3379_v4 = vld [vmem:[#allocation8 + $0x3d0] sm:$0xff]   ;;  %v3386_v11 = vld [vmem:[#allocation8 + $0x360] sm:$0xff]  }
 0x16b   :  { %3175 = vmatprep.subr.bf16.mxu0 %v3338_v29  ;;  %3197 = vmatprep.subr.bf16.mxu1 %v3339_v32  ;;  %v1382_v12 = vrot.slane %v1377_v50, %v3643_v46  ;;  %v1375_v28 = vrot.slane %v1370_v16, %v3643_v46  ;;  %v3367_v29 = vld [vmem:[#allocation8 + $0x2f8] sm:$0xff]   ;;  %v1389_v33 = vrot.slane %v1384_v18, %v3643_v46  ;;  %v3388_v50 = vld [vmem:[#allocation8 + $0x320] sm:$0xff]   ;;  %v3391_v18 = vld [vmem:[#allocation8 + $0x3e8] sm:$0xff]  }
 0x16c   :  { %2595 = vmatprep.mubr.bf16.mxu0 %v1439_v36  ;;  %2636 = vmatprep.mubr.bf16.mxu1 %v1441_v42  ;;  %v1261_v48 = vrot.slane %v3693_v60, %v1228_v35  ;;  %v1265_v14 = vrot.slane %v3693_v60, %v1232_v38  ;;  %v3389_v16 = vld [vmem:[#allocation8 + $0x3a0] sm:$0xff]   ;;  %v3390_v35 = vld [vmem:[#allocation8 + $0x368] sm:$0xff]  }
 0x16d   :  { %2596 = vmatmul.mubr.bf16.vlgmr.msra.gmra.mrb[20].mxu0 %v1438_v41  ;;  %2637 = vmatmul.mubr.bf16.vlgmr.msra.gmra.mrb[20].mxu1 %v1440_v34  ;;  %v3368_v41 = vld [vmem:[#allocation8 + $0x238] sm:$0xff]   ;;  %v3393_v38 = vld [vmem:[#allocation8 + $0x3a8] sm:$0xff]  }
 0x16e   :  { %3176 = vmatpush3.bf16.msra.mxu0 %v3340_v40  ;;  %3198 = vmatpush3.bf16.msra.mxu1 %v3341_v43 }
 0x16f   :  { %3177 = vmatprep.subr.bf16.mxu0 %v3342_v44  ;;  %3199 = vmatprep.subr.bf16.mxu1 %v3343_v51  ;;  %v3369_v44 = vld [vmem:[#allocation8 + $0x2b8] sm:$0xff]   ;;  %v3370_v51 = vld [vmem:[#allocation8 + $0x340] sm:$0xff]  }
 0x172   :  { %3178 = vmatpush3.bf16.msra.mxu0 %v3344_v52  ;;  %3200 = vmatpush3.bf16.msra.mxu1 %v3345_v53 }
 0x173   :  { %3179 = vmatprep.subr.bf16.mxu0 %v3346_v54  ;;  %3201 = vmatprep.subr.bf16.mxu1 %v3347_v55  ;;  %v3371_v54 = vld [vmem:[#allocation8 + $0x3c0] sm:$0xff]  }
 0x176   :  { %3180 = vmatpush3.bf16.msra.mxu0 %v3348_v56  ;;  %3202 = vmatpush3.bf16.msra.mxu1 %v3349_v57 }
 0x177   :  { %3181 = vmatprep.subr.bf16.mxu0 %v3350_v58  ;;  %3203 = vmatprep.subr.bf16.mxu1 %v3351_v59  ;;  %v3372_v58 = vld [vmem:[#allocation8 + $0x300] sm:$0xff]  }
 0x17a   :  { %3182 = vmatpush3.bf16.msra.mxu0 %v3352_v61  ;;  %3204 = vmatpush3.bf16.msra.mxu1 %v3353_v62  ;;  %v3373_v62 = vld [vmem:[#allocation8 + $0x380] sm:$0xff]  }
 0x17b   :  { %3183 = vmatprep.subr.bf16.mxu0 %v3354_v63  ;;  %3205 = vmatprep.subr.bf16.mxu1 %v3355_v2  ;;  %v3374_v63 = vld [vmem:[#allocation8 + $0x348] sm:$0xff]  }
 0x17c   :  { %v3376_v2 = vld [vmem:[#allocation8 + $0x308] sm:$0xff]  }
 0x17e   :  { %3184 = vmatpush3.bf16.msra.mxu0 %v3356_v5  ;;  %3206 = vmatpush3.bf16.msra.mxu1 %v3357_v6  ;;  %v3380_v5 = vld [vmem:[#allocation8 + $0x310] sm:$0xff]  }
 0x17f   :  { %3185 = vmatprep.subr.bf16.mxu0 %v3358_v7  ;;  %3207 = vmatprep.subr.bf16.mxu1 %v3359_v9  ;;  %v3381_v6 = vld [vmem:[#allocation8 + $0x390] sm:$0xff]   ;;  %v3382_v7 = vld [vmem:[#allocation8 + $0x358] sm:$0xff]  }
 0x180   :  { %v3384_v9 = vld [vmem:[#allocation8 + $0x318] sm:$0xff]  }
 0x182   :  { %v1052_v19 = vpop.f32.mrb[8].mxu0  ;;  %3186 = vmatpush3.bf16.msra.mxu0 %v3360_v13  ;;  %v1095_v21 = vpop.f32.mrb[8].mxu1  ;;  %3208 = vmatpush3.bf16.msra.mxu1 %v3361_v49  ;;  %v3387_v13 = vld [vmem:[#allocation8 + $0x3e0] sm:$0xff]   ;;  %v1269_v49 = vrot.slane %v3693_v60, %v1236_v37 }
 0x183   :  { %v1054_v22 = vpop.f32.mrb[9].mxu0  ;;  %3187 = vmatprep.subr.bf16.mxu0 %v3362_v15  ;;  %v1097_v26 = vpop.f32.mrb[9].mxu1  ;;  %3209 = vmatprep.subr.bf16.mxu1 %v3363_v17  ;;  %v1273_v15 = vrot.slane %v3693_v60, %v1240_v39  ;;  %v1302_v17 = vpack.c.bf16 %v1261_v48, %v1261_v48 }
 0x184   :  { %v1056_v27 = vpop.f32.mrb[10].mxu0  ;;  %v1099_v31 = vpop.f32.mrb[10].mxu1 }
 0x185   :  { %v1198_v30 = vpack.c.bf16 %v1056_v27, %v1052_v19  ;;  %v1058_v32 = vpop.f32.mrb[11].mxu0  ;;  %v1200_v34 = vpack.c.bf16 %v1099_v31, %v1095_v21  ;;  %v1101_v40 = vpop.f32.mrb[11].mxu1  ;;  %v1304_v19 = vpack.c.bf16 %v1269_v49, %v1269_v49  ;;  %v1305_v37 = vpack.c.bf16 %v1273_v15, %v1273_v15  ;;  %v3392_v21 = vld [vmem:[#allocation8 + $0x328] sm:$0xff]  }
 0x186   :  { %v1199_v36 = vpack.c.bf16 %v1058_v32, %v1054_v22  ;;  %3188 = vmatpush3.bf16.msra.mxu0 %v3364_v20  ;;  %v1201_v43 = vpack.c.bf16 %v1101_v40, %v1097_v26  ;;  %3210 = vmatpush3.bf16.msra.mxu1 %v3365_v24  ;;  %v1303_v20 = vpack.c.bf16 %v1265_v14, %v1265_v14  ;;  %v3394_v22 = vld [vmem:[#allocation8 + $0x370] sm:$0xff]  }
 0x187   :  { %v1426_v42 = vadd.bf16 %v1368_v23, %v1198_v30  ;;  %3189 = vmatprep.subr.bf16.mxu0 %v3366_v25  ;;  %v1428_v52 = vadd.bf16 %v1382_v12, %v1200_v34  ;;  %3211 = vmatprep.subr.bf16.mxu1 %v3367_v29  ;;  %v1391_v45 = vpack.i.b16 %v1302_v17, %v1302_v17  ;;  %v3395_v23 = vld [vmem:[#allocation8 + $0x3f0] sm:$0xff]   ;;  %v3398_v30 = vld [vmem:[#allocation8 + $0x378] sm:$0xff]  }
 0x188   :  { %v1427_v53 = vadd.bf16 %v1375_v28, %v1199_v36  ;;  %v1429_v55 = vadd.bf16 %v1389_v33, %v1201_v43  ;;  %v1405_v39 = vpack.i.b16 %v1304_v19, %v1304_v19  ;;  %v1398_v60 = vpack.i.b16 %v1303_v20, %v1303_v20  ;;  %v3396_v26 = vld [vmem:[#allocation8 + $0x330] sm:$0xff]   ;;  %v3399_v36 = vld [vmem:[#allocation8 + $0x3f8] sm:$0xff]  }
 0x189   :  { %v1444_v56 = vmax.bf16 %v3529_v0, %v1428_v52  ;;  %v1442_v59 = vmax.bf16 %v3529_v0, %v1426_v42  ;;  %v1412_v24 = vpack.i.b16 %v1305_v37, %v1305_v37  ;;  %v1396_v28 = vrot.slane %v1391_v45, %v3643_v46  ;;  %v3397_v29 = vld [vmem:[#allocation8 + $0x3b0] sm:$0xff]  }
 0x18a   :  { %3190 = vmatpush3.bf16.msra.mxu0 %v3368_v41  ;;  %v1443_v57 = vmax.bf16 %v3529_v0, %v1427_v53  ;;  %3212 = vmatpush3.bf16.msra.mxu1 %v3369_v44  ;;  %v1445_v61 = vmax.bf16 %v3529_v0, %v1429_v55  ;;  %v1410_v33 = vrot.slane %v1405_v39, %v3643_v46  ;;  %v3400_v53 = vld [vmem:[#allocation8 + $0x338] sm:$0xff]  }
 0x18b   :  { %3219 = vmatprep.subr.bf16.mxu0 %v3370_v51  ;;  %3241 = vmatprep.subr.bf16.mxu1 %v3371_v54  ;;  %v1403_v34 = vrot.slane %v1398_v60, %v3643_v46  ;;  %v1417_v43 = vrot.slane %v1412_v24, %v3643_v46 }
 0x18c   :  { %2677 = vmatprep.mubr.bf16.mxu0 %v1443_v57  ;;  %2718 = vmatprep.mubr.bf16.mxu1 %v1445_v61 }
 0x18d   :  { %2678 = vmatmul.mubr.bf16.vlgmr.msra.gmra.mrb[24].mxu0 %v1442_v59  ;;  %2719 = vmatmul.mubr.bf16.vlgmr.msra.gmra.mrb[24].mxu1 %v1444_v56  ;;  %v3401_v56 = vld [vmem:[#allocation8 + $0x3b8] sm:$0xff]  }
 0x18e   :  { %3220 = vmatpush3.bf16.msra.mxu0 %v3372_v58  ;;  %3242 = vmatpush3.bf16.msra.mxu1 %v3373_v62 }
 0x18f   :  { %3221 = vmatprep.subr.bf16.mxu0 %v3374_v63  ;;  %3243 = vmatprep.subr.bf16.mxu1 %v3375_v1 }
 0x192   :  { %3222 = vmatpush3.bf16.msra.mxu0 %v3376_v2  ;;  %3244 = vmatpush3.bf16.msra.mxu1 %v3377_v47  ;;  %v2958_v47 = vld [vmem:[%s3756_s4] ss:$0 sm:$0xff]  ;;  %s3530_s4 = smov [#allocation10]  }
 0x193   :  { %3223 = vmatprep.subr.bf16.mxu0 %v3378_v3  ;;  %3245 = vmatprep.subr.bf16.mxu1 %v3379_v4  ;;  %s2816_s20 = sshll.u32 %s3530_s4, 4  ;;  %s2817_s20 = int_to_ptr.vmem [resolvable:$true] %s2816_s20 }
 0x194   :  { %s3490_s21 = scalar_lea.vmem %s2817_s20, 256  ;;  %p3495_p5 = scmp.lt.s32.totalorder %s2817_s20, %s2817_s20 }
 0x195   :  { %p3491_p4 = scmp.ne.s32.totalorder %s2817_s20, %s3490_s21  ;;  %p3496_p6 = scmp.lt.s32.totalorder %s3490_s21, %s3490_s21 }
 0x196   :  { %3224 = vmatpush3.bf16.msra.mxu0 %v3380_v5  ;;  %3246 = vmatpush3.bf16.msra.mxu1 %v3381_v6 }
 0x197   :  { %3225 = vmatprep.subr.bf16.mxu0 %v3382_v7  ;;  %3247 = vmatprep.subr.bf16.mxu1 %v3383_v8  ;;  %p3497_p7 = por %p3496_p6, %p3495_p5 }
 0x199   :  { %p3498_p8 = pnand %p3497_p7, %p3491_p4 }
 0x19a   :  { %3226 = vmatpush3.bf16.msra.mxu0 %v3384_v9  ;;  %3248 = vmatpush3.bf16.msra.mxu1 %v3385_v10 }
 0x19b   :  { %3227 = vmatprep.subr.bf16.mxu0 %v3386_v11  ;;  %3249 = vmatprep.subr.bf16.mxu1 %v3387_v13 }
 0x19e   :  { %3228 = vmatpush3.bf16.msra.mxu0 %v3388_v50  ;;  %3250 = vmatpush3.bf16.msra.mxu1 %v3389_v16 }
 0x19f   :  { %3229 = vmatprep.subr.bf16.mxu0 %v3390_v35  ;;  %3251 = vmatprep.subr.bf16.mxu1 %v3391_v18 }
 0x1a2   :  { %v1138_v25 = vpop.f32.mrb[12].mxu0  ;;  %3230 = vmatpush3.bf16.msra.mxu0 %v3392_v21  ;;  %v1181_v27 = vpop.f32.mrb[12].mxu1  ;;  %3252 = vmatpush3.bf16.msra.mxu1 %v3393_v38 }
 0x1a3   :  { %v1140_v12 = vpop.f32.mrb[13].mxu0  ;;  %3231 = vmatprep.subr.bf16.mxu0 %v3394_v22  ;;  %v1183_v31 = vpop.f32.mrb[13].mxu1  ;;  %3253 = vmatprep.subr.bf16.mxu1 %v3395_v23 }
 0x1a4   :  { %v1142_v32 = vpop.f32.mrb[14].mxu0  ;;  %v1185_v41 = vpop.f32.mrb[14].mxu1 }
 0x1a5   :  { %v1202_v40 = vpack.c.bf16 %v1142_v32, %v1138_v25  ;;  %v1144_v42 = vpop.f32.mrb[15].mxu0  ;;  %v1204_v44 = vpack.c.bf16 %v1185_v41, %v1181_v27  ;;  %v1187_v52 = vpop.f32.mrb[15].mxu1 }
 0x1a6   :  { %v1203_v51 = vpack.c.bf16 %v1144_v42, %v1140_v12  ;;  %3232 = vmatpush3.bf16.msra.mxu0 %v3396_v26  ;;  %v1205_v55 = vpack.c.bf16 %v1187_v52, %v1183_v31  ;;  %3254 = vmatpush3.bf16.msra.mxu1 %v3397_v29 }
 0x1a7   :  { %v1430_v54 = vadd.bf16 %v1396_v28, %v1202_v40  ;;  %3233 = vmatprep.subr.bf16.mxu0 %v3398_v30  ;;  %v1432_v57 = vadd.bf16 %v1410_v33, %v1204_v44  ;;  %3255 = vmatprep.subr.bf16.mxu1 %v3399_v36 }
 0x1a8   :  { %v1431_v58 = vadd.bf16 %v1403_v34, %v1203_v51  ;;  %v1433_v59 = vadd.bf16 %v1417_v43, %v1205_v55 }
 0x1a9   :  { %v1446_v62 = vmax.bf16 %v3529_v0, %v1430_v54  ;;  %v1448_v63 = vmax.bf16 %v3529_v0, %v1432_v57 }
 0x1aa   :  { %3234 = vmatpush3.bf16.msra.mxu0 %v3400_v53  ;;  %v1447_v61 = vmax.bf16 %v3529_v0, %v1431_v58  ;;  %3256 = vmatpush3.bf16.msra.mxu1 %v3401_v56  ;;  %v1449_v46 = vmax.bf16 %v3529_v0, %v1433_v59 }
 0x1ac   :  { %2759 = vmatprep.mubr.bf16.mxu0 %v1447_v61  ;;  %2800 = vmatprep.mubr.bf16.mxu1 %v1449_v46 }
 0x1ad   :  { %2760 = vmatmul.mubr.bf16.vlgmr.msra.gmra.mrb[28].mxu0 %v1446_v62  ;;  %2801 = vmatmul.mubr.bf16.vlgmr.msra.gmra.mrb[28].mxu1 %v1448_v63 }
 0x220   :  { %v3103_v1 = vpop.f32.mrb[16].mxu0  ;;  %v3125_v2 = vpop.f32.mrb[16].mxu1 }
 0x221   :  { %v3104_v3 = vpop.f32.mrb[17].mxu0  ;;  %v3126_v5 = vpop.f32.mrb[17].mxu1 }
 0x222   :  { %v3105_v4 = vadd.f32 %v3104_v3, %v3103_v1  ;;  %v3106_v6 = vpop.f32.mrb[18].mxu0  ;;  %v3127_v7 = vadd.f32 %v3126_v5, %v3125_v2  ;;  %v3128_v8 = vpop.f32.mrb[18].mxu1 }
 0x223   :  { %v3107_v9 = vpop.f32.mrb[19].mxu0  ;;  %v3129_v0 = vpop.f32.mrb[19].mxu1 }
 0x224   :  { %v2516_v10 = vadd.f32 %v3105_v4, %v2958_v47  ;;  %v3108_v11 = vadd.f32 %v3107_v9, %v3106_v6  ;;  %v3130_v48 = vadd.f32 %v3129_v0, %v3128_v8 }
 0x226   :  { %v2557_v13 = vadd.f32 %v3127_v7, %v2516_v10  ;;  %v2519_v49 = vadd.f32 %v3108_v11, %v2958_v47 }
 0x228   :  { %v2560_v14 = vadd.f32 %v3130_v48, %v2519_v49 }
 0x240   :  { %v3147_v15 = vpop.f32.mrb[20].mxu0  ;;  %v3169_v50 = vpop.f32.mrb[20].mxu1 }
 0x241   :  { %v3148_v16 = vpop.f32.mrb[21].mxu0  ;;  %v3170_v17 = vpop.f32.mrb[21].mxu1 }
 0x242   :  { %v3149_v35 = vadd.f32 %v3148_v16, %v3147_v15  ;;  %v3150_v18 = vpop.f32.mrb[22].mxu0  ;;  %v3171_v19 = vadd.f32 %v3170_v17, %v3169_v50  ;;  %v3172_v20 = vpop.f32.mrb[22].mxu1 }
 0x243   :  { %v3151_v37 = vpop.f32.mrb[23].mxu0  ;;  %v3173_v45 = vpop.f32.mrb[23].mxu1 }
 0x244   :  { %v2598_v21 = vadd.f32 %v3149_v35, %v2557_v13  ;;  %v3152_v38 = vadd.f32 %v3151_v37, %v3150_v18  ;;  %v3174_v22 = vadd.f32 %v3173_v45, %v3172_v20 }
 0x246   :  { %v2639_v39 = vadd.f32 %v3171_v19, %v2598_v21  ;;  %v2601_v60 = vadd.f32 %v3152_v38, %v2560_v14 }
 0x248   :  { %v2642_v23 = vadd.f32 %v3174_v22, %v2601_v60 }
 0x260   :  { %v3191_v24 = vpop.f32.mrb[24].mxu0  ;;  %v3213_v25 = vpop.f32.mrb[24].mxu1 }
 0x261   :  { %v3192_v26 = vpop.f32.mrb[25].mxu0  ;;  %v3214_v12 = vpop.f32.mrb[25].mxu1 }
 0x262   :  { %v3193_v27 = vadd.f32 %v3192_v26, %v3191_v24  ;;  %v3194_v28 = vpop.f32.mrb[26].mxu0  ;;  %v3215_v29 = vadd.f32 %v3214_v12, %v3213_v25  ;;  %v3216_v30 = vpop.f32.mrb[26].mxu1 }
 0x263   :  { %v3195_v31 = vpop.f32.mrb[27].mxu0  ;;  %v3217_v34 = vpop.f32.mrb[27].mxu1 }
 0x264   :  { %v2680_v32 = vadd.f32 %v3193_v27, %v2639_v39  ;;  %v3196_v33 = vadd.f32 %v3195_v31, %v3194_v28  ;;  %v3218_v36 = vadd.f32 %v3217_v34, %v3216_v30 }
 0x266   :  { %v2721_v40 = vadd.f32 %v3215_v29, %v2680_v32  ;;  %v2683_v41 = vadd.f32 %v3196_v33, %v2642_v23 }
 0x268   :  { %v2724_v42 = vadd.f32 %v3218_v36, %v2683_v41 }
 0x280   :  { %v3235_v43 = vpop.f32.mrb[28].mxu0  ;;  %v3257_v44 = vpop.f32.mrb[28].mxu1 }
 0x281   :  { %v3236_v51 = vpop.f32.mrb[29].mxu0  ;;  %v3258_v53 = vpop.f32.mrb[29].mxu1 }
 0x282   :  { %v3237_v52 = vadd.f32 %v3236_v51, %v3235_v43  ;;  %v3238_v54 = vpop.f32.mrb[30].mxu0  ;;  %v3259_v55 = vadd.f32 %v3258_v53, %v3257_v44  ;;  %v3260_v56 = vpop.f32.mrb[30].mxu1 }
 0x283   :  { %v3239_v57 = vpop.f32.mrb[31].mxu0  ;;  %v3261_v61 = vpop.f32.mrb[31].mxu1 }
 0x284   :  { %v2762_v58 = vadd.f32 %v3237_v52, %v2721_v40  ;;  %v3240_v59 = vadd.f32 %v3239_v57, %v3238_v54  ;;  %v3262_v62 = vadd.f32 %v3261_v61, %v3260_v56 }
 0x286   :  { %v2803_v46 = vadd.f32 %v3259_v55, %v2762_v58  ;;  %v2765_v63 = vadd.f32 %v3240_v59, %v2724_v42 }
 0x288   :  { %2809 = vst [vmem:[#allocation10] sm:$0xff] %v2803_v46  ;;  %v2806_v1 = vadd.f32 %v3262_v62, %v2765_v63 }
 0x28a   :  { %2810 = vst [vmem:[#allocation10 + $0x8] sm:$0xff] %v2806_v1 }
 0x28b   :  { %3501 = shalt.err (!%p3498_p8)
}
 0x28c   :  { %s3502_s24 = scalar_lea.hbm %s3757_s5, 256 }
 0x28d   :  { %p3503_p9 = scmp.ne.s32.totalorder %s3757_s5, %s3502_s24  ;;  %p3506_p10 = scmp.lt.u32.totalorder %s3502_s24, %s3757_s5 }
 0x28f   :  { %p3508_p11 = pnand %p3506_p10, %p3503_p9 }
 0x291   :  { %3511 = shalt.err (!%p3508_p11)
}
 0x292   :  { %2822 = dma.vmem_to_hbm [thread:$0]  %s2817_s20, 256, %s3757_s5, [#allocation4], %s3524_s1, %s3524_s1, %s3525_s17  }
 0x293   :  { %3518 = dma.done.wait [#allocation4], 256  }
 0x294   :  { %3519 = vsyncadd [#allocation4], 4294967040 }
 0x295   :  { %2826 = vsyncpa [#allocation3], 1 }
 0x296   :  { %2827 = vsyncpa [#allocation6], 1 }
 0x297   :  { %2828 = vsyncpa [#allocation9], 1 }
 0x298   :  { %2829 = vsyncpa [#allocation4], 1 }

// kernel: position_feed_forward.1
= control target key start
LH: loop header
LB: loop body
LE: loop exit
PB: predicated region body
PF: predicated region fallthrough
CT: control target
= control target key end

     0   :  { %10 = vsyncpa [#allocation3], 0  ;;  %s3752_s0 = inlined_call_operand.hbm [shape: f32[16,128], index: 0, kind: input, shape index: {}]   ;;  %s3753_s1 = inlined_call_operand.hbm [shape: bf16[128,2048], index: 1, kind: input, shape index: {}]   ;;  %s3754_s2 = inlined_call_operand.hbm [shape: f32[1,2048], index: 2, kind: input, shape index: {}]   ;;  %s3755_s3 = inlined_call_operand.hbm [shape: bf16[2048,128], index: 3, kind: input, shape index: {}]   ;;  %s3756_s4 = inlined_call_operand.vmem [shape: f32[1,128], index: 4, kind: input, shape index: {}]   ;;  %s3757_s5 = inlined_call_operand.hbm [shape: f32[16,128], index: 5, kind: output, shape index: {}]  }
   0x1   :  { %11 = vsyncpa [#allocation6], 0 }
   0x2   :  { %12 = vsyncpa [#allocation9], 0 }
   0x3   :  { %13 = vsyncpa [#allocation4], 0  ;;  %s3520_s18 = smov [#allocation5]   ;;  %s3402_s22 = scalar_lea.hbm %s3753_s1, 16384 }
   0x4   :  { %s31_s19 = sshll.u32 %s3520_s18, 4  ;;  %p3403_p0 = scmp.ne.s32.totalorder %s3753_s1, %s3402_s22  ;;  %s32_s19 = int_to_ptr.vmem [resolvable:$true] %s31_s19 }
   0x5   :  { %p3406_p1 = scmp.lt.u32.totalorder %s3402_s22, %s3753_s1 }
   0x7   :  { %p3408_p2 = pnand %p3406_p1, %p3403_p0 }
   0x9   :  { %3411 = shalt.err (!%p3408_p2)
}
   0xa   :  { %s3412_s27 = scalar_lea.vmem %s32_s19, 16384  ;;  %p3417_p4 = scmp.lt.s32.totalorder %s32_s19, %s32_s19 }
   0xb   :  { %p3413_p3 = scmp.ne.s32.totalorder %s32_s19, %s3412_s27  ;;  %p3418_p5 = scmp.lt.s32.totalorder %s3412_s27, %s3412_s27 }
   0xd   :  { %p3419_p6 = por %p3418_p5, %p3417_p4 }
   0xf   :  { %p3420_p7 = pnand %p3419_p6, %p3413_p3 }
  0x11   :  { %3423 = shalt.err (!%p3420_p7)
}
  0x12   :  { %s3521_s28 = smov 1024   ;;  %s3522_s29 = smov 64  }
  0x13   :  { %37 = dma.hbm_to_vmem [thread:$0]  %s3753_s1, 16384, %s32_s19, [#allocation6], %s3521_s28, %s3521_s28, %s3522_s29  }
  0x14   :  { %s3523_s7 = smov [#allocation2]   ;;  %s3424_s11 = scalar_lea.hbm %s3752_s0, 256 }
  0x15   :  { %s19_s8 = sshll.u32 %s3523_s7, 4  ;;  %p3425_p8 = scmp.ne.s32.totalorder %s3752_s0, %s3424_s11  ;;  %s20_s8 = int_to_ptr.vmem [resolvable:$true] %s19_s8 }
  0x16   :  { %p3428_p9 = scmp.lt.u32.totalorder %s3424_s11, %s3752_s0 }
  0x18   :  { %p3430_p10 = pnand %p3428_p9, %p3425_p8 }
  0x1a   :  { %3433 = shalt.err (!%p3430_p10)
}
  0x1b   :  { %s3434_s16 = scalar_lea.vmem %s20_s8, 256  ;;  %p3439_p12 = scmp.lt.s32.totalorder %s20_s8, %s20_s8 }
  0x1c   :  { %p3435_p11 = scmp.ne.s32.totalorder %s20_s8, %s3434_s16  ;;  %p3440_p13 = scmp.lt.s32.totalorder %s3434_s16, %s3434_s16 }
  0x1e   :  { %p3441_p0 = por %p3440_p13, %p3439_p12 }
  0x20   :  { %p3442_p1 = pnand %p3441_p0, %p3435_p11 }
  0x22   :  { %3445 = shalt.err (!%p3442_p1)
}
  0x23   :  { %s3524_s1 = smov 128   ;;  %s3525_s17 = smov 8  }
  0x24   :  { %25 = dma.hbm_to_vmem [thread:$0]  %s3752_s0, 256, %s20_s8, [#allocation3], %s3524_s1, %s3524_s1, %s3525_s17  }
  0x25   :  { %s3526_s20 = smov [#allocation7]   ;;  %s3527_s22 = smov [#allocation8]  }
  0x26   :  { %s44_s21 = sshll.u32 %s3526_s20, 4  ;;  %s53_s23 = sshll.u32 %s3527_s22, 4  ;;  %s45_s21 = int_to_ptr.vmem [resolvable:$true] %s44_s21  ;;  %s3589_s23 = int_to_ptr.vmem [resolvable:$true] %s53_s23 }
  0x27   :  { %s3446_s26 = scalar_lea.hbm %s3754_s2, 256 }
  0x28   :  { %p3447_p2 = scmp.ne.s32.totalorder %s3754_s2, %s3446_s26  ;;  %p3450_p3 = scmp.lt.u32.totalorder %s3446_s26, %s3754_s2 }
  0x2a   :  { %p3452_p4 = pnand %p3450_p3, %p3447_p2 }
  0x2c   :  { %3455 = shalt.err (!%p3452_p4)
}
  0x2d   :  { %s3456_s0 = scalar_lea.vmem %s45_s21, 256  ;;  %p3461_p6 = scmp.lt.s32.totalorder %s45_s21, %s45_s21 }
  0x2e   :  { %p3457_p5 = scmp.ne.s32.totalorder %s45_s21, %s3456_s0  ;;  %p3462_p7 = scmp.lt.s32.totalorder %s3456_s0, %s3456_s0 }
  0x30   :  { %p3463_p8 = por %p3462_p7, %p3461_p6 }
  0x32   :  { %p3464_p9 = pnand %p3463_p8, %p3457_p5 }
  0x34   :  { %3467 = shalt.err (!%p3464_p9)
}
  0x35   :  { %47 = dma.hbm_to_vmem [thread:$0]  %s3754_s2, 256, %s45_s21, [#allocation6]  }
  0x36   :  { %s3468_s11 = scalar_lea.hbm %s3755_s3, 16384 }
  0x37   :  { %p3469_p10 = scmp.ne.s32.totalorder %s3755_s3, %s3468_s11  ;;  %p3472_p11 = scmp.lt.u32.totalorder %s3468_s11, %s3755_s3 }
  0x39   :  { %p3474_p12 = pnand %p3472_p11, %p3469_p10 }
  0x3b   :  { %3477 = shalt.err (!%p3474_p12)
}
  0x3c   :  { %s3478_s16 = scalar_lea.vmem %s3589_s23, 16384  ;;  %p3483_p0 = scmp.lt.s32.totalorder %s3589_s23, %s3589_s23 }
  0x3d   :  { %p3479_p13 = scmp.ne.s32.totalorder %s3589_s23, %s3478_s16  ;;  %p3484_p1 = scmp.lt.s32.totalorder %s3478_s16, %s3478_s16 }
  0x3f   :  { %p3485_p2 = por %p3484_p1, %p3483_p0 }
  0x41   :  { %p3486_p3 = pnand %p3485_p2, %p3479_p13 }
  0x43   :  { %3489 = shalt.err (!%p3486_p3)
}
  0x44   :  { %s3528_s2 = smov 4  }
  0x45   :  { %59 = dma.hbm_to_vmem [thread:$0]  %s3755_s3, 16384, %s3589_s23, [#allocation9], %s3522_s29, %s3522_s29, %s3528_s2  }
  0x46   :  { %3512 = dma.done.wait [#allocation3], 256  }
  0x47   :  { %3513 = vsyncadd [#allocation3], 4294967040 }
  0x48   :  { %3514 = dma.done.wait [#allocation6], 16640  }
  0x49   :  { %3515 = vsyncadd [#allocation6], 4294950656 }
  0x4a   :  { %3516 = dma.done.wait [#allocation9], 16384  }
  0x4b   :  { %3517 = vsyncadd [#allocation9], 4294950912  ;;  %v3529_v0 = vmov 0   ;;  %v78_v1 = vld [vmem:[#allocation5] sm:$0xff]  ;;  %v79_v3 = vld [vmem:[#allocation5 + $0x8] sm:$0xff] }
  0x4c   :  { %878 = vmatprep.mubr.bf16.mxu0 %v3529_v0  ;;  %921 = vmatprep.mubr.bf16.mxu1 %v3529_v0  ;;  %v86_v2 = vld [vmem:[#allocation5 + $0x40] sm:$0xff]  ;;  %v87_v5 = vld [vmem:[#allocation5 + $0x48] sm:$0xff]  ;;  %v80_v63 = vld [vmem:[#allocation5 + $0x10] sm:$0xff] }
  0x4d   :  { %v2831_v4 = vcombine.high %v78_v1, %v86_v2  ;;  %v2830_v6 = vcombine.low %v78_v1, %v86_v2  ;;  %v94_v7 = vld [vmem:[#allocation5 + $0x80] sm:$0xff]  ;;  %v2833_v9 = vcombine.high %v79_v3, %v87_v5  ;;  %v2832_v10 = vcombine.low %v79_v3, %v87_v5  ;;  %v95_v12 = vld [vmem:[#allocation5 + $0x88] sm:$0xff]  ;;  %v88_v1 = vld [vmem:[#allocation5 + $0x50] sm:$0xff] }
  0x4e   :  { %v102_v8 = vld [vmem:[#allocation5 + $0xc0] sm:$0xff]  ;;  %v103_v13 = vld [vmem:[#allocation5 + $0xc8] sm:$0xff]  ;;  %v81_v2 = vld [vmem:[#allocation5 + $0x18] sm:$0xff] }
  0x4f   :  { %v2847_v11 = vcombine.high %v94_v7, %v102_v8  ;;  %v110_v14 = vld [vmem:[#allocation5 + $0x100] sm:$0xff]  ;;  %846 = vmatprep.subr.bf16.mxu0 %v2831_v4  ;;  %v2849_v15 = vcombine.high %v95_v12, %v103_v13  ;;  %v111_v17 = vld [vmem:[#allocation5 + $0x108] sm:$0xff]  ;;  %889 = vmatprep.subr.bf16.mxu1 %v2833_v9  ;;  %v2846_v19 = vcombine.low %v94_v7, %v102_v8  ;;  %v89_v3 = vld [vmem:[#allocation5 + $0x58] sm:$0xff] }
  0x50   :  { %v118_v16 = vld [vmem:[#allocation5 + $0x140] sm:$0xff]  ;;  %v119_v18 = vld [vmem:[#allocation5 + $0x148] sm:$0xff]  ;;  %847 = vmatpush1.bf16.msra.mxu0 %v2830_v6  ;;  %890 = vmatpush1.bf16.msra.mxu1 %v2832_v10  ;;  %v2848_v20 = vcombine.low %v95_v12, %v103_v13  ;;  %v75_v5 = vld [vmem:[#allocation2] sm:$0xff]  ;;  %v2835_v8 = vcombine.high %v80_v63, %v88_v1  ;;  %v2837_v9 = vcombine.high %v81_v2, %v89_v3 }
  0x51   :  { %848 = vmatprep.subr.bf16.mxu0 %v2847_v11  ;;  %v2863_v21 = vcombine.high %v110_v14, %v118_v16  ;;  %891 = vmatprep.subr.bf16.mxu1 %v2849_v15  ;;  %v2865_v22 = vcombine.high %v111_v17, %v119_v18  ;;  %v126_v23 = vld [vmem:[#allocation5 + $0x180] sm:$0xff]  ;;  %v127_v25 = vld [vmem:[#allocation5 + $0x188] sm:$0xff]  ;;  %v2862_v27 = vcombine.low %v110_v14, %v118_v16  ;;  %v76_v6 = vld [vmem:[#allocation2 + $0x8] sm:$0xff] }
  0x52   :  { %v134_v24 = vld [vmem:[#allocation5 + $0x1c0] sm:$0xff]  ;;  %v135_v26 = vld [vmem:[#allocation5 + $0x1c8] sm:$0xff]  ;;  %v2864_v28 = vcombine.low %v111_v17, %v119_v18  ;;  %v96_v10 = vld [vmem:[#allocation5 + $0x90] sm:$0xff]  ;;  %v3624_v12 = vpack.c.bf16 %v76_v6, %v75_v5  ;;  %v2834_v15 = vcombine.low %v80_v63, %v88_v1  ;;  %v2836_v16 = vcombine.low %v81_v2, %v89_v3 }
  0x53   :  { %v2879_v29 = vcombine.high %v126_v23, %v134_v24  ;;  %v2881_v30 = vcombine.high %v127_v25, %v135_v26  ;;  %v142_v31 = vld [vmem:[#allocation5 + $0x200] sm:$0xff]  ;;  %v143_v33 = vld [vmem:[#allocation5 + $0x208] sm:$0xff]  ;;  %v2878_v35 = vcombine.low %v126_v23, %v134_v24  ;;  %v2880_v36 = vcombine.low %v127_v25, %v135_v26  ;;  %v104_v11 = vld [vmem:[#allocation5 + $0xd0] sm:$0xff] }
  0x54   :  { %849 = vmatpush1.bf16.msra.mxu0 %v2846_v19  ;;  %892 = vmatpush1.bf16.msra.mxu1 %v2848_v20  ;;  %v150_v32 = vld [vmem:[#allocation5 + $0x240] sm:$0xff]  ;;  %v151_v34 = vld [vmem:[#allocation5 + $0x248] sm:$0xff]  ;;  %v97_v13 = vld [vmem:[#allocation5 + $0x98] sm:$0xff]  ;;  %v2851_v17 = vcombine.high %v96_v10, %v104_v11  ;;  %v2850_v23 = vcombine.low %v96_v10, %v104_v11 }
  0x55   :  { %850 = vmatprep.subr.bf16.mxu0 %v2863_v21  ;;  %893 = vmatprep.subr.bf16.mxu1 %v2865_v22  ;;  %v2895_v37 = vcombine.high %v142_v31, %v150_v32  ;;  %v2897_v38 = vcombine.high %v143_v33, %v151_v34  ;;  %v158_v39 = vld [vmem:[#allocation5 + $0x280] sm:$0xff]  ;;  %v159_v41 = vld [vmem:[#allocation5 + $0x288] sm:$0xff]  ;;  %v2894_v43 = vcombine.low %v142_v31, %v150_v32  ;;  %v105_v14 = vld [vmem:[#allocation5 + $0xd8] sm:$0xff] }
  0x56   :  { %v166_v40 = vld [vmem:[#allocation5 + $0x2c0] sm:$0xff]  ;;  %v167_v42 = vld [vmem:[#allocation5 + $0x2c8] sm:$0xff]  ;;  %v2896_v44 = vcombine.low %v143_v33, %v151_v34  ;;  %v2853_v18 = vcombine.high %v97_v13, %v105_v14  ;;  %v112_v19 = vld [vmem:[#allocation5 + $0x110] sm:$0xff]  ;;  %v2852_v24 = vcombine.low %v97_v13, %v105_v14 }
  0x57   :  { %v2911_v45 = vcombine.high %v158_v39, %v166_v40  ;;  %v2913_v46 = vcombine.high %v159_v41, %v167_v42  ;;  %v174_v47 = vld [vmem:[#allocation5 + $0x300] sm:$0xff]  ;;  %v175_v49 = vld [vmem:[#allocation5 + $0x308] sm:$0xff]  ;;  %v2910_v51 = vcombine.low %v158_v39, %v166_v40  ;;  %v2912_v52 = vcombine.low %v159_v41, %v167_v42  ;;  %v120_v20 = vld [vmem:[#allocation5 + $0x150] sm:$0xff] }
  0x58   :  { %851 = vmatpush1.bf16.msra.mxu0 %v2862_v27  ;;  %894 = vmatpush1.bf16.msra.mxu1 %v2864_v28  ;;  %v182_v48 = vld [vmem:[#allocation5 + $0x340] sm:$0xff]  ;;  %v183_v50 = vld [vmem:[#allocation5 + $0x348] sm:$0xff]  ;;  %v113_v21 = vld [vmem:[#allocation5 + $0x118] sm:$0xff]  ;;  %v2867_v25 = vcombine.high %v112_v19, %v120_v20  ;;  %v2866_v31 = vcombine.low %v112_v19, %v120_v20 }
  0x59   :  { %852 = vmatprep.subr.bf16.mxu0 %v2879_v29  ;;  %895 = vmatprep.subr.bf16.mxu1 %v2881_v30  ;;  %v2927_v53 = vcombine.high %v174_v47, %v182_v48  ;;  %v2929_v54 = vcombine.high %v175_v49, %v183_v50  ;;  %v190_v55 = vld [vmem:[#allocation5 + $0x380] sm:$0xff]  ;;  %v191_v57 = vld [vmem:[#allocation5 + $0x388] sm:$0xff]  ;;  %v2926_v59 = vcombine.low %v174_v47, %v182_v48  ;;  %v121_v22 = vld [vmem:[#allocation5 + $0x158] sm:$0xff] }
  0x5a   :  { %v198_v56 = vld [vmem:[#allocation5 + $0x3c0] sm:$0xff]  ;;  %v199_v58 = vld [vmem:[#allocation5 + $0x3c8] sm:$0xff]  ;;  %v2928_v60 = vcombine.low %v175_v49, %v183_v50  ;;  %v2869_v26 = vcombine.high %v113_v21, %v121_v22  ;;  %v128_v27 = vld [vmem:[#allocation5 + $0x190] sm:$0xff]  ;;  %v2868_v32 = vcombine.low %v113_v21, %v121_v22 }
  0x5b   :  { %v2943_v61 = vcombine.high %v190_v55, %v198_v56  ;;  %v2945_v62 = vcombine.high %v191_v57, %v199_v58  ;;  %v2942_v4 = vcombine.low %v190_v55, %v198_v56  ;;  %v2944_v7 = vcombine.low %v191_v57, %v199_v58  ;;  %v136_v28 = vld [vmem:[#allocation5 + $0x1d0] sm:$0xff]  ;;  %v129_v29 = vld [vmem:[#allocation5 + $0x198] sm:$0xff]  ;;  %v82_v1 = vld [vmem:[#allocation5 + $0x20] sm:$0xff] }
  0x5c   :  { %853 = vmatpush1.bf16.msra.mxu0 %v2878_v35  ;;  %896 = vmatpush1.bf16.msra.mxu1 %v2880_v36  ;;  %v137_v30 = vld [vmem:[#allocation5 + $0x1d8] sm:$0xff]  ;;  %v2883_v33 = vcombine.high %v128_v27, %v136_v28  ;;  %v144_v35 = vld [vmem:[#allocation5 + $0x210] sm:$0xff]  ;;  %v2882_v39 = vcombine.low %v128_v27, %v136_v28  ;;  %v83_v6 = vld [vmem:[#allocation5 + $0x28] sm:$0xff] }
  0x5d   :  { %854 = vmatprep.subr.bf16.mxu0 %v2895_v37  ;;  %897 = vmatprep.subr.bf16.mxu1 %v2897_v38  ;;  %v2885_v34 = vcombine.high %v129_v29, %v137_v30  ;;  %v152_v36 = vld [vmem:[#allocation5 + $0x250] sm:$0xff]  ;;  %v145_v37 = vld [vmem:[#allocation5 + $0x218] sm:$0xff]  ;;  %v2884_v41 = vcombine.low %v129_v29, %v137_v30  ;;  %v106_v13 = vld [vmem:[#allocation5 + $0xe0] sm:$0xff] }
  0x5e   :  { %v153_v38 = vld [vmem:[#allocation5 + $0x258] sm:$0xff]  ;;  %v160_v40 = vld [vmem:[#allocation5 + $0x290] sm:$0xff]  ;;  %v2899_v42 = vcombine.high %v144_v35, %v152_v36  ;;  %v2898_v47 = vcombine.low %v144_v35, %v152_v36  ;;  %v122_v19 = vld [vmem:[#allocation5 + $0x160] sm:$0xff] }
  0x5f   :  { %v176_v48 = vld [vmem:[#allocation5 + $0x310] sm:$0xff]  ;;  %v2900_v49 = vcombine.low %v145_v37, %v153_v38  ;;  %v115_v22 = vld [vmem:[#allocation5 + $0x128] sm:$0xff]  ;;  %v138_v27 = vld [vmem:[#allocation5 + $0x1e0] sm:$0xff] }
  0x60   :  { %855 = vmatpush1.bf16.msra.mxu0 %v2894_v43  ;;  %898 = vmatpush1.bf16.msra.mxu1 %v2896_v44  ;;  %v168_v43 = vld [vmem:[#allocation5 + $0x2d0] sm:$0xff]  ;;  %v2901_v44 = vcombine.high %v145_v37, %v153_v38  ;;  %v131_v30 = vld [vmem:[#allocation5 + $0x1a8] sm:$0xff]  ;;  %v154_v35 = vld [vmem:[#allocation5 + $0x260] sm:$0xff] }
  0x61   :  { %856 = vmatprep.subr.bf16.mxu0 %v2911_v45  ;;  %899 = vmatprep.subr.bf16.mxu1 %v2913_v46  ;;  %v161_v45 = vld [vmem:[#allocation5 + $0x298] sm:$0xff]  ;;  %v2915_v50 = vcombine.high %v160_v40, %v168_v43  ;;  %v2914_v55 = vcombine.low %v160_v40, %v168_v43  ;;  %v192_v56 = vld [vmem:[#allocation5 + $0x390] sm:$0xff]  ;;  %v147_v38 = vld [vmem:[#allocation5 + $0x228] sm:$0xff] }
  0x62   :  { %v169_v46 = vld [vmem:[#allocation5 + $0x2d8] sm:$0xff]  ;;  %v170_v43 = vld [vmem:[#allocation5 + $0x2e0] sm:$0xff] }
  0x63   :  { %v2916_v57 = vcombine.low %v161_v45, %v169_v46 }
  0x64   :  { %857 = vmatpush1.bf16.msra.mxu0 %v2910_v51  ;;  %900 = vmatpush1.bf16.msra.mxu1 %v2912_v52  ;;  %v184_v51 = vld [vmem:[#allocation5 + $0x350] sm:$0xff]  ;;  %v2917_v52 = vcombine.high %v161_v45, %v169_v46  ;;  %v163_v46 = vld [vmem:[#allocation5 + $0x2a8] sm:$0xff] }
  0x65   :  { %858 = vmatprep.subr.bf16.mxu0 %v2927_v53  ;;  %901 = vmatprep.subr.bf16.mxu1 %v2929_v54  ;;  %v177_v53 = vld [vmem:[#allocation5 + $0x318] sm:$0xff]  ;;  %v2931_v58 = vcombine.high %v176_v48, %v184_v51  ;;  %v2930_v63 = vcombine.low %v176_v48, %v184_v51  ;;  %v186_v51 = vld [vmem:[#allocation5 + $0x360] sm:$0xff] }
  0x66   :  { %v185_v54 = vld [vmem:[#allocation5 + $0x358] sm:$0xff] }
  0x67   :  { %v2932_v2 = vcombine.low %v177_v53, %v185_v54 }
  0x68   :  { %859 = vmatpush1.bf16.msra.mxu0 %v2926_v59  ;;  %902 = vmatpush1.bf16.msra.mxu1 %v2928_v60  ;;  %v200_v59 = vld [vmem:[#allocation5 + $0x3d0] sm:$0xff]  ;;  %v2933_v60 = vcombine.high %v177_v53, %v185_v54  ;;  %v179_v54 = vld [vmem:[#allocation5 + $0x328] sm:$0xff] }
  0x69   :  { %860 = vmatprep.subr.bf16.mxu0 %v2943_v61  ;;  %903 = vmatprep.subr.bf16.mxu1 %v2945_v62  ;;  %v193_v61 = vld [vmem:[#allocation5 + $0x398] sm:$0xff]  ;;  %v2947_v3 = vcombine.high %v192_v56, %v200_v59 }
  0x6a   :  { %v201_v62 = vld [vmem:[#allocation5 + $0x3d8] sm:$0xff] }
  0x6b   :  { %v2949_v5 = vcombine.high %v193_v61, %v201_v62  ;;  %v2948_v10 = vcombine.low %v193_v61, %v201_v62  ;;  %v195_v62 = vld [vmem:[#allocation5 + $0x3a8] sm:$0xff] }
  0x6c   :  { %861 = vmatpush1.bf16.msra.mxu0 %v2942_v4  ;;  %904 = vmatpush1.bf16.msra.mxu1 %v2944_v7  ;;  %v90_v4 = vld [vmem:[#allocation5 + $0x60] sm:$0xff]  ;;  %v91_v7 = vld [vmem:[#allocation5 + $0x68] sm:$0xff] }
  0x6d   :  { %932 = vmatprep.subr.bf16.mxu0 %v2835_v8  ;;  %975 = vmatprep.subr.bf16.mxu1 %v2837_v9  ;;  %v2946_v8 = vcombine.low %v192_v56, %v200_v59  ;;  %v98_v9 = vld [vmem:[#allocation5 + $0xa0] sm:$0xff]  ;;  %v2839_v11 = vcombine.high %v82_v1, %v90_v4  ;;  %v2841_v14 = vcombine.high %v83_v6, %v91_v7 }
  0x6e   :  { %v2840_v20 = vcombine.low %v83_v6, %v91_v7  ;;  %v2855_v21 = vcombine.high %v98_v9, %v106_v13  ;;  %v202_v59 = vld [vmem:[#allocation5 + $0x3e0] sm:$0xff]  ;;  %v85_v7 = vld [vmem:[#allocation5 + $0x38] sm:$0xff] }
  0x6f   :  { %879 = vmatmul.mubr.bf16.vlgmr.msra.gmra.mrb[0].mxu0 %v3624_v12  ;;  %922 = vmatmul.mubr.bf16.vlgmr.msra.gmra.mrb[0].mxu1 %v3624_v12 }
  0x70   :  { %933 = vmatpush1.bf16.msra.mxu0 %v2834_v15  ;;  %976 = vmatpush1.bf16.msra.mxu1 %v2836_v16  ;;  %v99_v15 = vld [vmem:[#allocation5 + $0xa8] sm:$0xff] }
  0x71   :  { %934 = vmatprep.subr.bf16.mxu0 %v2851_v17  ;;  %977 = vmatprep.subr.bf16.mxu1 %v2853_v18  ;;  %v107_v16 = vld [vmem:[#allocation5 + $0xe8] sm:$0xff]  ;;  %v2838_v17 = vcombine.low %v82_v1, %v90_v4  ;;  %v114_v18 = vld [vmem:[#allocation5 + $0x120] sm:$0xff]  ;;  %v92_v4 = vld [vmem:[#allocation5 + $0x70] sm:$0xff] }
  0x72   :  { %964 = vmatprep.mubr.bf16.mxu0 %v3529_v0  ;;  %1007 = vmatprep.mubr.bf16.mxu1 %v3529_v0  ;;  %v2856_v28 = vcombine.low %v99_v15, %v107_v16  ;;  %v2871_v29 = vcombine.high %v114_v18, %v122_v19 }
  0x74   :  { %935 = vmatpush1.bf16.msra.mxu0 %v2850_v23  ;;  %978 = vmatpush1.bf16.msra.mxu1 %v2852_v24  ;;  %v123_v23 = vld [vmem:[#allocation5 + $0x168] sm:$0xff]  ;;  %v2857_v24 = vcombine.high %v99_v15, %v107_v16  ;;  %v101_v16 = vld [vmem:[#allocation5 + $0xb8] sm:$0xff] }
  0x75   :  { %936 = vmatprep.subr.bf16.mxu0 %v2867_v25  ;;  %979 = vmatprep.subr.bf16.mxu1 %v2869_v26  ;;  %v2854_v25 = vcombine.low %v98_v9, %v106_v13  ;;  %v130_v26 = vld [vmem:[#allocation5 + $0x1a0] sm:$0xff]  ;;  %v2872_v36 = vcombine.low %v115_v22, %v123_v23  ;;  %v108_v13 = vld [vmem:[#allocation5 + $0xf0] sm:$0xff] }
  0x76   :  { %v2887_v37 = vcombine.high %v130_v26, %v138_v27 }
  0x78   :  { %937 = vmatpush1.bf16.msra.mxu0 %v2866_v31  ;;  %980 = vmatpush1.bf16.msra.mxu1 %v2868_v32  ;;  %v139_v31 = vld [vmem:[#allocation5 + $0x1e8] sm:$0xff]  ;;  %v2873_v32 = vcombine.high %v115_v22, %v123_v23 }
  0x79   :  { %938 = vmatprep.subr.bf16.mxu0 %v2883_v33  ;;  %981 = vmatprep.subr.bf16.mxu1 %v2885_v34  ;;  %v2870_v33 = vcombine.low %v114_v18, %v122_v19  ;;  %v146_v34 = vld [vmem:[#allocation5 + $0x220] sm:$0xff]  ;;  %v2889_v40 = vcombine.high %v131_v30, %v139_v31 }
  0x7a   :  { %v2903_v45 = vcombine.high %v146_v34, %v154_v35 }
  0x7c   :  { %939 = vmatpush1.bf16.msra.mxu0 %v2882_v39  ;;  %982 = vmatpush1.bf16.msra.mxu1 %v2884_v41  ;;  %v155_v39 = vld [vmem:[#allocation5 + $0x268] sm:$0xff]  ;;  %v2886_v41 = vcombine.low %v130_v26, %v138_v27 }
  0x7d   :  { %940 = vmatprep.subr.bf16.mxu0 %v2899_v42  ;;  %983 = vmatprep.subr.bf16.mxu1 %v2901_v44  ;;  %v162_v42 = vld [vmem:[#allocation5 + $0x2a0] sm:$0xff]  ;;  %v2888_v44 = vcombine.low %v131_v30, %v139_v31  ;;  %v2905_v48 = vcombine.high %v147_v38, %v155_v39 }
  0x7e   :  { %v2919_v53 = vcombine.high %v162_v42, %v170_v43 }
  0x80   :  { %941 = vmatpush1.bf16.msra.mxu0 %v2898_v47  ;;  %984 = vmatpush1.bf16.msra.mxu1 %v2900_v49  ;;  %v171_v47 = vld [vmem:[#allocation5 + $0x2e8] sm:$0xff]  ;;  %v2902_v49 = vcombine.low %v146_v34, %v154_v35 }
  0x81   :  { %942 = vmatprep.subr.bf16.mxu0 %v2915_v50  ;;  %985 = vmatprep.subr.bf16.mxu1 %v2917_v52  ;;  %v178_v50 = vld [vmem:[#allocation5 + $0x320] sm:$0xff]  ;;  %v2904_v52 = vcombine.low %v147_v38, %v155_v39  ;;  %v2921_v56 = vcombine.high %v163_v46, %v171_v47 }
  0x82   :  { %v2935_v61 = vcombine.high %v178_v50, %v186_v51 }
  0x84   :  { %943 = vmatpush1.bf16.msra.mxu0 %v2914_v55  ;;  %986 = vmatpush1.bf16.msra.mxu1 %v2916_v57  ;;  %v187_v55 = vld [vmem:[#allocation5 + $0x368] sm:$0xff]  ;;  %v2918_v57 = vcombine.low %v162_v42, %v170_v43 }
  0x85   :  { %944 = vmatprep.subr.bf16.mxu0 %v2931_v58  ;;  %987 = vmatprep.subr.bf16.mxu1 %v2933_v60  ;;  %v194_v58 = vld [vmem:[#allocation5 + $0x3a0] sm:$0xff]  ;;  %v2920_v60 = vcombine.low %v163_v46, %v171_v47  ;;  %v2937_v1 = vcombine.high %v179_v54, %v187_v55 }
  0x86   :  { %v2951_v6 = vcombine.high %v194_v58, %v202_v59 }
  0x88   :  { %945 = vmatpush1.bf16.msra.mxu0 %v2930_v63  ;;  %988 = vmatpush1.bf16.msra.mxu1 %v2932_v2  ;;  %v203_v63 = vld [vmem:[#allocation5 + $0x3e8] sm:$0xff]  ;;  %v2934_v2 = vcombine.low %v178_v50, %v186_v51 }
  0x89   :  { %946 = vmatprep.subr.bf16.mxu0 %v2947_v3  ;;  %989 = vmatprep.subr.bf16.mxu1 %v2949_v5  ;;  %v84_v3 = vld [vmem:[#allocation5 + $0x30] sm:$0xff]  ;;  %v2936_v5 = vcombine.low %v179_v54, %v187_v55  ;;  %v2953_v9 = vcombine.high %v195_v62, %v203_v63 }
  0x8a   :  { %v2843_v15 = vcombine.high %v84_v3, %v92_v4  ;;  %v2842_v19 = vcombine.low %v84_v3, %v92_v4 }
  0x8c   :  { %947 = vmatpush1.bf16.msra.mxu0 %v2946_v8  ;;  %990 = vmatpush1.bf16.msra.mxu1 %v2948_v10  ;;  %v93_v8 = vld [vmem:[#allocation5 + $0x78] sm:$0xff]  ;;  %v2950_v10 = vcombine.low %v194_v58, %v202_v59 }
  0x8d   :  { %1018 = vmatprep.subr.bf16.mxu0 %v2839_v11  ;;  %1061 = vmatprep.subr.bf16.mxu1 %v2841_v14  ;;  %v100_v11 = vld [vmem:[#allocation5 + $0xb0] sm:$0xff]  ;;  %v2952_v14 = vcombine.low %v195_v62, %v203_v63  ;;  %v2845_v18 = vcombine.high %v85_v7, %v93_v8  ;;  %v2844_v22 = vcombine.low %v85_v7, %v93_v8  ;;  %v189_v58 = vld [vmem:[#allocation5 + $0x378] sm:$0xff] }
  0x8e   :  { %v2859_v23 = vcombine.high %v100_v11, %v108_v13  ;;  %v2858_v27 = vcombine.low %v100_v11, %v108_v13  ;;  %v3275_v11 = vld [vmem:[#allocation8 + $0xc0] sm:$0xff]  }
  0x8f   :  { %965 = vmatmul.mubr.bf16.vlgmr.msra.gmra.mrb[4].mxu0 %v3624_v12  ;;  %1008 = vmatmul.mubr.bf16.vlgmr.msra.gmra.mrb[4].mxu1 %v3624_v12  ;;  %v3276_v13 = vld [vmem:[#allocation8] sm:$0xff]  }
  0x90   :  { %1019 = vmatpush1.bf16.msra.mxu0 %v2838_v17  ;;  %1062 = vmatpush1.bf16.msra.mxu1 %v2840_v20  ;;  %v109_v17 = vld [vmem:[#allocation5 + $0xf8] sm:$0xff]  ;;  %v116_v20 = vld [vmem:[#allocation5 + $0x130] sm:$0xff] }
  0x91   :  { %1020 = vmatprep.subr.bf16.mxu0 %v2855_v21  ;;  %1063 = vmatprep.subr.bf16.mxu1 %v2857_v24  ;;  %v124_v21 = vld [vmem:[#allocation5 + $0x170] sm:$0xff]  ;;  %v117_v24 = vld [vmem:[#allocation5 + $0x138] sm:$0xff]  ;;  %v2861_v26 = vcombine.high %v101_v16, %v109_v17  ;;  %v2860_v30 = vcombine.low %v101_v16, %v109_v17 }
  0x92   :  { %1050 = vmatprep.mubr.bf16.mxu0 %v3529_v0  ;;  %1093 = vmatprep.mubr.bf16.mxu1 %v3529_v0  ;;  %v2875_v31 = vcombine.high %v116_v20, %v124_v21  ;;  %v2874_v35 = vcombine.low %v116_v20, %v124_v21  ;;  %v3279_v16 = vld [vmem:[#allocation8 + $0xc8] sm:$0xff]   ;;  %v3283_v20 = vld [vmem:[#allocation8 + $0xd0] sm:$0xff]  }
  0x93   :  { %v3280_v17 = vld [vmem:[#allocation8 + $0x8] sm:$0xff]   ;;  %v3284_v21 = vld [vmem:[#allocation8 + $0x10] sm:$0xff]  }
  0x94   :  { %1021 = vmatpush1.bf16.msra.mxu0 %v2854_v25  ;;  %1064 = vmatpush1.bf16.msra.mxu1 %v2856_v28  ;;  %v125_v25 = vld [vmem:[#allocation5 + $0x178] sm:$0xff]  ;;  %v132_v28 = vld [vmem:[#allocation5 + $0x1b0] sm:$0xff] }
  0x95   :  { %1022 = vmatprep.subr.bf16.mxu0 %v2871_v29  ;;  %1065 = vmatprep.subr.bf16.mxu1 %v2873_v32  ;;  %v140_v29 = vld [vmem:[#allocation5 + $0x1f0] sm:$0xff]  ;;  %v133_v32 = vld [vmem:[#allocation5 + $0x1b8] sm:$0xff]  ;;  %v2877_v34 = vcombine.high %v117_v24, %v125_v25  ;;  %v2876_v38 = vcombine.low %v117_v24, %v125_v25  ;;  %v3287_v24 = vld [vmem:[#allocation8 + $0xd8] sm:$0xff]  }
  0x96   :  { %v2891_v39 = vcombine.high %v132_v28, %v140_v29  ;;  %v2890_v43 = vcombine.low %v132_v28, %v140_v29  ;;  %v3288_v25 = vld [vmem:[#allocation8 + $0x18] sm:$0xff]   ;;  %v3292_v28 = vld [vmem:[#allocation8 + $0x20] sm:$0xff]  }
  0x97   :  { %v3293_v29 = vld [vmem:[#allocation8 + $0xa0] sm:$0xff]  }
  0x98   :  { %1023 = vmatpush1.bf16.msra.mxu0 %v2870_v33  ;;  %1066 = vmatpush1.bf16.msra.mxu1 %v2872_v36  ;;  %v141_v33 = vld [vmem:[#allocation5 + $0x1f8] sm:$0xff]  ;;  %v148_v36 = vld [vmem:[#allocation5 + $0x230] sm:$0xff] }
  0x99   :  { %1024 = vmatprep.subr.bf16.mxu0 %v2887_v37  ;;  %1067 = vmatprep.subr.bf16.mxu1 %v2889_v40  ;;  %v156_v37 = vld [vmem:[#allocation5 + $0x270] sm:$0xff]  ;;  %v149_v40 = vld [vmem:[#allocation5 + $0x238] sm:$0xff]  ;;  %v2893_v42 = vcombine.high %v133_v32, %v141_v33  ;;  %v2892_v46 = vcombine.low %v133_v32, %v141_v33 }
  0x9a   :  { %v2907_v47 = vcombine.high %v148_v36, %v156_v37  ;;  %v2906_v51 = vcombine.low %v148_v36, %v156_v37  ;;  %v3296_v32 = vld [vmem:[#allocation8 + $0x28] sm:$0xff]   ;;  %v3300_v36 = vld [vmem:[#allocation8 + $0x30] sm:$0xff]  }
  0x9b   :  { %v3297_v33 = vld [vmem:[#allocation8 + $0xa8] sm:$0xff]   ;;  %v3301_v37 = vld [vmem:[#allocation8 + $0xb0] sm:$0xff]  }
  0x9c   :  { %1025 = vmatpush1.bf16.msra.mxu0 %v2886_v41  ;;  %1068 = vmatpush1.bf16.msra.mxu1 %v2888_v44  ;;  %v157_v41 = vld [vmem:[#allocation5 + $0x278] sm:$0xff]  ;;  %v164_v44 = vld [vmem:[#allocation5 + $0x2b0] sm:$0xff] }
  0x9d   :  { %1026 = vmatprep.subr.bf16.mxu0 %v2903_v45  ;;  %1069 = vmatprep.subr.bf16.mxu1 %v2905_v48  ;;  %v172_v45 = vld [vmem:[#allocation5 + $0x2f0] sm:$0xff]  ;;  %v165_v48 = vld [vmem:[#allocation5 + $0x2b8] sm:$0xff]  ;;  %v2909_v50 = vcombine.high %v149_v40, %v157_v41 }
  0x9e   :  { %v2923_v54 = vcombine.high %v164_v44, %v172_v45  ;;  %v2922_v59 = vcombine.low %v164_v44, %v172_v45  ;;  %v1210_v44 = vlaneseq }
  0xa0   :  { %1027 = vmatpush1.bf16.msra.mxu0 %v2902_v49  ;;  %1070 = vmatpush1.bf16.msra.mxu1 %v2904_v52  ;;  %v173_v49 = vld [vmem:[#allocation5 + $0x2f8] sm:$0xff]  ;;  %v180_v52 = vld [vmem:[#allocation5 + $0x330] sm:$0xff]  ;;  %v3640_v45 = vshrl.u32 %v1210_v44, 7 }
  0xa1   :  { %1028 = vmatprep.subr.bf16.mxu0 %v2919_v53  ;;  %1071 = vmatprep.subr.bf16.mxu1 %v2921_v56  ;;  %v2908_v53 = vcombine.low %v149_v40, %v157_v41  ;;  %v2925_v55 = vcombine.high %v165_v48, %v173_v49  ;;  %v188_v56 = vld [vmem:[#allocation5 + $0x370] sm:$0xff]  ;;  %v2924_v62 = vcombine.low %v165_v48, %v173_v49  ;;  %v3304_v40 = vld [vmem:[#allocation8 + $0x38] sm:$0xff]  }
  0xa2   :  { %v2939_v63 = vcombine.high %v180_v52, %v188_v56  ;;  %v2938_v4 = vcombine.low %v180_v52, %v188_v56  ;;  %v3305_v41 = vld [vmem:[#allocation8 + $0xb8] sm:$0xff]   ;;  %v1220_v48 = vsub.s32 2, %v3640_v45  ;;  %v1216_v49 = vsub.s32 1, %v3640_v45  ;;  %v3323_v44 = vld [vmem:[#allocation8 + $0x1e0] sm:$0xff]  }
  0xa4   :  { %1029 = vmatpush1.bf16.msra.mxu0 %v2918_v57  ;;  %1072 = vmatpush1.bf16.msra.mxu1 %v2920_v60  ;;  %v181_v57 = vld [vmem:[#allocation5 + $0x338] sm:$0xff]  ;;  %v196_v60 = vld [vmem:[#allocation5 + $0x3b0] sm:$0xff] }
  0xa5   :  { %1030 = vmatprep.subr.bf16.mxu0 %v2935_v61  ;;  %1073 = vmatprep.subr.bf16.mxu1 %v2937_v1  ;;  %v204_v61 = vld [vmem:[#allocation5 + $0x3f0] sm:$0xff]  ;;  %v197_v1 = vld [vmem:[#allocation5 + $0x3b8] sm:$0xff]  ;;  %v2941_v3 = vcombine.high %v181_v57, %v189_v58 }
  0xa6   :  { %v2954_v8 = vcombine.low %v196_v60, %v204_v61 }
  0xa8   :  { %1031 = vmatpush1.bf16.msra.mxu0 %v2934_v2  ;;  %1074 = vmatpush1.bf16.msra.mxu1 %v2936_v5  ;;  %v205_v2 = vld [vmem:[#allocation5 + $0x3f8] sm:$0xff]  ;;  %v2940_v5 = vcombine.low %v181_v57, %v189_v58 }
  0xa9   :  { %1032 = vmatprep.subr.bf16.mxu0 %v2951_v6  ;;  %1075 = vmatprep.subr.bf16.mxu1 %v2953_v9  ;;  %v2955_v6 = vcombine.high %v196_v60, %v204_v61  ;;  %v2957_v7 = vcombine.high %v197_v1, %v205_v2  ;;  %v2956_v9 = vcombine.low %v197_v1, %v205_v2 }
  0xac   :  { %1033 = vmatpush1.bf16.msra.mxu0 %v2950_v10  ;;  %1076 = vmatpush1.bf16.msra.mxu1 %v2952_v14  ;;  %v3274_v10 = vld [vmem:[#allocation8 + $0x40] sm:$0xff]  }
  0xad   :  { %1104 = vmatprep.subr.bf16.mxu0 %v2843_v15  ;;  %1147 = vmatprep.subr.bf16.mxu1 %v2845_v18  ;;  %v3277_v14 = vld [vmem:[#allocation8 + $0x80] sm:$0xff]   ;;  %v3278_v15 = vld [vmem:[#allocation8 + $0x48] sm:$0xff]  }
  0xae   :  { %v3281_v18 = vld [vmem:[#allocation8 + $0x88] sm:$0xff]  }
  0xaf   :  { %1051 = vmatmul.mubr.bf16.vlgmr.msra.gmra.mrb[8].mxu0 %v3624_v12  ;;  %1094 = vmatmul.mubr.bf16.vlgmr.msra.gmra.mrb[8].mxu1 %v3624_v12 }
  0xb0   :  { %1105 = vmatpush1.bf16.msra.mxu0 %v2842_v19  ;;  %1148 = vmatpush1.bf16.msra.mxu1 %v2844_v22  ;;  %v3282_v19 = vld [vmem:[#allocation8 + $0x50] sm:$0xff]  }
  0xb1   :  { %1106 = vmatprep.subr.bf16.mxu0 %v2859_v23  ;;  %1149 = vmatprep.subr.bf16.mxu1 %v2861_v26  ;;  %v3285_v22 = vld [vmem:[#allocation8 + $0x90] sm:$0xff]   ;;  %v3286_v23 = vld [vmem:[#allocation8 + $0x58] sm:$0xff]  }
  0xb2   :  { %1136 = vmatprep.mubr.bf16.mxu0 %v3529_v0  ;;  %1179 = vmatprep.mubr.bf16.mxu1 %v3529_v0  ;;  %v3289_v26 = vld [vmem:[#allocation8 + $0x98] sm:$0xff]  }
  0xb4   :  { %1107 = vmatpush1.bf16.msra.mxu0 %v2858_v27  ;;  %1150 = vmatpush1.bf16.msra.mxu1 %v2860_v30  ;;  %v3290_v27 = vld [vmem:[#allocation8 + $0x60] sm:$0xff]   ;;  %v3294_v30 = vld [vmem:[#allocation8 + $0x68] sm:$0xff]  }
  0xb5   :  { %1108 = vmatprep.subr.bf16.mxu0 %v2875_v31  ;;  %1151 = vmatprep.subr.bf16.mxu1 %v2877_v34  ;;  %v3295_v31 = vld [vmem:[#allocation8 + $0xe8] sm:$0xff]   ;;  %v3298_v34 = vld [vmem:[#allocation8 + $0x70] sm:$0xff]  }
  0xb8   :  { %1109 = vmatpush1.bf16.msra.mxu0 %v2874_v35  ;;  %1152 = vmatpush1.bf16.msra.mxu1 %v2876_v38  ;;  %v3299_v35 = vld [vmem:[#allocation8 + $0xf0] sm:$0xff]   ;;  %v3302_v38 = vld [vmem:[#allocation8 + $0x78] sm:$0xff]  }
  0xb9   :  { %1110 = vmatprep.subr.bf16.mxu0 %v2891_v39  ;;  %1153 = vmatprep.subr.bf16.mxu1 %v2893_v42  ;;  %v3303_v39 = vld [vmem:[#allocation8 + $0xf8] sm:$0xff]   ;;  %v3306_v42 = vld [vmem:[#allocation8 + $0x140] sm:$0xff]  }
  0xbc   :  { %1111 = vmatpush1.bf16.msra.mxu0 %v2890_v43  ;;  %1154 = vmatpush1.bf16.msra.mxu1 %v2892_v46  ;;  %v3307_v43 = vld [vmem:[#allocation8 + $0x1c0] sm:$0xff]   ;;  %v3643_v46 = vsub.s32 0, %v3640_v45 }
  0xbd   :  { %1112 = vmatprep.subr.bf16.mxu0 %v2907_v47  ;;  %1155 = vmatprep.subr.bf16.mxu1 %v2909_v50  ;;  %v3645_v47 = vld [vmem:[#allocation7] sm:$0xff]  ;;  %v1224_v50 = vsub.s32 3, %v3640_v45 }
  0xbe   :  { %v1221_v52 = vrot.slane %v3645_v47, %v1220_v48 }
  0xc0   :  { %1113 = vmatpush1.bf16.msra.mxu0 %v2906_v51  ;;  %1156 = vmatpush1.bf16.msra.mxu1 %v2908_v53  ;;  %v1213_v51 = vrot.slane %v3645_v47, %v3643_v46  ;;  %v1217_v53 = vrot.slane %v3645_v47, %v1216_v49  ;;  %v1292_v56 = vpack.c.bf16 %v1221_v52, %v1221_v52 }
  0xc1   :  { %1114 = vmatprep.subr.bf16.mxu0 %v2923_v54  ;;  %1157 = vmatprep.subr.bf16.mxu1 %v2925_v55  ;;  %v1225_v54 = vrot.slane %v3645_v47, %v1224_v50 }
  0xc2   :  { %v1290_v55 = vpack.c.bf16 %v1213_v51, %v1213_v51  ;;  %v1291_v57 = vpack.c.bf16 %v1217_v53, %v1217_v53  ;;  %v1321_v60 = vpack.i.b16 %v1292_v56, %v1292_v56  ;;  %v3326_v56 = vld [vmem:[#allocation8 + $0x168] sm:$0xff]  }
  0xc3   :  { %v1293_v58 = vpack.c.bf16 %v1225_v54, %v1225_v54  ;;  %v3324_v54 = vld [vmem:[#allocation8 + $0x120] sm:$0xff]  }
  0xc4   :  { %1115 = vmatpush1.bf16.msra.mxu0 %v2922_v59  ;;  %1158 = vmatpush1.bf16.msra.mxu1 %v2924_v62  ;;  %v1307_v59 = vpack.i.b16 %v1290_v55, %v1290_v55  ;;  %v1314_v61 = vpack.i.b16 %v1291_v57, %v1291_v57  ;;  %v3325_v55 = vld [vmem:[#allocation8 + $0x1a0] sm:$0xff]  }
  0xc5   :  { %1116 = vmatprep.subr.bf16.mxu0 %v2939_v63  ;;  %1159 = vmatprep.subr.bf16.mxu1 %v2941_v3  ;;  %v1328_v62 = vpack.i.b16 %v1293_v58, %v1293_v58  ;;  %v3327_v58 = vld [vmem:[#allocation8 + $0x1e8] sm:$0xff]  }
  0xc6   :  { %v1312_v3 = vrot.slane %v1307_v59, %v3643_v46 }
  0xc8   :  { %1117 = vmatpush1.bf16.msra.mxu0 %v2938_v4  ;;  %1160 = vmatpush1.bf16.msra.mxu1 %v2940_v5 }
  0xc9   :  { %1118 = vmatprep.subr.bf16.mxu0 %v2955_v6  ;;  %1161 = vmatprep.subr.bf16.mxu1 %v2957_v7  ;;  %v1326_v6 = vrot.slane %v1321_v60, %v3643_v46  ;;  %v1319_v7 = vrot.slane %v1314_v61, %v3643_v46 }
  0xcc   :  { %1119 = vmatpush1.bf16.msra.mxu0 %v2954_v8  ;;  %1162 = vmatpush1.bf16.msra.mxu1 %v2956_v9 }
  0xcd   :  { %3087 = vmatprep.subr.bf16.mxu0 %v3274_v10  ;;  %3109 = vmatprep.subr.bf16.mxu1 %v3275_v11  ;;  %v1333_v11 = vrot.slane %v1328_v62, %v3643_v46  ;;  %v3328_v62 = vld [vmem:[#allocation8 + $0x128] sm:$0xff]  }
  0xcf   :  { %1137 = vmatmul.mubr.bf16.vlgmr.msra.gmra.mrb[12].mxu0 %v3624_v12  ;;  %1180 = vmatmul.mubr.bf16.vlgmr.msra.gmra.mrb[12].mxu1 %v3624_v12  ;;  %v3291_v12 = vld [vmem:[#allocation8 + $0xe0] sm:$0xff]  }
  0xd0   :  { %3088 = vmatpush3.bf16.msra.mxu0 %v3276_v13  ;;  %3110 = vmatpush3.bf16.msra.mxu1 %v3277_v14 }
  0xd1   :  { %3089 = vmatprep.subr.bf16.mxu0 %v3278_v15  ;;  %3111 = vmatprep.subr.bf16.mxu1 %v3279_v16 }
  0xd4   :  { %3090 = vmatpush3.bf16.msra.mxu0 %v3280_v17  ;;  %3112 = vmatpush3.bf16.msra.mxu1 %v3281_v18 }
  0xd5   :  { %3091 = vmatprep.subr.bf16.mxu0 %v3282_v19  ;;  %3113 = vmatprep.subr.bf16.mxu1 %v3283_v20 }
  0xd8   :  { %3092 = vmatpush3.bf16.msra.mxu0 %v3284_v21  ;;  %3114 = vmatpush3.bf16.msra.mxu1 %v3285_v22 }
  0xd9   :  { %3093 = vmatprep.subr.bf16.mxu0 %v3286_v23  ;;  %3115 = vmatprep.subr.bf16.mxu1 %v3287_v24  ;;  %v3308_v23 = vld [vmem:[#allocation8 + $0x100] sm:$0xff]  }
  0xdc   :  { %3094 = vmatpush3.bf16.msra.mxu0 %v3288_v25  ;;  %3116 = vmatpush3.bf16.msra.mxu1 %v3289_v26  ;;  %v3309_v26 = vld [vmem:[#allocation8 + $0x180] sm:$0xff]  }
  0xdd   :  { %3095 = vmatprep.subr.bf16.mxu0 %v3290_v27  ;;  %3117 = vmatprep.subr.bf16.mxu1 %v3291_v12  ;;  %v3310_v27 = vld [vmem:[#allocation8 + $0x148] sm:$0xff]  }
  0xde   :  { %v3311_v12 = vld [vmem:[#allocation8 + $0x1c8] sm:$0xff]  }
  0xe0   :  { %3096 = vmatpush3.bf16.msra.mxu0 %v3292_v28  ;;  %3118 = vmatpush3.bf16.msra.mxu1 %v3293_v29  ;;  %v3312_v28 = vld [vmem:[#allocation8 + $0x108] sm:$0xff]  }
  0xe1   :  { %3097 = vmatprep.subr.bf16.mxu0 %v3294_v30  ;;  %3119 = vmatprep.subr.bf16.mxu1 %v3295_v31  ;;  %v3313_v29 = vld [vmem:[#allocation8 + $0x188] sm:$0xff]   ;;  %v3314_v30 = vld [vmem:[#allocation8 + $0x150] sm:$0xff]  }
  0xe2   :  { %v3315_v31 = vld [vmem:[#allocation8 + $0x1d0] sm:$0xff]  }
  0xe4   :  { %3098 = vmatpush3.bf16.msra.mxu0 %v3296_v32  ;;  %3120 = vmatpush3.bf16.msra.mxu1 %v3297_v33  ;;  %v3316_v32 = vld [vmem:[#allocation8 + $0x110] sm:$0xff]  }
  0xe5   :  { %3099 = vmatprep.subr.bf16.mxu0 %v3298_v34  ;;  %3121 = vmatprep.subr.bf16.mxu1 %v3299_v35  ;;  %v3317_v33 = vld [vmem:[#allocation8 + $0x190] sm:$0xff]   ;;  %v3318_v34 = vld [vmem:[#allocation8 + $0x158] sm:$0xff]   ;;  %v1228_v35 = vsub.s32 4, %v3640_v45 }
  0xe8   :  { %3100 = vmatpush3.bf16.msra.mxu0 %v3300_v36  ;;  %3122 = vmatpush3.bf16.msra.mxu1 %v3301_v37  ;;  %v3319_v36 = vld [vmem:[#allocation8 + $0x1d8] sm:$0xff]   ;;  %v1236_v37 = vsub.s32 6, %v3640_v45 }
  0xe9   :  { %3101 = vmatprep.subr.bf16.mxu0 %v3302_v38  ;;  %3123 = vmatprep.subr.bf16.mxu1 %v3303_v39  ;;  %v1232_v38 = vsub.s32 5, %v3640_v45  ;;  %v1240_v39 = vsub.s32 7, %v3640_v45 }
  0xea   :  { %v1237_v51 = vrot.slane %v3645_v47, %v1236_v37 }
  0xeb   :  { %v1233_v52 = vrot.slane %v3645_v47, %v1232_v38  ;;  %v1241_v53 = vrot.slane %v3645_v47, %v1240_v39 }
  0xec   :  { %3102 = vmatpush3.bf16.msra.mxu0 %v3304_v40  ;;  %3124 = vmatpush3.bf16.msra.mxu1 %v3305_v41  ;;  %v3320_v40 = vld [vmem:[#allocation8 + $0x118] sm:$0xff]   ;;  %v1296_v59 = vpack.c.bf16 %v1237_v51, %v1237_v51  ;;  %v3343_v51 = vld [vmem:[#allocation8 + $0x2c8] sm:$0xff]  }
  0xed   :  { %3131 = vmatprep.subr.bf16.mxu0 %v3306_v42  ;;  %3153 = vmatprep.subr.bf16.mxu1 %v3307_v43  ;;  %v3321_v41 = vld [vmem:[#allocation8 + $0x198] sm:$0xff]   ;;  %v3322_v42 = vld [vmem:[#allocation8 + $0x160] sm:$0xff]   ;;  %v1229_v43 = vrot.slane %v3645_v47, %v1228_v35  ;;  %v1295_v60 = vpack.c.bf16 %v1233_v52, %v1233_v52  ;;  %v1297_v61 = vpack.c.bf16 %v1241_v53, %v1241_v53  ;;  %v3344_v52 = vld [vmem:[#allocation8 + $0x208] sm:$0xff]  }
  0xee   :  { %v1349_v47 = vpack.i.b16 %v1296_v59, %v1296_v59  ;;  %v3345_v53 = vld [vmem:[#allocation8 + $0x288] sm:$0xff]   ;;  %v3351_v59 = vld [vmem:[#allocation8 + $0x2d8] sm:$0xff]  }
  0xef   :  { %v1294_v57 = vpack.c.bf16 %v1229_v43, %v1229_v43  ;;  %v3341_v43 = vld [vmem:[#allocation8 + $0x280] sm:$0xff]  }
 0x142   :  { %v880_v63 = vpop.f32.mrb[0].mxu0  ;;  %v923_v1 = vpop.f32.mrb[0].mxu1 }
 0x143   :  { %v882_v2 = vpop.f32.mrb[1].mxu0  ;;  %v925_v4 = vpop.f32.mrb[1].mxu1 }
 0x144   :  { %v884_v5 = vpop.f32.mrb[2].mxu0  ;;  %v927_v9 = vpop.f32.mrb[2].mxu1 }
 0x145   :  { %v1190_v8 = vpack.c.bf16 %v884_v5, %v880_v63  ;;  %v886_v10 = vpop.f32.mrb[3].mxu0  ;;  %v1192_v13 = vpack.c.bf16 %v927_v9, %v923_v1  ;;  %v929_v15 = vpop.f32.mrb[3].mxu1  ;;  %v3329_v63 = vld [vmem:[#allocation8 + $0x1a8] sm:$0xff]   ;;  %v1335_v1 = vpack.i.b16 %v1294_v57, %v1294_v57  ;;  %v1356_v5 = vpack.i.b16 %v1297_v61, %v1297_v61  ;;  %v3349_v57 = vld [vmem:[#allocation8 + $0x290] sm:$0xff]   ;;  %v3352_v61 = vld [vmem:[#allocation8 + $0x218] sm:$0xff]  }
 0x146   :  { %v1191_v14 = vpack.c.bf16 %v886_v10, %v882_v2  ;;  %v1193_v17 = vpack.c.bf16 %v929_v15, %v925_v4  ;;  %v3330_v2 = vld [vmem:[#allocation8 + $0x170] sm:$0xff]  }
 0x147   :  { %v1418_v16 = vadd.bf16 %v1312_v3, %v1190_v8  ;;  %v1420_v18 = vadd.bf16 %v1326_v6, %v1192_v13  ;;  %v1342_v3 = vpack.i.b16 %v1295_v60, %v1295_v60  ;;  %v3331_v4 = vld [vmem:[#allocation8 + $0x1f0] sm:$0xff]   ;;  %v1340_v10 = vrot.slane %v1335_v1, %v3643_v46  ;;  %v3334_v13 = vld [vmem:[#allocation8 + $0x178] sm:$0xff]  }
 0x148   :  { %v1419_v19 = vadd.bf16 %v1319_v7, %v1191_v14  ;;  %v1421_v20 = vadd.bf16 %v1333_v11, %v1193_v17  ;;  %v3332_v7 = vld [vmem:[#allocation8 + $0x130] sm:$0xff]   ;;  %v3693_v60 = vld [vmem:[#allocation7 + $0x8] sm:$0xff] }
 0x149   :  { %v1436_v21 = vmax.bf16 %v3529_v0, %v1420_v18  ;;  %v1434_v24 = vmax.bf16 %v3529_v0, %v1418_v16  ;;  %v3333_v11 = vld [vmem:[#allocation8 + $0x1b0] sm:$0xff]   ;;  %v1354_v16 = vrot.slane %v1349_v47, %v3643_v46  ;;  %v1347_v17 = vrot.slane %v1342_v3, %v3643_v46  ;;  %v3335_v18 = vld [vmem:[#allocation8 + $0x1f8] sm:$0xff]  }
 0x14a   :  { %v1435_v22 = vmax.bf16 %v3529_v0, %v1419_v19  ;;  %v1437_v25 = vmax.bf16 %v3529_v0, %v1421_v20  ;;  %v1245_v1 = vrot.slane %v3693_v60, %v3643_v46  ;;  %v1253_v47 = vrot.slane %v3693_v60, %v1220_v48 }
 0x14b   :  { %v1249_v3 = vrot.slane %v3693_v60, %v1216_v49  ;;  %v3361_v49 = vld [vmem:[#allocation8 + $0x2a8] sm:$0xff]  }
 0x14c   :  { %2513 = vmatprep.mubr.bf16.mxu0 %v1435_v22  ;;  %2554 = vmatprep.mubr.bf16.mxu1 %v1437_v25  ;;  %v1361_v22 = vrot.slane %v1356_v5, %v3643_v46  ;;  %v3356_v5 = vld [vmem:[#allocation8 + $0x220] sm:$0xff]  }
 0x14d   :  { %2514 = vmatmul.mubr.bf16.vlgmr.msra.gmra.mrb[16].mxu0 %v1434_v24  ;;  %2555 = vmatmul.mubr.bf16.vlgmr.msra.gmra.mrb[16].mxu1 %v1436_v21 }
 0x14e   :  { %3132 = vmatpush3.bf16.msra.mxu0 %v3308_v23  ;;  %3154 = vmatpush3.bf16.msra.mxu1 %v3309_v26  ;;  %v3336_v26 = vld [vmem:[#allocation8 + $0x138] sm:$0xff]  }
 0x14f   :  { %3133 = vmatprep.subr.bf16.mxu0 %v3310_v27  ;;  %3155 = vmatprep.subr.bf16.mxu1 %v3311_v12 }
 0x152   :  { %3134 = vmatpush3.bf16.msra.mxu0 %v3312_v28  ;;  %3156 = vmatpush3.bf16.msra.mxu1 %v3313_v29  ;;  %v3337_v28 = vld [vmem:[#allocation8 + $0x1b8] sm:$0xff]   ;;  %v3338_v29 = vld [vmem:[#allocation8 + $0x240] sm:$0xff]  }
 0x153   :  { %3135 = vmatprep.subr.bf16.mxu0 %v3314_v30  ;;  %3157 = vmatprep.subr.bf16.mxu1 %v3315_v31 }
 0x156   :  { %3136 = vmatpush3.bf16.msra.mxu0 %v3316_v32  ;;  %3158 = vmatpush3.bf16.msra.mxu1 %v3317_v33  ;;  %v3339_v32 = vld [vmem:[#allocation8 + $0x2c0] sm:$0xff]  }
 0x157   :  { %3137 = vmatprep.subr.bf16.mxu0 %v3318_v34  ;;  %3159 = vmatprep.subr.bf16.mxu1 %v3319_v36 }
 0x15a   :  { %3138 = vmatpush3.bf16.msra.mxu0 %v3320_v40  ;;  %3160 = vmatpush3.bf16.msra.mxu1 %v3321_v41  ;;  %v3340_v40 = vld [vmem:[#allocation8 + $0x200] sm:$0xff]  }
 0x15b   :  { %3139 = vmatprep.subr.bf16.mxu0 %v3322_v42  ;;  %3161 = vmatprep.subr.bf16.mxu1 %v3323_v44  ;;  %v3342_v44 = vld [vmem:[#allocation8 + $0x248] sm:$0xff]  }
 0x15e   :  { %3140 = vmatpush3.bf16.msra.mxu0 %v3324_v54  ;;  %3162 = vmatpush3.bf16.msra.mxu1 %v3325_v55  ;;  %v3346_v54 = vld [vmem:[#allocation8 + $0x250] sm:$0xff]  }
 0x15f   :  { %3141 = vmatprep.subr.bf16.mxu0 %v3326_v56  ;;  %3163 = vmatprep.subr.bf16.mxu1 %v3327_v58  ;;  %v3347_v55 = vld [vmem:[#allocation8 + $0x2d0] sm:$0xff]   ;;  %v3350_v58 = vld [vmem:[#allocation8 + $0x258] sm:$0xff]  }
 0x160   :  { %v3348_v56 = vld [vmem:[#allocation8 + $0x210] sm:$0xff]  }
 0x162   :  { %v966_v6 = vpop.f32.mrb[4].mxu0  ;;  %3142 = vmatpush3.bf16.msra.mxu0 %v3328_v62  ;;  %v1009_v8 = vpop.f32.mrb[4].mxu1  ;;  %3164 = vmatpush3.bf16.msra.mxu1 %v3329_v63  ;;  %v3353_v62 = vld [vmem:[#allocation8 + $0x298] sm:$0xff]   ;;  %v3354_v63 = vld [vmem:[#allocation8 + $0x260] sm:$0xff]  }
 0x163   :  { %v968_v9 = vpop.f32.mrb[5].mxu0  ;;  %3143 = vmatprep.subr.bf16.mxu0 %v3330_v2  ;;  %v1011_v14 = vpop.f32.mrb[5].mxu1  ;;  %3165 = vmatprep.subr.bf16.mxu1 %v3331_v4  ;;  %v3355_v2 = vld [vmem:[#allocation8 + $0x2e0] sm:$0xff]   ;;  %v1257_v4 = vrot.slane %v3693_v60, %v1224_v50 }
 0x164   :  { %v970_v15 = vpop.f32.mrb[6].mxu0  ;;  %v1013_v20 = vpop.f32.mrb[6].mxu1 }
 0x165   :  { %v1194_v19 = vpack.c.bf16 %v970_v15, %v966_v6  ;;  %v972_v21 = vpop.f32.mrb[7].mxu0  ;;  %v1196_v23 = vpack.c.bf16 %v1013_v20, %v1009_v8  ;;  %v1015_v25 = vpop.f32.mrb[7].mxu1  ;;  %v3357_v6 = vld [vmem:[#allocation8 + $0x2a0] sm:$0xff]   ;;  %v1298_v8 = vpack.c.bf16 %v1245_v1, %v1245_v1  ;;  %v1301_v48 = vpack.c.bf16 %v1257_v4, %v1257_v4  ;;  %v3362_v15 = vld [vmem:[#allocation8 + $0x270] sm:$0xff]   ;;  %v3375_v1 = vld [vmem:[#allocation8 + $0x3c8] sm:$0xff]  }
 0x166   :  { %v1195_v24 = vpack.c.bf16 %v972_v21, %v968_v9  ;;  %3144 = vmatpush3.bf16.msra.mxu0 %v3332_v7  ;;  %v1197_v12 = vpack.c.bf16 %v1015_v25, %v1011_v14  ;;  %3166 = vmatpush3.bf16.msra.mxu1 %v3333_v11  ;;  %v3358_v7 = vld [vmem:[#allocation8 + $0x268] sm:$0xff]   ;;  %v1299_v11 = vpack.c.bf16 %v1249_v3, %v1249_v3  ;;  %v3364_v20 = vld [vmem:[#allocation8 + $0x230] sm:$0xff]   ;;  %v3366_v25 = vld [vmem:[#allocation8 + $0x278] sm:$0xff]  }
 0x167   :  { %v1422_v27 = vadd.bf16 %v1340_v10, %v1194_v19  ;;  %3145 = vmatprep.subr.bf16.mxu0 %v3334_v13  ;;  %v1424_v30 = vadd.bf16 %v1354_v16, %v1196_v23  ;;  %3167 = vmatprep.subr.bf16.mxu1 %v3335_v18  ;;  %v3359_v9 = vld [vmem:[#allocation8 + $0x2e8] sm:$0xff]   ;;  %v1300_v10 = vpack.c.bf16 %v1253_v47, %v1253_v47  ;;  %v3378_v3 = vld [vmem:[#allocation8 + $0x350] sm:$0xff]  }
 0x168   :  { %v1423_v31 = vadd.bf16 %v1347_v17, %v1195_v24  ;;  %v1425_v33 = vadd.bf16 %v1361_v22, %v1197_v12  ;;  %v3360_v13 = vld [vmem:[#allocation8 + $0x228] sm:$0xff]   ;;  %v1363_v14 = vpack.i.b16 %v1298_v8, %v1298_v8  ;;  %v1370_v16 = vpack.i.b16 %v1299_v11, %v1299_v11  ;;  %v3363_v17 = vld [vmem:[#allocation8 + $0x2f0] sm:$0xff]   ;;  %v3383_v8 = vld [vmem:[#allocation8 + $0x3d8] sm:$0xff]  }
 0x169   :  { %v1440_v34 = vmax.bf16 %v3529_v0, %v1424_v30  ;;  %v1438_v41 = vmax.bf16 %v3529_v0, %v1422_v27  ;;  %v1377_v50 = vpack.i.b16 %v1300_v10, %v1300_v10  ;;  %v1384_v18 = vpack.i.b16 %v1301_v48, %v1301_v48  ;;  %v3365_v24 = vld [vmem:[#allocation8 + $0x2b0] sm:$0xff]   ;;  %v3377_v47 = vld [vmem:[#allocation8 + $0x388] sm:$0xff]   ;;  %v3385_v10 = vld [vmem:[#allocation8 + $0x398] sm:$0xff]  }
 0x16a   :  { %3146 = vmatpush3.bf16.msra.mxu0 %v3336_v26  ;;  %v1439_v36 = vmax.bf16 %v3529_v0, %v1423_v31  ;;  %3168 = vmatpush3.bf16.msra.mxu1 %v3337_v28  ;;  %v1441_v42 = vmax.bf16 %v3529_v0, %v1425_v33  ;;  %v1368_v23 = vrot.slane %v1363_v14, %v3643_v46  ;;  %v3379_v4 = vld [vmem:[#allocation8 + $0x3d0] sm:$0xff]   ;;  %v3386_v11 = vld [vmem:[#allocation8 + $0x360] sm:$0xff]  }
 0x16b   :  { %3175 = vmatprep.subr.bf16.mxu0 %v3338_v29  ;;  %3197 = vmatprep.subr.bf16.mxu1 %v3339_v32  ;;  %v1382_v12 = vrot.slane %v1377_v50, %v3643_v46  ;;  %v1375_v28 = vrot.slane %v1370_v16, %v3643_v46  ;;  %v3367_v29 = vld [vmem:[#allocation8 + $0x2f8] sm:$0xff]   ;;  %v1389_v33 = vrot.slane %v1384_v18, %v3643_v46  ;;  %v3388_v50 = vld [vmem:[#allocation8 + $0x320] sm:$0xff]   ;;  %v3391_v18 = vld [vmem:[#allocation8 + $0x3e8] sm:$0xff]  }
 0x16c   :  { %2595 = vmatprep.mubr.bf16.mxu0 %v1439_v36  ;;  %2636 = vmatprep.mubr.bf16.mxu1 %v1441_v42  ;;  %v1261_v48 = vrot.slane %v3693_v60, %v1228_v35  ;;  %v1265_v14 = vrot.slane %v3693_v60, %v1232_v38  ;;  %v3389_v16 = vld [vmem:[#allocation8 + $0x3a0] sm:$0xff]   ;;  %v3390_v35 = vld [vmem:[#allocation8 + $0x368] sm:$0xff]  }
 0x16d   :  { %2596 = vmatmul.mubr.bf16.vlgmr.msra.gmra.mrb[20].mxu0 %v1438_v41  ;;  %2637 = vmatmul.mubr.bf16.vlgmr.msra.gmra.mrb[20].mxu1 %v1440_v34  ;;  %v3368_v41 = vld [vmem:[#allocation8 + $0x238] sm:$0xff]   ;;  %v3393_v38 = vld [vmem:[#allocation8 + $0x3a8] sm:$0xff]  }
 0x16e   :  { %3176 = vmatpush3.bf16.msra.mxu0 %v3340_v40  ;;  %3198 = vmatpush3.bf16.msra.mxu1 %v3341_v43 }
 0x16f   :  { %3177 = vmatprep.subr.bf16.mxu0 %v3342_v44  ;;  %3199 = vmatprep.subr.bf16.mxu1 %v3343_v51  ;;  %v3369_v44 = vld [vmem:[#allocation8 + $0x2b8] sm:$0xff]   ;;  %v3370_v51 = vld [vmem:[#allocation8 + $0x340] sm:$0xff]  }
 0x172   :  { %3178 = vmatpush3.bf16.msra.mxu0 %v3344_v52  ;;  %3200 = vmatpush3.bf16.msra.mxu1 %v3345_v53 }
 0x173   :  { %3179 = vmatprep.subr.bf16.mxu0 %v3346_v54  ;;  %3201 = vmatprep.subr.bf16.mxu1 %v3347_v55  ;;  %v3371_v54 = vld [vmem:[#allocation8 + $0x3c0] sm:$0xff]  }
 0x176   :  { %3180 = vmatpush3.bf16.msra.mxu0 %v3348_v56  ;;  %3202 = vmatpush3.bf16.msra.mxu1 %v3349_v57 }
 0x177   :  { %3181 = vmatprep.subr.bf16.mxu0 %v3350_v58  ;;  %3203 = vmatprep.subr.bf16.mxu1 %v3351_v59  ;;  %v3372_v58 = vld [vmem:[#allocation8 + $0x300] sm:$0xff]  }
 0x17a   :  { %3182 = vmatpush3.bf16.msra.mxu0 %v3352_v61  ;;  %3204 = vmatpush3.bf16.msra.mxu1 %v3353_v62  ;;  %v3373_v62 = vld [vmem:[#allocation8 + $0x380] sm:$0xff]  }
 0x17b   :  { %3183 = vmatprep.subr.bf16.mxu0 %v3354_v63  ;;  %3205 = vmatprep.subr.bf16.mxu1 %v3355_v2  ;;  %v3374_v63 = vld [vmem:[#allocation8 + $0x348] sm:$0xff]  }
 0x17c   :  { %v3376_v2 = vld [vmem:[#allocation8 + $0x308] sm:$0xff]  }
 0x17e   :  { %3184 = vmatpush3.bf16.msra.mxu0 %v3356_v5  ;;  %3206 = vmatpush3.bf16.msra.mxu1 %v3357_v6  ;;  %v3380_v5 = vld [vmem:[#allocation8 + $0x310] sm:$0xff]  }
 0x17f   :  { %3185 = vmatprep.subr.bf16.mxu0 %v3358_v7  ;;  %3207 = vmatprep.subr.bf16.mxu1 %v3359_v9  ;;  %v3381_v6 = vld [vmem:[#allocation8 + $0x390] sm:$0xff]   ;;  %v3382_v7 = vld [vmem:[#allocation8 + $0x358] sm:$0xff]  }
 0x180   :  { %v3384_v9 = vld [vmem:[#allocation8 + $0x318] sm:$0xff]  }
 0x182   :  { %v1052_v19 = vpop.f32.mrb[8].mxu0  ;;  %3186 = vmatpush3.bf16.msra.mxu0 %v3360_v13  ;;  %v1095_v21 = vpop.f32.mrb[8].mxu1  ;;  %3208 = vmatpush3.bf16.msra.mxu1 %v3361_v49  ;;  %v3387_v13 = vld [vmem:[#allocation8 + $0x3e0] sm:$0xff]   ;;  %v1269_v49 = vrot.slane %v3693_v60, %v1236_v37 }
 0x183   :  { %v1054_v22 = vpop.f32.mrb[9].mxu0  ;;  %3187 = vmatprep.subr.bf16.mxu0 %v3362_v15  ;;  %v1097_v26 = vpop.f32.mrb[9].mxu1  ;;  %3209 = vmatprep.subr.bf16.mxu1 %v3363_v17  ;;  %v1273_v15 = vrot.slane %v3693_v60, %v1240_v39  ;;  %v1302_v17 = vpack.c.bf16 %v1261_v48, %v1261_v48 }
 0x184   :  { %v1056_v27 = vpop.f32.mrb[10].mxu0  ;;  %v1099_v31 = vpop.f32.mrb[10].mxu1 }
 0x185   :  { %v1198_v30 = vpack.c.bf16 %v1056_v27, %v1052_v19  ;;  %v1058_v32 = vpop.f32.mrb[11].mxu0  ;;  %v1200_v34 = vpack.c.bf16 %v1099_v31, %v1095_v21  ;;  %v1101_v40 = vpop.f32.mrb[11].mxu1  ;;  %v1304_v19 = vpack.c.bf16 %v1269_v49, %v1269_v49  ;;  %v1305_v37 = vpack.c.bf16 %v1273_v15, %v1273_v15  ;;  %v3392_v21 = vld [vmem:[#allocation8 + $0x328] sm:$0xff]  }
 0x186   :  { %v1199_v36 = vpack.c.bf16 %v1058_v32, %v1054_v22  ;;  %3188 = vmatpush3.bf16.msra.mxu0 %v3364_v20  ;;  %v1201_v43 = vpack.c.bf16 %v1101_v40, %v1097_v26  ;;  %3210 = vmatpush3.bf16.msra.mxu1 %v3365_v24  ;;  %v1303_v20 = vpack.c.bf16 %v1265_v14, %v1265_v14  ;;  %v3394_v22 = vld [vmem:[#allocation8 + $0x370] sm:$0xff]  }
 0x187   :  { %v1426_v42 = vadd.bf16 %v1368_v23, %v1198_v30  ;;  %3189 = vmatprep.subr.bf16.mxu0 %v3366_v25  ;;  %v1428_v52 = vadd.bf16 %v1382_v12, %v1200_v34  ;;  %3211 = vmatprep.subr.bf16.mxu1 %v3367_v29  ;;  %v1391_v45 = vpack.i.b16 %v1302_v17, %v1302_v17  ;;  %v3395_v23 = vld [vmem:[#allocation8 + $0x3f0] sm:$0xff]   ;;  %v3398_v30 = vld [vmem:[#allocation8 + $0x378] sm:$0xff]  }
 0x188   :  { %v1427_v53 = vadd.bf16 %v1375_v28, %v1199_v36  ;;  %v1429_v55 = vadd.bf16 %v1389_v33, %v1201_v43  ;;  %v1405_v39 = vpack.i.b16 %v1304_v19, %v1304_v19  ;;  %v1398_v60 = vpack.i.b16 %v1303_v20, %v1303_v20  ;;  %v3396_v26 = vld [vmem:[#allocation8 + $0x330] sm:$0xff]   ;;  %v3399_v36 = vld [vmem:[#allocation8 + $0x3f8] sm:$0xff]  }
 0x189   :  { %v1444_v56 = vmax.bf16 %v3529_v0, %v1428_v52  ;;  %v1442_v59 = vmax.bf16 %v3529_v0, %v1426_v42  ;;  %v1412_v24 = vpack.i.b16 %v1305_v37, %v1305_v37  ;;  %v1396_v28 = vrot.slane %v1391_v45, %v3643_v46  ;;  %v3397_v29 = vld [vmem:[#allocation8 + $0x3b0] sm:$0xff]  }
 0x18a   :  { %3190 = vmatpush3.bf16.msra.mxu0 %v3368_v41  ;;  %v1443_v57 = vmax.bf16 %v3529_v0, %v1427_v53  ;;  %3212 = vmatpush3.bf16.msra.mxu1 %v3369_v44  ;;  %v1445_v61 = vmax.bf16 %v3529_v0, %v1429_v55  ;;  %v1410_v33 = vrot.slane %v1405_v39, %v3643_v46  ;;  %v3400_v53 = vld [vmem:[#allocation8 + $0x338] sm:$0xff]  }
 0x18b   :  { %3219 = vmatprep.subr.bf16.mxu0 %v3370_v51  ;;  %3241 = vmatprep.subr.bf16.mxu1 %v3371_v54  ;;  %v1403_v34 = vrot.slane %v1398_v60, %v3643_v46  ;;  %v1417_v43 = vrot.slane %v1412_v24, %v3643_v46 }
 0x18c   :  { %2677 = vmatprep.mubr.bf16.mxu0 %v1443_v57  ;;  %2718 = vmatprep.mubr.bf16.mxu1 %v1445_v61 }
 0x18d   :  { %2678 = vmatmul.mubr.bf16.vlgmr.msra.gmra.mrb[24].mxu0 %v1442_v59  ;;  %2719 = vmatmul.mubr.bf16.vlgmr.msra.gmra.mrb[24].mxu1 %v1444_v56  ;;  %v3401_v56 = vld [vmem:[#allocation8 + $0x3b8] sm:$0xff]  }
 0x18e   :  { %3220 = vmatpush3.bf16.msra.mxu0 %v3372_v58  ;;  %3242 = vmatpush3.bf16.msra.mxu1 %v3373_v62 }
 0x18f   :  { %3221 = vmatprep.subr.bf16.mxu0 %v3374_v63  ;;  %3243 = vmatprep.subr.bf16.mxu1 %v3375_v1 }
 0x192   :  { %3222 = vmatpush3.bf16.msra.mxu0 %v3376_v2  ;;  %3244 = vmatpush3.bf16.msra.mxu1 %v3377_v47  ;;  %v2958_v47 = vld [vmem:[%s3756_s4] ss:$0 sm:$0xff]  ;;  %s3530_s4 = smov [#allocation10]  }
 0x193   :  { %3223 = vmatprep.subr.bf16.mxu0 %v3378_v3  ;;  %3245 = vmatprep.subr.bf16.mxu1 %v3379_v4  ;;  %s2816_s20 = sshll.u32 %s3530_s4, 4  ;;  %s2817_s20 = int_to_ptr.vmem [resolvable:$true] %s2816_s20 }
 0x194   :  { %s3490_s21 = scalar_lea.vmem %s2817_s20, 256  ;;  %p3495_p5 = scmp.lt.s32.totalorder %s2817_s20, %s2817_s20 }
 0x195   :  { %p3491_p4 = scmp.ne.s32.totalorder %s2817_s20, %s3490_s21  ;;  %p3496_p6 = scmp.lt.s32.totalorder %s3490_s21, %s3490_s21 }
 0x196   :  { %3224 = vmatpush3.bf16.msra.mxu0 %v3380_v5  ;;  %3246 = vmatpush3.bf16.msra.mxu1 %v3381_v6 }
 0x197   :  { %3225 = vmatprep.subr.bf16.mxu0 %v3382_v7  ;;  %3247 = vmatprep.subr.bf16.mxu1 %v3383_v8  ;;  %p3497_p7 = por %p3496_p6, %p3495_p5 }
 0x199   :  { %p3498_p8 = pnand %p3497_p7, %p3491_p4 }
 0x19a   :  { %3226 = vmatpush3.bf16.msra.mxu0 %v3384_v9  ;;  %3248 = vmatpush3.bf16.msra.mxu1 %v3385_v10 }
 0x19b   :  { %3227 = vmatprep.subr.bf16.mxu0 %v3386_v11  ;;  %3249 = vmatprep.subr.bf16.mxu1 %v3387_v13 }
 0x19e   :  { %3228 = vmatpush3.bf16.msra.mxu0 %v3388_v50  ;;  %3250 = vmatpush3.bf16.msra.mxu1 %v3389_v16 }
 0x19f   :  { %3229 = vmatprep.subr.bf16.mxu0 %v3390_v35  ;;  %3251 = vmatprep.subr.bf16.mxu1 %v3391_v18 }
 0x1a2   :  { %v1138_v25 = vpop.f32.mrb[12].mxu0  ;;  %3230 = vmatpush3.bf16.msra.mxu0 %v3392_v21  ;;  %v1181_v27 = vpop.f32.mrb[12].mxu1  ;;  %3252 = vmatpush3.bf16.msra.mxu1 %v3393_v38 }
 0x1a3   :  { %v1140_v12 = vpop.f32.mrb[13].mxu0  ;;  %3231 = vmatprep.subr.bf16.mxu0 %v3394_v22  ;;  %v1183_v31 = vpop.f32.mrb[13].mxu1  ;;  %3253 = vmatprep.subr.bf16.mxu1 %v3395_v23 }
 0x1a4   :  { %v1142_v32 = vpop.f32.mrb[14].mxu0  ;;  %v1185_v41 = vpop.f32.mrb[14].mxu1 }
 0x1a5   :  { %v1202_v40 = vpack.c.bf16 %v1142_v32, %v1138_v25  ;;  %v1144_v42 = vpop.f32.mrb[15].mxu0  ;;  %v1204_v44 = vpack.c.bf16 %v1185_v41, %v1181_v27  ;;  %v1187_v52 = vpop.f32.mrb[15].mxu1 }
 0x1a6   :  { %v1203_v51 = vpack.c.bf16 %v1144_v42, %v1140_v12  ;;  %3232 = vmatpush3.bf16.msra.mxu0 %v3396_v26  ;;  %v1205_v55 = vpack.c.bf16 %v1187_v52, %v1183_v31  ;;  %3254 = vmatpush3.bf16.msra.mxu1 %v3397_v29 }
 0x1a7   :  { %v1430_v54 = vadd.bf16 %v1396_v28, %v1202_v40  ;;  %3233 = vmatprep.subr.bf16.mxu0 %v3398_v30  ;;  %v1432_v57 = vadd.bf16 %v1410_v33, %v1204_v44  ;;  %3255 = vmatprep.subr.bf16.mxu1 %v3399_v36 }
 0x1a8   :  { %v1431_v58 = vadd.bf16 %v1403_v34, %v1203_v51  ;;  %v1433_v59 = vadd.bf16 %v1417_v43, %v1205_v55 }
 0x1a9   :  { %v1446_v62 = vmax.bf16 %v3529_v0, %v1430_v54  ;;  %v1448_v63 = vmax.bf16 %v3529_v0, %v1432_v57 }
 0x1aa   :  { %3234 = vmatpush3.bf16.msra.mxu0 %v3400_v53  ;;  %v1447_v61 = vmax.bf16 %v3529_v0, %v1431_v58  ;;  %3256 = vmatpush3.bf16.msra.mxu1 %v3401_v56  ;;  %v1449_v46 = vmax.bf16 %v3529_v0, %v1433_v59 }
 0x1ac   :  { %2759 = vmatprep.mubr.bf16.mxu0 %v1447_v61  ;;  %2800 = vmatprep.mubr.bf16.mxu1 %v1449_v46 }
 0x1ad   :  { %2760 = vmatmul.mubr.bf16.vlgmr.msra.gmra.mrb[28].mxu0 %v1446_v62  ;;  %2801 = vmatmul.mubr.bf16.vlgmr.msra.gmra.mrb[28].mxu1 %v1448_v63 }
 0x220   :  { %v3103_v1 = vpop.f32.mrb[16].mxu0  ;;  %v3125_v2 = vpop.f32.mrb[16].mxu1 }
 0x221   :  { %v3104_v3 = vpop.f32.mrb[17].mxu0  ;;  %v3126_v5 = vpop.f32.mrb[17].mxu1 }
 0x222   :  { %v3105_v4 = vadd.f32 %v3104_v3, %v3103_v1  ;;  %v3106_v6 = vpop.f32.mrb[18].mxu0  ;;  %v3127_v7 = vadd.f32 %v3126_v5, %v3125_v2  ;;  %v3128_v8 = vpop.f32.mrb[18].mxu1 }
 0x223   :  { %v3107_v9 = vpop.f32.mrb[19].mxu0  ;;  %v3129_v0 = vpop.f32.mrb[19].mxu1 }
 0x224   :  { %v2516_v10 = vadd.f32 %v3105_v4, %v2958_v47  ;;  %v3108_v11 = vadd.f32 %v3107_v9, %v3106_v6  ;;  %v3130_v48 = vadd.f32 %v3129_v0, %v3128_v8 }
 0x226   :  { %v2557_v13 = vadd.f32 %v3127_v7, %v2516_v10  ;;  %v2519_v49 = vadd.f32 %v3108_v11, %v2958_v47 }
 0x228   :  { %v2560_v14 = vadd.f32 %v3130_v48, %v2519_v49 }
 0x240   :  { %v3147_v15 = vpop.f32.mrb[20].mxu0  ;;  %v3169_v50 = vpop.f32.mrb[20].mxu1 }
 0x241   :  { %v3148_v16 = vpop.f32.mrb[21].mxu0  ;;  %v3170_v17 = vpop.f32.mrb[21].mxu1 }
 0x242   :  { %v3149_v35 = vadd.f32 %v3148_v16, %v3147_v15  ;;  %v3150_v18 = vpop.f32.mrb[22].mxu0  ;;  %v3171_v19 = vadd.f32 %v3170_v17, %v3169_v50  ;;  %v3172_v20 = vpop.f32.mrb[22].mxu1 }
 0x243   :  { %v3151_v37 = vpop.f32.mrb[23].mxu0  ;;  %v3173_v45 = vpop.f32.mrb[23].mxu1 }
 0x244   :  { %v2598_v21 = vadd.f32 %v3149_v35, %v2557_v13  ;;  %v3152_v38 = vadd.f32 %v3151_v37, %v3150_v18  ;;  %v3174_v22 = vadd.f32 %v3173_v45, %v3172_v20 }
 0x246   :  { %v2639_v39 = vadd.f32 %v3171_v19, %v2598_v21  ;;  %v2601_v60 = vadd.f32 %v3152_v38, %v2560_v14 }
 0x248   :  { %v2642_v23 = vadd.f32 %v3174_v22, %v2601_v60 }
 0x260   :  { %v3191_v24 = vpop.f32.mrb[24].mxu0  ;;  %v3213_v25 = vpop.f32.mrb[24].mxu1 }
 0x261   :  { %v3192_v26 = vpop.f32.mrb[25].mxu0  ;;  %v3214_v12 = vpop.f32.mrb[25].mxu1 }
 0x262   :  { %v3193_v27 = vadd.f32 %v3192_v26, %v3191_v24  ;;  %v3194_v28 = vpop.f32.mrb[26].mxu0  ;;  %v3215_v29 = vadd.f32 %v3214_v12, %v3213_v25  ;;  %v3216_v30 = vpop.f32.mrb[26].mxu1 }
 0x263   :  { %v3195_v31 = vpop.f32.mrb[27].mxu0  ;;  %v3217_v34 = vpop.f32.mrb[27].mxu1 }
 0x264   :  { %v2680_v32 = vadd.f32 %v3193_v27, %v2639_v39  ;;  %v3196_v33 = vadd.f32 %v3195_v31, %v3194_v28  ;;  %v3218_v36 = vadd.f32 %v3217_v34, %v3216_v30 }
 0x266   :  { %v2721_v40 = vadd.f32 %v3215_v29, %v2680_v32  ;;  %v2683_v41 = vadd.f32 %v3196_v33, %v2642_v23 }
 0x268   :  { %v2724_v42 = vadd.f32 %v3218_v36, %v2683_v41 }
 0x280   :  { %v3235_v43 = vpop.f32.mrb[28].mxu0  ;;  %v3257_v44 = vpop.f32.mrb[28].mxu1 }
 0x281   :  { %v3236_v51 = vpop.f32.mrb[29].mxu0  ;;  %v3258_v53 = vpop.f32.mrb[29].mxu1 }
 0x282   :  { %v3237_v52 = vadd.f32 %v3236_v51, %v3235_v43  ;;  %v3238_v54 = vpop.f32.mrb[30].mxu0  ;;  %v3259_v55 = vadd.f32 %v3258_v53, %v3257_v44  ;;  %v3260_v56 = vpop.f32.mrb[30].mxu1 }
 0x283   :  { %v3239_v57 = vpop.f32.mrb[31].mxu0  ;;  %v3261_v61 = vpop.f32.mrb[31].mxu1 }
 0x284   :  { %v2762_v58 = vadd.f32 %v3237_v52, %v2721_v40  ;;  %v3240_v59 = vadd.f32 %v3239_v57, %v3238_v54  ;;  %v3262_v62 = vadd.f32 %v3261_v61, %v3260_v56 }
 0x286   :  { %v2803_v46 = vadd.f32 %v3259_v55, %v2762_v58  ;;  %v2765_v63 = vadd.f32 %v3240_v59, %v2724_v42 }
 0x288   :  { %2809 = vst [vmem:[#allocation10] sm:$0xff] %v2803_v46  ;;  %v2806_v1 = vadd.f32 %v3262_v62, %v2765_v63 }
 0x28a   :  { %2810 = vst [vmem:[#allocation10 + $0x8] sm:$0xff] %v2806_v1 }
 0x28b   :  { %3501 = shalt.err (!%p3498_p8)
}
 0x28c   :  { %s3502_s24 = scalar_lea.hbm %s3757_s5, 256 }
 0x28d   :  { %p3503_p9 = scmp.ne.s32.totalorder %s3757_s5, %s3502_s24  ;;  %p3506_p10 = scmp.lt.u32.totalorder %s3502_s24, %s3757_s5 }
 0x28f   :  { %p3508_p11 = pnand %p3506_p10, %p3503_p9 }
 0x291   :  { %3511 = shalt.err (!%p3508_p11)
}
 0x292   :  { %2822 = dma.vmem_to_hbm [thread:$0]  %s2817_s20, 256, %s3757_s5, [#allocation4], %s3524_s1, %s3524_s1, %s3525_s17  }
 0x293   :  { %3518 = dma.done.wait [#allocation4], 256  }
 0x294   :  { %3519 = vsyncadd [#allocation4], 4294967040 }
 0x295   :  { %2826 = vsyncpa [#allocation3], 1 }
 0x296   :  { %2827 = vsyncpa [#allocation6], 1 }
 0x297   :  { %2828 = vsyncpa [#allocation9], 1 }
 0x298   :  { %2829 = vsyncpa [#allocation4], 1 }

</bundles_post_ra>
